<compile_context>
chip_gen: v7x
topology: tpu7x:2x2x1
jax: 0.10.0
libtpu: 0.0.40
codegen_flags: <defaults>
</compile_context>

<pallas_src>
import functools

import jax
import jax.numpy as jnp
from jax.experimental import pallas as pl
from jax.experimental.pallas import tpu as pltpu

# ---------------- small synthetic BERT config ----------------
BATCH = 2
SEQ = 8
HIDDEN = 32
NUM_HEADS = 4
HEAD_DIM = HIDDEN // NUM_HEADS
INTERMEDIATE = 64
NUM_LAYERS = 2
VOCAB = 50
MAX_POS = 16
TYPE_VOCAB = 2
NUM_TYPE = 5
LN_EPS = 1e-12
M = BATCH * SEQ

_VMEM = pl.BlockSpec(memory_space=pltpu.MemorySpace.VMEM)
_SMEM = pl.BlockSpec(memory_space=pltpu.MemorySpace.SMEM)

N_ENC_REFS = 16  # number of encoder input refs shared by every kernel variant


# ---------------- in-kernel math helpers ----------------
def _layernorm(x, g, b):
    mu = jnp.mean(x, axis=-1, keepdims=True)
    d = x - mu
    var = jnp.mean(d * d, axis=-1, keepdims=True)
    return d * jax.lax.rsqrt(var + LN_EPS) * g + b


def _erf_poly(x):
    # Abramowitz & Stegun 7.1.26, |err| < 1.5e-7 (~f32 precision).
    a1, a2, a3, a4, a5 = 0.254829592, -0.284496736, 1.421413741, -1.453152027, 1.061405429
    p = 0.3275911
    ax = jnp.abs(x)
    t = 1.0 / (1.0 + p * ax)
    poly = ((((a5 * t + a4) * t + a3) * t + a2) * t + a1) * t
    y = 1.0 - poly * jnp.exp(-ax * ax)
    return jnp.where(x >= 0, y, -y)


def _gelu_exact(x):
    # Matches PyTorch / HF BERT exact-erf GELU (to f32 precision).
    return 0.5 * x * (1.0 + _erf_poly(x * 0.7071067811865476))


# ---------------- shared fused encoder body ----------------
def _encoder(enc_refs, ctx_ref):
    """Embedding-LN -> NUM_LAYERS transformer layers. Returns hidden states (M, H)."""
    (emb_ref, bias_ref, emb_g_ref, emb_b_ref,
     qkv_w_ref, qkv_b_ref, ao_w_ref, ao_b_ref,
     ln1_g_ref, ln1_b_ref, ff1_w_ref, ff1_b_ref,
     ff2_w_ref, ff2_b_ref, ln2_g_ref, ln2_b_ref) = enc_refs

    scale = 1.0 / float(HEAD_DIM) ** 0.5
    bias = bias_ref[...]                                      # (M, M) additive mask
    h = _layernorm(emb_ref[...], emb_g_ref[...], emb_b_ref[...])   # (M, H)

    for l in range(NUM_LAYERS):
        # ---- multi-head self-attention: both batch rows in one (M, M) score ----
        # Per-head Q/K/V come from pre-split weight refs (static index -> clean
        # loads, no lane-offset value slicing).
        for hh in range(NUM_HEADS):
            c0 = hh * HEAD_DIM
            q = jnp.dot(h, qkv_w_ref[l, 0, hh],
                        preferred_element_type=jnp.float32) + qkv_b_ref[l, 0, hh]
            k = jnp.dot(h, qkv_w_ref[l, 1, hh],
                        preferred_element_type=jnp.float32) + qkv_b_ref[l, 1, hh]
            v = jnp.dot(h, qkv_w_ref[l, 2, hh],
                        preferred_element_type=jnp.float32) + qkv_b_ref[l, 2, hh]
            s = jnp.einsum("md,nd->mn", q, k,
                           preferred_element_type=jnp.float32) * scale + bias
            mx = jnp.max(s, axis=-1, keepdims=True)
            p = jnp.exp(s - mx)
            p = p * pl.reciprocal(jnp.sum(p, axis=-1, keepdims=True), approx=True)
            ctx_ref[:, c0:c0 + HEAD_DIM] = jnp.dot(
                p, v, preferred_element_type=jnp.float32)      # (M, D) head context
        # Single output projection over all heads.
        attn = jnp.dot(ctx_ref[...], ao_w_ref[l],
                       preferred_element_type=jnp.float32) + ao_b_ref[l]
        h = _layernorm(attn + h, ln1_g_ref[l], ln1_b_ref[l])

        # ---- feed-forward ----
        ff = jnp.dot(h, ff1_w_ref[l], preferred_element_type=jnp.float32) + ff1_b_ref[l]
        ff = _gelu_exact(ff)
        ff = jnp.dot(ff, ff2_w_ref[l], preferred_element_type=jnp.float32) + ff2_b_ref[l]
        h = _layernorm(ff + h, ln2_g_ref[l], ln2_b_ref[l])
    return h


# ---------------- heads / losses (in-kernel) ----------------
def _qa_logits(h, qa_wt_ref, qa_b_ref):
    # start/end logits directly in (B, S) layout: lane-reduce over H on the
    # (B, S, H) view of h (sublane-split reshape is layout-neutral at (8,128)).
    h3 = h.reshape(BATCH, SEQ, HIDDEN)
    w_start = qa_wt_ref[0:1, :].reshape(1, 1, HIDDEN)
    w_end = qa_wt_ref[1:2, :].reshape(1, 1, HIDDEN)
    start = jnp.sum(h3 * w_start, axis=-1) + qa_b_ref[0]
    end = jnp.sum(h3 * w_end, axis=-1) + qa_b_ref[1]
    return start, end


def _ce_positions(logits, labels):
    # CrossEntropyLoss(ignore_index=SEQ), mean over non-ignored rows.
    mx = jnp.max(logits, axis=-1, keepdims=True)
    z = logits - mx
    logp = z - jnp.log(jnp.sum(jnp.exp(z), axis=-1, keepdims=True))
    pos = jax.lax.broadcasted_iota(jnp.int32, logits.shape, 1)
    onehot = (pos == labels).astype(jnp.float32)
    nll = -jnp.sum(onehot * logp, axis=-1, keepdims=True)          # (B, 1)
    valid = (labels != SEQ).astype(jnp.float32)
    num = jnp.sum(nll * valid, axis=0, keepdims=True)               # (1, 1)
    den = jnp.maximum(jnp.sum(valid, axis=0, keepdims=True), 1.0)
    # NOTE: all-ignored batch yields 0.0 where PyTorch CE would give NaN.
    return num / den


def _pooler(h, pooler_w_ref, pooler_b_ref):
    cls = jnp.concatenate([h[b * SEQ:b * SEQ + 1, :] for b in range(BATCH)], axis=0)
    return jnp.tanh(jnp.dot(cls, pooler_w_ref[...],
                            preferred_element_type=jnp.float32) + pooler_b_ref[...])


# ---------------- fused kernel variants (one pallas_call each) ----------------
def _trigger_kernel(*refs):
    enc, rest = refs[:N_ENC_REFS], refs[N_ENC_REFS:]
    qa_wt_ref, qa_b_ref, start_ref, end_ref, ctx_ref = rest
    h = _encoder(enc, ctx_ref)
    start, end = _qa_logits(h, qa_wt_ref, qa_b_ref)
    start_ref[...] = start
    end_ref[...] = end


def _trigger_loss_kernel(*refs):
    enc, rest = refs[:N_ENC_REFS], refs[N_ENC_REFS:]
    qa_wt_ref, qa_b_ref, sp_ref, ep_ref, start_ref, end_ref, loss_ref, ctx_ref = rest
    h = _encoder(enc, ctx_ref)
    start, end = _qa_logits(h, qa_wt_ref, qa_b_ref)
    start_ref[...] = start
    end_ref[...] = end
    loss_ref[...] = 0.5 * (_ce_positions(start, sp_ref[...])
                           + _ce_positions(end, ep_ref[...]))


def _type_kernel(*refs):
    enc, rest = refs[:N_ENC_REFS], refs[N_ENC_REFS:]
    pw_ref, pb_ref, tw_ref, tb_ref, logits_ref, ctx_ref = rest
    h = _encoder(enc, ctx_ref)
    pooled = _pooler(h, pw_ref, pb_ref)
    logits_ref[...] = jnp.dot(pooled, tw_ref[...],
                              preferred_element_type=jnp.float32) + tb_ref[...]


def _type_loss_kernel(*refs):
    enc, rest = refs[:N_ENC_REFS], refs[N_ENC_REFS:]
    pw_ref, pb_ref, tw_ref, tb_ref, lab_ref, logits_ref, loss_ref, ctx_ref = rest
    h = _encoder(enc, ctx_ref)
    pooled = _pooler(h, pw_ref, pb_ref)
    logits = jnp.dot(pooled, tw_ref[...],
                     preferred_element_type=jnp.float32) + tb_ref[...]
    logits_ref[...] = logits
    labels = lab_ref[...]                                           # (B, 1) int32
    mx = jnp.max(logits, axis=-1, keepdims=True)
    z = logits - mx
    logp = z - jnp.log(jnp.sum(jnp.exp(z), axis=-1, keepdims=True))
    cls_id = jax.lax.broadcasted_iota(jnp.int32, logits.shape, 1)
    onehot = (cls_id == labels).astype(jnp.float32)
    nll = -jnp.sum(onehot * logp, axis=-1, keepdims=True)
    valid = (labels != -100).astype(jnp.float32)
    num = jnp.sum(nll * valid, axis=0, keepdims=True)
    den = jnp.maximum(jnp.sum(valid, axis=0, keepdims=True), 1.0)
    loss_ref[...] = num / den


# ---------------- deterministic parameter init (HF-like layout) ----------------
def init_params(key):
    def dense(k, shape):
        return 0.02 * jax.random.normal(k, shape, jnp.float32)

    keys = jax.random.split(key, 10)
    L = NUM_LAYERS
    return {
        "word_emb": dense(keys[0], (VOCAB, HIDDEN)),
        "pos_emb": dense(keys[1], (MAX_POS, HIDDEN)),
        "type_emb": dense(keys[2], (TYPE_VOCAB, HIDDEN)),
        "emb_ln_g": jnp.ones((HIDDEN,), jnp.float32),
        "emb_ln_b": jnp.zeros((HIDDEN,), jnp.float32),
        "qkv_w": dense(keys[3], (L, HIDDEN, 3 * HIDDEN)),
        "qkv_b": jnp.zeros((L, 3 * HIDDEN), jnp.float32),
        "attn_o_w": dense(keys[4], (L, HIDDEN, HIDDEN)),
        "attn_o_b": jnp.zeros((L, HIDDEN), jnp.float32),
        "ln1_g": jnp.ones((L, HIDDEN), jnp.float32),
        "ln1_b": jnp.zeros((L, HIDDEN), jnp.float32),
        "ff1_w": dense(keys[5], (L, HIDDEN, INTERMEDIATE)),
        "ff1_b": jnp.zeros((L, INTERMEDIATE), jnp.float32),
        "ff2_w": dense(keys[6], (L, INTERMEDIATE, HIDDEN)),
        "ff2_b": jnp.zeros((L, HIDDEN), jnp.float32),
        "ln2_g": jnp.ones((L, HIDDEN), jnp.float32),
        "ln2_b": jnp.zeros((L, HIDDEN), jnp.float32),
        "pooler_w": dense(keys[7], (HIDDEN, HIDDEN)),
        "pooler_b": jnp.zeros((HIDDEN,), jnp.float32),
        "qa_w": dense(keys[8], (HIDDEN, 2)),           # nn.Linear(hidden, 2)
        "qa_b": jnp.zeros((2,), jnp.float32),
        "type_w": dense(keys[9], (HIDDEN, NUM_TYPE)),  # nn.Linear(hidden, num_type)
        "type_b": jnp.zeros((NUM_TYPE,), jnp.float32),
    }


def prepare_params(p):
    """One-time host-side re-layout into the kernel-ready (per-head split) format."""
    L, NH, D = NUM_LAYERS, NUM_HEADS, HEAD_DIM
    return {
        "word_emb": p["word_emb"], "pos_emb": p["pos_emb"], "type_emb": p["type_emb"],
        "emb_ln_g": p["emb_ln_g"].reshape(1, HIDDEN),
        "emb_ln_b": p["emb_ln_b"].reshape(1, HIDDEN),
        # (L, 3, NH, H, D): static ref indexing per layer / q-k-v / head.
        "qkv_w_h": p["qkv_w"].reshape(L, HIDDEN, 3, NH, D).transpose(0, 2, 3, 1, 4),
        "qkv_b_h": p["qkv_b"].reshape(L, 3, NH, 1, D),
        "ao_w": p["attn_o_w"],
        "ao_b": p["attn_o_b"].reshape(L, 1, HIDDEN),
        "ln1_g": p["ln1_g"].reshape(L, 1, HIDDEN), "ln1_b": p["ln1_b"].reshape(L, 1, HIDDEN),
        "ff1_w": p["ff1_w"], "ff1_b": p["ff1_b"].reshape(L, 1, INTERMEDIATE),
        "ff2_w": p["ff2_w"], "ff2_b": p["ff2_b"].reshape(L, 1, HIDDEN),
        "ln2_g": p["ln2_g"].reshape(L, 1, HIDDEN), "ln2_b": p["ln2_b"].reshape(L, 1, HIDDEN),
        "pooler_w": p["pooler_w"], "pooler_b": p["pooler_b"].reshape(1, HIDDEN),
        "qa_wt": p["qa_w"].T,                          # (2, H) row0=start row1=end
        "qa_b": p["qa_b"].astype(jnp.float32),         # (2,) -> SMEM scalars
        "type_w": p["type_w"], "type_b": p["type_b"].reshape(1, NUM_TYPE),
    }


# ---------------- forward wrapper ----------------
def _encoder_inputs(kp, input_ids, token_type_ids, attention_mask):
    B, S = input_ids.shape
    positions = jnp.arange(S)[None, :]
    # embedding gathers are glue (plain JAX)
    emb = (kp["word_emb"][input_ids]
           + kp["pos_emb"][positions]
           + kp["type_emb"][token_type_ids]).astype(jnp.float32).reshape(B * S, HIDDEN)
    # (M, M) additive bias: attention-mask bias along keys + block-diagonal
    # cross-batch mask so both examples share one score matrix per head.
    key_bias = (1.0 - attention_mask.astype(jnp.float32)).reshape(B * S) * -1e4
    row_batch = jnp.repeat(jnp.arange(B), S)
    block = jnp.where(row_batch[:, None] == row_batch[None, :], 0.0, -1e4)
    attn_bias = block + key_bias[None, :]
    return (emb, attn_bias,
            kp["emb_ln_g"], kp["emb_ln_b"],
            kp["qkv_w_h"], kp["qkv_b_h"],
            kp["ao_w"], kp["ao_b"],
            kp["ln1_g"], kp["ln1_b"],
            kp["ff1_w"], kp["ff1_b"],
            kp["ff2_w"], kp["ff2_b"],
            kp["ln2_g"], kp["ln2_b"])


@functools.partial(jax.jit, static_argnames=("task_type",))
def bert_for_event_trigger_and_type(kparams, input_ids, token_type_ids=None,
                                    attention_mask=None, start_positions=None,
                                    end_positions=None, type=None,
                                    task_type="trigger_task"):
    B, S = input_ids.shape
    if token_type_ids is None:
        token_type_ids = jnp.zeros_like(input_ids)
    if attention_mask is None:
        attention_mask = jnp.ones_like(input_ids)

    enc_in = _encoder_inputs(kparams, input_ids, token_type_ids, attention_mask)
    enc_specs = [_VMEM] * N_ENC_REFS
    scratch = [pltpu.VMEM((M, HIDDEN), jnp.float32)]   # per-layer attention context

    final = {}
    if task_type != "type_task":
        qa_in = (kparams["qa_wt"], kparams["qa_b"])
        qa_specs = [_VMEM, _SMEM]
        if start_positions is not None and end_positions is not None:
            ignored_index = S                          # start_logits.size(1)
            sp = jnp.clip(start_positions.reshape(B, 1), 0, ignored_index).astype(jnp.int32)
            ep = jnp.clip(end_positions.reshape(B, 1), 0, ignored_index).astype(jnp.int32)
            start_logits, end_logits, loss = pl.pallas_call(
                _trigger_loss_kernel,
                out_shape=(jax.ShapeDtypeStruct((B, S), jnp.float32),
                           jax.ShapeDtypeStruct((B, S), jnp.float32),
                           jax.ShapeDtypeStruct((1, 1), jnp.float32)),
                in_specs=enc_specs + qa_specs + [_VMEM, _VMEM],
                out_specs=(_VMEM, _VMEM, _VMEM),
                scratch_shapes=scratch,
            )(*enc_in, *qa_in, sp, ep)
            final["loss"] = loss[0, 0]
        else:
            start_logits, end_logits = pl.pallas_call(
                _trigger_kernel,
                out_shape=(jax.ShapeDtypeStruct((B, S), jnp.float32),
                           jax.ShapeDtypeStruct((B, S), jnp.float32)),
                in_specs=enc_specs + qa_specs,
                out_specs=(_VMEM, _VMEM),
                scratch_shapes=scratch,
            )(*enc_in, *qa_in)
        final["start_logits"] = start_logits
        final["end_logits"] = end_logits
    else:
        head_in = (kparams["pooler_w"], kparams["pooler_b"],
                   kparams["type_w"], kparams["type_b"])
        head_specs = [_VMEM] * 4
        if type is not None:
            labels = type.reshape(B, 1).astype(jnp.int32)
            type_logits, loss = pl.pallas_call(
                _type_loss_kernel,
                out_shape=(jax.ShapeDtypeStruct((B, NUM_TYPE), jnp.float32),
                           jax.ShapeDtypeStruct((1, 1), jnp.float32)),
                in_specs=enc_specs + head_specs + [_VMEM],
                out_specs=(_VMEM, _VMEM),
                scratch_shapes=scratch,
            )(*enc_in, *head_in, labels)
            final["loss"] = loss[0, 0]
        else:
            type_logits = pl.pallas_call(
                _type_kernel,
                out_shape=jax.ShapeDtypeStruct((B, NUM_TYPE), jnp.float32),
                in_specs=enc_specs + head_specs,
                out_specs=_VMEM,
                scratch_shapes=scratch,
            )(*enc_in, *head_in)
        final["type_logits"] = type_logits
    return final


if __name__ == "__main__":
    key = jax.random.PRNGKey(0)
    pkey, ikey, tkey, skey, ekey, ykey = jax.random.split(key, 6)
    kparams = prepare_params(init_params(pkey))

    input_ids = jax.random.randint(ikey, (BATCH, SEQ), 0, VOCAB)
    token_type_ids = jax.random.randint(tkey, (BATCH, SEQ), 0, TYPE_VOCAB)
    attention_mask = jnp.ones((BATCH, SEQ), jnp.int32)
    start_positions = jax.random.randint(skey, (BATCH,), 0, SEQ)
    end_positions = jax.random.randint(ekey, (BATCH,), 0, SEQ)
    type_labels = jax.random.randint(ykey, (BATCH,), 0, NUM_TYPE)

    # trigger task (with and without labels) and type task (with and without labels)
    trig = bert_for_event_trigger_and_type(
        kparams, input_ids, token_type_ids, attention_mask,
        start_positions=start_positions, end_positions=end_positions,
        task_type="trigger_task")
    trig_nolab = bert_for_event_trigger_and_type(
        kparams, input_ids, token_type_ids, attention_mask,
        task_type="trigger_task")
    typ = bert_for_event_trigger_and_type(
        kparams, input_ids, token_type_ids, attention_mask,
        type=type_labels, task_type="type_task")
    typ_nolab = bert_for_event_trigger_and_type(
        kparams, input_ids, token_type_ids, attention_mask,
        task_type="type_task")

    jax.block_until_ready((trig, trig_nolab, typ, typ_nolab))
    assert trig["start_logits"].shape == (BATCH, SEQ)
    assert trig["end_logits"].shape == (BATCH, SEQ)
    assert trig_nolab["start_logits"].shape == (BATCH, SEQ)
    assert typ["type_logits"].shape == (BATCH, NUM_TYPE)
    assert typ_nolab["type_logits"].shape == (BATCH, NUM_TYPE)
    assert bool(jnp.isfinite(trig["loss"]))
    assert bool(jnp.isfinite(typ["loss"]))
    print("KERNEL_OK")
</pallas_src>

<mosaic_0001>
module attributes {stable_mosaic.version = 11 : i64} {
  func.func @_trigger_loss_kernel(%arg0: memref<16x32xf32, #tpu.memory_space<vmem>>, %arg1: memref<16x16xf32, #tpu.memory_space<vmem>>, %arg2: memref<1x32xf32, #tpu.memory_space<vmem>>, %arg3: memref<1x32xf32, #tpu.memory_space<vmem>>, %arg4: memref<2x3x4x32x8xf32, #tpu.memory_space<vmem>>, %arg5: memref<2x3x4x1x8xf32, #tpu.memory_space<vmem>>, %arg6: memref<2x32x32xf32, #tpu.memory_space<vmem>>, %arg7: memref<2x1x32xf32, #tpu.memory_space<vmem>>, %arg8: memref<2x1x32xf32, #tpu.memory_space<vmem>>, %arg9: memref<2x1x32xf32, #tpu.memory_space<vmem>>, %arg10: memref<2x32x64xf32, #tpu.memory_space<vmem>>, %arg11: memref<2x1x64xf32, #tpu.memory_space<vmem>>, %arg12: memref<2x64x32xf32, #tpu.memory_space<vmem>>, %arg13: memref<2x1x32xf32, #tpu.memory_space<vmem>>, %arg14: memref<2x1x32xf32, #tpu.memory_space<vmem>>, %arg15: memref<2x1x32xf32, #tpu.memory_space<vmem>>, %arg16: memref<2x32xf32, #tpu.memory_space<vmem>>, %arg17: memref<2xf32, #tpu.memory_space<smem>>, %arg18: memref<2x1xi32, #tpu.memory_space<vmem>>, %arg19: memref<2x1xi32, #tpu.memory_space<vmem>>, %arg20: memref<2x8xf32, #tpu.memory_space<vmem>>, %arg21: memref<2x8xf32, #tpu.memory_space<vmem>>, %arg22: memref<1x1xf32, #tpu.memory_space<vmem>>, %arg23: memref<16x32xf32, #tpu.memory_space<vmem>>) attributes {dimension_semantics = [], scalar_prefetch = 0 : i64, scratch_operands = 1 : i64, tpu.core_type = #tpu.core_type<tc>} {
    %c0 = arith.constant 0 : index
    %c0_0 = arith.constant 0 : index
    %0 = vector.load %arg1[%c0, %c0_0] : memref<16x16xf32, #tpu.memory_space<vmem>>, vector<16x16xf32>
    %c0_1 = arith.constant 0 : index
    %c0_2 = arith.constant 0 : index
    %1 = vector.load %arg0[%c0_1, %c0_2] : memref<16x32xf32, #tpu.memory_space<vmem>>, vector<16x32xf32>
    %c0_3 = arith.constant 0 : index
    %c0_4 = arith.constant 0 : index
    %2 = vector.load %arg2[%c0_3, %c0_4] : memref<1x32xf32, #tpu.memory_space<vmem>>, vector<1x32xf32>
    %c0_5 = arith.constant 0 : index
    %c0_6 = arith.constant 0 : index
    %3 = vector.load %arg3[%c0_5, %c0_6] : memref<1x32xf32, #tpu.memory_space<vmem>>, vector<1x32xf32>
    %cst = arith.constant dense<0.000000e+00> : vector<16xf32>
    %4 = vector.multi_reduction <add>, %1, %cst [1] : vector<16x32xf32> to vector<16xf32>
    %5 = vector.shape_cast %4 : vector<16xf32> to vector<16x1xf32>
    %cst_7 = arith.constant 3.200000e+01 : f32
    %6 = vector.broadcast %cst_7 : f32 to vector<16x1xf32>
    %7 = arith.divf %5, %6 : vector<16x1xf32>
    %8 = vector.broadcast %7 : vector<16x1xf32> to vector<16x32xf32>
    %9 = arith.subf %1, %8 : vector<16x32xf32>
    %10 = arith.mulf %9, %9 : vector<16x32xf32>
    %cst_8 = arith.constant dense<0.000000e+00> : vector<16xf32>
    %11 = vector.multi_reduction <add>, %10, %cst_8 [1] : vector<16x32xf32> to vector<16xf32>
    %12 = vector.shape_cast %11 : vector<16xf32> to vector<16x1xf32>
    %cst_9 = arith.constant 3.200000e+01 : f32
    %13 = vector.broadcast %cst_9 : f32 to vector<16x1xf32>
    %14 = arith.divf %12, %13 : vector<16x1xf32>
    %cst_10 = arith.constant 9.99999996E-13 : f32
    %15 = vector.broadcast %cst_10 : f32 to vector<16x1xf32>
    %16 = arith.addf %14, %15 : vector<16x1xf32>
    %17 = math.rsqrt %16 : vector<16x1xf32>
    %18 = vector.broadcast %17 : vector<16x1xf32> to vector<16x32xf32>
    %19 = arith.mulf %9, %18 : vector<16x32xf32>
    %20 = vector.broadcast %2 : vector<1x32xf32> to vector<16x32xf32>
    %21 = arith.mulf %19, %20 : vector<16x32xf32>
    %22 = vector.broadcast %3 : vector<1x32xf32> to vector<16x32xf32>
    %23 = arith.addf %21, %22 : vector<16x32xf32>
    %c0_11 = arith.constant 0 : index
    %c0_12 = arith.constant 0 : index
    %c0_13 = arith.constant 0 : index
    %c0_14 = arith.constant 0 : index
    %c0_15 = arith.constant 0 : index
    %24 = vector.load %arg4[%c0_11, %c0_12, %c0_13, %c0_14, %c0_15] : memref<2x3x4x32x8xf32, #tpu.memory_space<vmem>>, vector<1x1x1x32x8xf32>
    %25 = vector.shape_cast %24 : vector<1x1x1x32x8xf32> to vector<32x8xf32>
    %cst_16 = arith.constant dense<0.000000e+00> : vector<16x8xf32>
    %26 = tpu.matmul %23, %25, %cst_16 {dimension_numbers = #tpu.dot_dimension_numbers<[1], [0], [0], [1], [0, 0, 1, 1], [], []>} : vector<16x32xf32>, vector<32x8xf32>, vector<16x8xf32> -> vector<16x8xf32>
    %c0_17 = arith.constant 0 : index
    %c0_18 = arith.constant 0 : index
    %c0_19 = arith.constant 0 : index
    %c0_20 = arith.constant 0 : index
    %c0_21 = arith.constant 0 : index
    %27 = vector.load %arg5[%c0_17, %c0_18, %c0_19, %c0_20, %c0_21] : memref<2x3x4x1x8xf32, #tpu.memory_space<vmem>>, vector<1x1x1x1x8xf32>
    %28 = vector.shape_cast %27 : vector<1x1x1x1x8xf32> to vector<1x8xf32>
    %29 = vector.broadcast %28 : vector<1x8xf32> to vector<16x8xf32>
    %30 = arith.addf %26, %29 : vector<16x8xf32>
    %c0_22 = arith.constant 0 : index
    %c1 = arith.constant 1 : index
    %c0_23 = arith.constant 0 : index
    %c0_24 = arith.constant 0 : index
    %c0_25 = arith.constant 0 : index
    %31 = vector.load %arg4[%c0_22, %c1, %c0_23, %c0_24, %c0_25] : memref<2x3x4x32x8xf32, #tpu.memory_space<vmem>>, vector<1x1x1x32x8xf32>
    %32 = vector.shape_cast %31 : vector<1x1x1x32x8xf32> to vector<32x8xf32>
    %cst_26 = arith.constant dense<0.000000e+00> : vector<16x8xf32>
    %33 = tpu.matmul %23, %32, %cst_26 {dimension_numbers = #tpu.dot_dimension_numbers<[1], [0], [0], [1], [0, 0, 1, 1], [], []>} : vector<16x32xf32>, vector<32x8xf32>, vector<16x8xf32> -> vector<16x8xf32>
    %c0_27 = arith.constant 0 : index
    %c1_28 = arith.constant 1 : index
    %c0_29 = arith.constant 0 : index
    %c0_30 = arith.constant 0 : index
    %c0_31 = arith.constant 0 : index
    %34 = vector.load %arg5[%c0_27, %c1_28, %c0_29, %c0_30, %c0_31] : memref<2x3x4x1x8xf32, #tpu.memory_space<vmem>>, vector<1x1x1x1x8xf32>
    %35 = vector.shape_cast %34 : vector<1x1x1x1x8xf32> to vector<1x8xf32>
    %36 = vector.broadcast %35 : vector<1x8xf32> to vector<16x8xf32>
    %37 = arith.addf %33, %36 : vector<16x8xf32>
    %c0_32 = arith.constant 0 : index
    %c2 = arith.constant 2 : index
    %c0_33 = arith.constant 0 : index
    %c0_34 = arith.constant 0 : index
    %c0_35 = arith.constant 0 : index
    %38 = vector.load %arg4[%c0_32, %c2, %c0_33, %c0_34, %c0_35] : memref<2x3x4x32x8xf32, #tpu.memory_space<vmem>>, vector<1x1x1x32x8xf32>
    %39 = vector.shape_cast %38 : vector<1x1x1x32x8xf32> to vector<32x8xf32>
    %cst_36 = arith.constant dense<0.000000e+00> : vector<16x8xf32>
    %40 = tpu.matmul %23, %39, %cst_36 {dimension_numbers = #tpu.dot_dimension_numbers<[1], [0], [0], [1], [0, 0, 1, 1], [], []>} : vector<16x32xf32>, vector<32x8xf32>, vector<16x8xf32> -> vector<16x8xf32>
    %c0_37 = arith.constant 0 : index
    %c2_38 = arith.constant 2 : index
    %c0_39 = arith.constant 0 : index
    %c0_40 = arith.constant 0 : index
    %c0_41 = arith.constant 0 : index
    %41 = vector.load %arg5[%c0_37, %c2_38, %c0_39, %c0_40, %c0_41] : memref<2x3x4x1x8xf32, #tpu.memory_space<vmem>>, vector<1x1x1x1x8xf32>
    %42 = vector.shape_cast %41 : vector<1x1x1x1x8xf32> to vector<1x8xf32>
    %43 = vector.broadcast %42 : vector<1x8xf32> to vector<16x8xf32>
    %44 = arith.addf %40, %43 : vector<16x8xf32>
    "tpu.trace_start"() <{level = 10 : i32, message = "md,nd->mn"}> : () -> ()
    %cst_42 = arith.constant dense<0.000000e+00> : vector<16x16xf32>
    %45 = tpu.matmul %30, %37, %cst_42 {dimension_numbers = #tpu.dot_dimension_numbers<[1], [1], [0], [0], [0, 0, 1, 0], [], []>} : vector<16x8xf32>, vector<16x8xf32>, vector<16x16xf32> -> vector<16x16xf32>
    "tpu.trace_stop"() : () -> ()
    %cst_43 = arith.constant 0.353553385 : f32
    %46 = vector.broadcast %cst_43 : f32 to vector<16x16xf32>
    %47 = arith.mulf %45, %46 : vector<16x16xf32>
    %48 = arith.addf %47, %0 : vector<16x16xf32>
    %cst_44 = arith.constant dense<0xFF800000> : vector<16xf32>
    %49 = vector.multi_reduction <maximumf>, %48, %cst_44 [1] : vector<16x16xf32> to vector<16xf32>
    %50 = vector.shape_cast %49 : vector<16xf32> to vector<16x1xf32>
    %51 = vector.broadcast %50 : vector<16x1xf32> to vector<16x16xf32>
    %52 = arith.subf %48, %51 : vector<16x16xf32>
    %53 = math.exp %52 : vector<16x16xf32>
    %cst_45 = arith.constant dense<0.000000e+00> : vector<16xf32>
    %54 = vector.multi_reduction <add>, %53, %cst_45 [1] : vector<16x16xf32> to vector<16xf32>
    %55 = vector.shape_cast %54 : vector<16xf32> to vector<16x1xf32>
    %56 = tpu.reciprocal %55 {approx = true} : vector<16x1xf32> -> vector<16x1xf32>
    %57 = vector.broadcast %56 : vector<16x1xf32> to vector<16x16xf32>
    %58 = arith.mulf %53, %57 : vector<16x16xf32>
    %cst_46 = arith.constant dense<0.000000e+00> : vector<16x8xf32>
    %59 = tpu.matmul %58, %44, %cst_46 {dimension_numbers = #tpu.dot_dimension_numbers<[1], [0], [0], [1], [0, 0, 1, 1], [], []>} : vector<16x16xf32>, vector<16x8xf32>, vector<16x8xf32> -> vector<16x8xf32>
    %c0_47 = arith.constant 0 : index
    %c0_48 = arith.constant 0 : index
    %60 = vector.load %arg23[%c0_47, %c0_48] : memref<16x32xf32, #tpu.memory_space<vmem>>, vector<16x8xf32>
    tpu.vector_store %arg23[%c0_47, %c0_48], %59 {strides = array<i32>} : memref<16x32xf32, #tpu.memory_space<vmem>>, vector<16x8xf32>,
    %c0_49 = arith.constant 0 : index
    %c0_50 = arith.constant 0 : index
    %c1_51 = arith.constant 1 : index
    %c0_52 = arith.constant 0 : index
    %c0_53 = arith.constant 0 : index
    %61 = vector.load %arg4[%c0_49, %c0_50, %c1_51, %c0_52, %c0_53] : memref<2x3x4x32x8xf32, #tpu.memory_space<vmem>>, vector<1x1x1x32x8xf32>
    %62 = vector.shape_cast %61 : vector<1x1x1x32x8xf32> to vector<32x8xf32>
    %cst_54 = arith.constant dense<0.000000e+00> : vector<16x8xf32>
    %63 = tpu.matmul %23, %62, %cst_54 {dimension_numbers = #tpu.dot_dimension_numbers<[1], [0], [0], [1], [0, 0, 1, 1], [], []>} : vector<16x32xf32>, vector<32x8xf32>, vector<16x8xf32> -> vector<16x8xf32>
    %c0_55 = arith.constant 0 : index
    %c0_56 = arith.constant 0 : index
    %c1_57 = arith.constant 1 : index
    %c0_58 = arith.constant 0 : index
    %c0_59 = arith.constant 0 : index
    %64 = vector.load %arg5[%c0_55, %c0_56, %c1_57, %c0_58, %c0_59] : memref<2x3x4x1x8xf32, #tpu.memory_space<vmem>>, vector<1x1x1x1x8xf32>
    %65 = vector.shape_cast %64 : vector<1x1x1x1x8xf32> to vector<1x8xf32>
    %66 = vector.broadcast %65 : vector<1x8xf32> to vector<16x8xf32>
    %67 = arith.addf %63, %66 : vector<16x8xf32>
    %c0_60 = arith.constant 0 : index
    %c1_61 = arith.constant 1 : index
    %c1_62 = arith.constant 1 : index
    %c0_63 = arith.constant 0 : index
    %c0_64 = arith.constant 0 : index
    %68 = vector.load %arg4[%c0_60, %c1_61, %c1_62, %c0_63, %c0_64] : memref<2x3x4x32x8xf32, #tpu.memory_space<vmem>>, vector<1x1x1x32x8xf32>
    %69 = vector.shape_cast %68 : vector<1x1x1x32x8xf32> to vector<32x8xf32>
    %cst_65 = arith.constant dense<0.000000e+00> : vector<16x8xf32>
    %70 = tpu.matmul %23, %69, %cst_65 {dimension_numbers = #tpu.dot_dimension_numbers<[1], [0], [0], [1], [0, 0, 1, 1], [], []>} : vector<16x32xf32>, vector<32x8xf32>, vector<16x8xf32> -> vector<16x8xf32>
    %c0_66 = arith.constant 0 : index
    %c1_67 = arith.constant 1 : index
    %c1_68 = arith.constant 1 : index
    %c0_69 = arith.constant 0 : index
    %c0_70 = arith.constant 0 : index
    %71 = vector.load %arg5[%c0_66, %c1_67, %c1_68, %c0_69, %c0_70] : memref<2x3x4x1x8xf32, #tpu.memory_space<vmem>>, vector<1x1x1x1x8xf32>
    %72 = vector.shape_cast %71 : vector<1x1x1x1x8xf32> to vector<1x8xf32>
    %73 = vector.broadcast %72 : vector<1x8xf32> to vector<16x8xf32>
    %74 = arith.addf %70, %73 : vector<16x8xf32>
    %c0_71 = arith.constant 0 : index
    %c2_72 = arith.constant 2 : index
    %c1_73 = arith.constant 1 : index
    %c0_74 = arith.constant 0 : index
    %c0_75 = arith.constant 0 : index
    %75 = vector.load %arg4[%c0_71, %c2_72, %c1_73, %c0_74, %c0_75] : memref<2x3x4x32x8xf32, #tpu.memory_space<vmem>>, vector<1x1x1x32x8xf32>
    %76 = vector.shape_cast %75 : vector<1x1x1x32x8xf32> to vector<32x8xf32>
    %cst_76 = arith.constant dense<0.000000e+00> : vector<16x8xf32>
    %77 = tpu.matmul %23, %76, %cst_76 {dimension_numbers = #tpu.dot_dimension_numbers<[1], [0], [0], [1], [0, 0, 1, 1], [], []>} : vector<16x32xf32>, vector<32x8xf32>, vector<16x8xf32> -> vector<16x8xf32>
    %c0_77 = arith.constant 0 : index
    %c2_78 = arith.constant 2 : index
    %c1_79 = arith.constant 1 : index
    %c0_80 = arith.constant 0 : index
    %c0_81 = arith.constant 0 : index
    %78 = vector.load %arg5[%c0_77, %c2_78, %c1_79, %c0_80, %c0_81] : memref<2x3x4x1x8xf32, #tpu.memory_space<vmem>>, vector<1x1x1x1x8xf32>
    %79 = vector.shape_cast %78 : vector<1x1x1x1x8xf32> to vector<1x8xf32>
    %80 = vector.broadcast %79 : vector<1x8xf32> to vector<16x8xf32>
    %81 = arith.addf %77, %80 : vector<16x8xf32>
    "tpu.trace_start"() <{level = 10 : i32, message = "md,nd->mn"}> : () -> ()
    %cst_82 = arith.constant dense<0.000000e+00> : vector<16x16xf32>
    %82 = tpu.matmul %67, %74, %cst_82 {dimension_numbers = #tpu.dot_dimension_numbers<[1], [1], [0], [0], [0, 0, 1, 0], [], []>} : vector<16x8xf32>, vector<16x8xf32>, vector<16x16xf32> -> vector<16x16xf32>
    "tpu.trace_stop"() : () -> ()
    %cst_83 = arith.constant 0.353553385 : f32
    %83 = vector.broadcast %cst_83 : f32 to vector<16x16xf32>
    %84 = arith.mulf %82, %83 : vector<16x16xf32>
    %85 = arith.addf %84, %0 : vector<16x16xf32>
    %cst_84 = arith.constant dense<0xFF800000> : vector<16xf32>
    %86 = vector.multi_reduction <maximumf>, %85, %cst_84 [1] : vector<16x16xf32> to vector<16xf32>
    %87 = vector.shape_cast %86 : vector<16xf32> to vector<16x1xf32>
    %88 = vector.broadcast %87 : vector<16x1xf32> to vector<16x16xf32>
    %89 = arith.subf %85, %88 : vector<16x16xf32>
    %90 = math.exp %89 : vector<16x16xf32>
    %cst_85 = arith.constant dense<0.000000e+00> : vector<16xf32>
    %91 = vector.multi_reduction <add>, %90, %cst_85 [1] : vector<16x16xf32> to vector<16xf32>
    %92 = vector.shape_cast %91 : vector<16xf32> to vector<16x1xf32>
    %93 = tpu.reciprocal %92 {approx = true} : vector<16x1xf32> -> vector<16x1xf32>
    %94 = vector.broadcast %93 : vector<16x1xf32> to vector<16x16xf32>
    %95 = arith.mulf %90, %94 : vector<16x16xf32>
    %cst_86 = arith.constant dense<0.000000e+00> : vector<16x8xf32>
    %96 = tpu.matmul %95, %81, %cst_86 {dimension_numbers = #tpu.dot_dimension_numbers<[1], [0], [0], [1], [0, 0, 1, 1], [], []>} : vector<16x16xf32>, vector<16x8xf32>, vector<16x8xf32> -> vector<16x8xf32>
    %c0_87 = arith.constant 0 : index
    %c8 = arith.constant 8 : index
    %97 = vector.load %arg23[%c0_87, %c8] : memref<16x32xf32, #tpu.memory_space<vmem>>, vector<16x8xf32>
    tpu.vector_store %arg23[%c0_87, %c8], %96 {strides = array<i32>} : memref<16x32xf32, #tpu.memory_space<vmem>>, vector<16x8xf32>,
    %c0_88 = arith.constant 0 : index
    %c0_89 = arith.constant 0 : index
    %c2_90 = arith.constant 2 : index
    %c0_91 = arith.constant 0 : index
    %c0_92 = arith.constant 0 : index
    %98 = vector.load %arg4[%c0_88, %c0_89, %c2_90, %c0_91, %c0_92] : memref<2x3x4x32x8xf32, #tpu.memory_space<vmem>>, vector<1x1x1x32x8xf32>
    %99 = vector.shape_cast %98 : vector<1x1x1x32x8xf32> to vector<32x8xf32>
    %cst_93 = arith.constant dense<0.000000e+00> : vector<16x8xf32>
    %100 = tpu.matmul %23, %99, %cst_93 {dimension_numbers = #tpu.dot_dimension_numbers<[1], [0], [0], [1], [0, 0, 1, 1], [], []>} : vector<16x32xf32>, vector<32x8xf32>, vector<16x8xf32> -> vector<16x8xf32>
    %c0_94 = arith.constant 0 : index
    %c0_95 = arith.constant 0 : index
    %c2_96 = arith.constant 2 : index
    %c0_97 = arith.constant 0 : index
    %c0_98 = arith.constant 0 : index
    %101 = vector.load %arg5[%c0_94, %c0_95, %c2_96, %c0_97, %c0_98] : memref<2x3x4x1x8xf32, #tpu.memory_space<vmem>>, vector<1x1x1x1x8xf32>
    %102 = vector.shape_cast %101 : vector<1x1x1x1x8xf32> to vector<1x8xf32>
    %103 = vector.broadcast %102 : vector<1x8xf32> to vector<16x8xf32>
    %104 = arith.addf %100, %103 : vector<16x8xf32>
    %c0_99 = arith.constant 0 : index
    %c1_100 = arith.constant 1 : index
    %c2_101 = arith.constant 2 : index
    %c0_102 = arith.constant 0 : index
    %c0_103 = arith.constant 0 : index
    %105 = vector.load %arg4[%c0_99, %c1_100, %c2_101, %c0_102, %c0_103] : memref<2x3x4x32x8xf32, #tpu.memory_space<vmem>>, vector<1x1x1x32x8xf32>
    %106 = vector.shape_cast %105 : vector<1x1x1x32x8xf32> to vector<32x8xf32>
    %cst_104 = arith.constant dense<0.000000e+00> : vector<16x8xf32>
    %107 = tpu.matmul %23, %106, %cst_104 {dimension_numbers = #tpu.dot_dimension_numbers<[1], [0], [0], [1], [0, 0, 1, 1], [], []>} : vector<16x32xf32>, vector<32x8xf32>, vector<16x8xf32> -> vector<16x8xf32>
    %c0_105 = arith.constant 0 : index
    %c1_106 = arith.constant 1 : index
    %c2_107 = arith.constant 2 : index
    %c0_108 = arith.constant 0 : index
    %c0_109 = arith.constant 0 : index
    %108 = vector.load %arg5[%c0_105, %c1_106, %c2_107, %c0_108, %c0_109] : memref<2x3x4x1x8xf32, #tpu.memory_space<vmem>>, vector<1x1x1x1x8xf32>
    %109 = vector.shape_cast %108 : vector<1x1x1x1x8xf32> to vector<1x8xf32>
    %110 = vector.broadcast %109 : vector<1x8xf32> to vector<16x8xf32>
    %111 = arith.addf %107, %110 : vector<16x8xf32>
    %c0_110 = arith.constant 0 : index
    %c2_111 = arith.constant 2 : index
    %c2_112 = arith.constant 2 : index
    %c0_113 = arith.constant 0 : index
    %c0_114 = arith.constant 0 : index
    %112 = vector.load %arg4[%c0_110, %c2_111, %c2_112, %c0_113, %c0_114] : memref<2x3x4x32x8xf32, #tpu.memory_space<vmem>>, vector<1x1x1x32x8xf32>
    %113 = vector.shape_cast %112 : vector<1x1x1x32x8xf32> to vector<32x8xf32>
    %cst_115 = arith.constant dense<0.000000e+00> : vector<16x8xf32>
    %114 = tpu.matmul %23, %113, %cst_115 {dimension_numbers = #tpu.dot_dimension_numbers<[1], [0], [0], [1], [0, 0, 1, 1], [], []>} : vector<16x32xf32>, vector<32x8xf32>, vector<16x8xf32> -> vector<16x8xf32>
    %c0_116 = arith.constant 0 : index
    %c2_117 = arith.constant 2 : index
    %c2_118 = arith.constant 2 : index
    %c0_119 = arith.constant 0 : index
    %c0_120 = arith.constant 0 : index
    %115 = vector.load %arg5[%c0_116, %c2_117, %c2_118, %c0_119, %c0_120] : memref<2x3x4x1x8xf32, #tpu.memory_space<vmem>>, vector<1x1x1x1x8xf32>
    %116 = vector.shape_cast %115 : vector<1x1x1x1x8xf32> to vector<1x8xf32>
    %117 = vector.broadcast %116 : vector<1x8xf32> to vector<16x8xf32>
    %118 = arith.addf %114, %117 : vector<16x8xf32>
    "tpu.trace_start"() <{level = 10 : i32, message = "md,nd->mn"}> : () -> ()
    %cst_121 = arith.constant dense<0.000000e+00> : vector<16x16xf32>
    %119 = tpu.matmul %104, %111, %cst_121 {dimension_numbers = #tpu.dot_dimension_numbers<[1], [1], [0], [0], [0, 0, 1, 0], [], []>} : vector<16x8xf32>, vector<16x8xf32>, vector<16x16xf32> -> vector<16x16xf32>
    "tpu.trace_stop"() : () -> ()
    %cst_122 = arith.constant 0.353553385 : f32
    %120 = vector.broadcast %cst_122 : f32 to vector<16x16xf32>
    %121 = arith.mulf %119, %120 : vector<16x16xf32>
    %122 = arith.addf %121, %0 : vector<16x16xf32>
    %cst_123 = arith.constant dense<0xFF800000> : vector<16xf32>
    %123 = vector.multi_reduction <maximumf>, %122, %cst_123 [1] : vector<16x16xf32> to vector<16xf32>
    %124 = vector.shape_cast %123 : vector<16xf32> to vector<16x1xf32>
    %125 = vector.broadcast %124 : vector<16x1xf32> to vector<16x16xf32>
    %126 = arith.subf %122, %125 : vector<16x16xf32>
    %127 = math.exp %126 : vector<16x16xf32>
    %cst_124 = arith.constant dense<0.000000e+00> : vector<16xf32>
    %128 = vector.multi_reduction <add>, %127, %cst_124 [1] : vector<16x16xf32> to vector<16xf32>
    %129 = vector.shape_cast %128 : vector<16xf32> to vector<16x1xf32>
    %130 = tpu.reciprocal %129 {approx = true} : vector<16x1xf32> -> vector<16x1xf32>
    %131 = vector.broadcast %130 : vector<16x1xf32> to vector<16x16xf32>
    %132 = arith.mulf %127, %131 : vector<16x16xf32>
    %cst_125 = arith.constant dense<0.000000e+00> : vector<16x8xf32>
    %133 = tpu.matmul %132, %118, %cst_125 {dimension_numbers = #tpu.dot_dimension_numbers<[1], [0], [0], [1], [0, 0, 1, 1], [], []>} : vector<16x16xf32>, vector<16x8xf32>, vector<16x8xf32> -> vector<16x8xf32>
    %c0_126 = arith.constant 0 : index
    %c16 = arith.constant 16 : index
    %134 = vector.load %arg23[%c0_126, %c16] : memref<16x32xf32, #tpu.memory_space<vmem>>, vector<16x8xf32>
    tpu.vector_store %arg23[%c0_126, %c16], %133 {strides = array<i32>} : memref<16x32xf32, #tpu.memory_space<vmem>>, vector<16x8xf32>,
    %c0_127 = arith.constant 0 : index
    %c0_128 = arith.constant 0 : index
    %c3 = arith.constant 3 : index
    %c0_129 = arith.constant 0 : index
    %c0_130 = arith.constant 0 : index
    %135 = vector.load %arg4[%c0_127, %c0_128, %c3, %c0_129, %c0_130] : memref<2x3x4x32x8xf32, #tpu.memory_space<vmem>>, vector<1x1x1x32x8xf32>
    %136 = vector.shape_cast %135 : vector<1x1x1x32x8xf32> to vector<32x8xf32>
    %cst_131 = arith.constant dense<0.000000e+00> : vector<16x8xf32>
    %137 = tpu.matmul %23, %136, %cst_131 {dimension_numbers = #tpu.dot_dimension_numbers<[1], [0], [0], [1], [0, 0, 1, 1], [], []>} : vector<16x32xf32>, vector<32x8xf32>, vector<16x8xf32> -> vector<16x8xf32>
    %c0_132 = arith.constant 0 : index
    %c0_133 = arith.constant 0 : index
    %c3_134 = arith.constant 3 : index
    %c0_135 = arith.constant 0 : index
    %c0_136 = arith.constant 0 : index
    %138 = vector.load %arg5[%c0_132, %c0_133, %c3_134, %c0_135, %c0_136] : memref<2x3x4x1x8xf32, #tpu.memory_space<vmem>>, vector<1x1x1x1x8xf32>
    %139 = vector.shape_cast %138 : vector<1x1x1x1x8xf32> to vector<1x8xf32>
    %140 = vector.broadcast %139 : vector<1x8xf32> to vector<16x8xf32>
    %141 = arith.addf %137, %140 : vector<16x8xf32>
    %c0_137 = arith.constant 0 : index
    %c1_138 = arith.constant 1 : index
    %c3_139 = arith.constant 3 : index
    %c0_140 = arith.constant 0 : index
    %c0_141 = arith.constant 0 : index
    %142 = vector.load %arg4[%c0_137, %c1_138, %c3_139, %c0_140, %c0_141] : memref<2x3x4x32x8xf32, #tpu.memory_space<vmem>>, vector<1x1x1x32x8xf32>
    %143 = vector.shape_cast %142 : vector<1x1x1x32x8xf32> to vector<32x8xf32>
    %cst_142 = arith.constant dense<0.000000e+00> : vector<16x8xf32>
    %144 = tpu.matmul %23, %143, %cst_142 {dimension_numbers = #tpu.dot_dimension_numbers<[1], [0], [0], [1], [0, 0, 1, 1], [], []>} : vector<16x32xf32>, vector<32x8xf32>, vector<16x8xf32> -> vector<16x8xf32>
    %c0_143 = arith.constant 0 : index
    %c1_144 = arith.constant 1 : index
    %c3_145 = arith.constant 3 : index
    %c0_146 = arith.constant 0 : index
    %c0_147 = arith.constant 0 : index
    %145 = vector.load %arg5[%c0_143, %c1_144, %c3_145, %c0_146, %c0_147] : memref<2x3x4x1x8xf32, #tpu.memory_space<vmem>>, vector<1x1x1x1x8xf32>
    %146 = vector.shape_cast %145 : vector<1x1x1x1x8xf32> to vector<1x8xf32>
    %147 = vector.broadcast %146 : vector<1x8xf32> to vector<16x8xf32>
    %148 = arith.addf %144, %147 : vector<16x8xf32>
    %c0_148 = arith.constant 0 : index
    %c2_149 = arith.constant 2 : index
    %c3_150 = arith.constant 3 : index
    %c0_151 = arith.constant 0 : index
    %c0_152 = arith.constant 0 : index
    %149 = vector.load %arg4[%c0_148, %c2_149, %c3_150, %c0_151, %c0_152] : memref<2x3x4x32x8xf32, #tpu.memory_space<vmem>>, vector<1x1x1x32x8xf32>
    %150 = vector.shape_cast %149 : vector<1x1x1x32x8xf32> to vector<32x8xf32>
    %cst_153 = arith.constant dense<0.000000e+00> : vector<16x8xf32>
    %151 = tpu.matmul %23, %150, %cst_153 {dimension_numbers = #tpu.dot_dimension_numbers<[1], [0], [0], [1], [0, 0, 1, 1], [], []>} : vector<16x32xf32>, vector<32x8xf32>, vector<16x8xf32> -> vector<16x8xf32>
    %c0_154 = arith.constant 0 : index
    %c2_155 = arith.constant 2 : index
    %c3_156 = arith.constant 3 : index
    %c0_157 = arith.constant 0 : index
    %c0_158 = arith.constant 0 : index
    %152 = vector.load %arg5[%c0_154, %c2_155, %c3_156, %c0_157, %c0_158] : memref<2x3x4x1x8xf32, #tpu.memory_space<vmem>>, vector<1x1x1x1x8xf32>
    %153 = vector.shape_cast %152 : vector<1x1x1x1x8xf32> to vector<1x8xf32>
    %154 = vector.broadcast %153 : vector<1x8xf32> to vector<16x8xf32>
    %155 = arith.addf %151, %154 : vector<16x8xf32>
    "tpu.trace_start"() <{level = 10 : i32, message = "md,nd->mn"}> : () -> ()
    %cst_159 = arith.constant dense<0.000000e+00> : vector<16x16xf32>
    %156 = tpu.matmul %141, %148, %cst_159 {dimension_numbers = #tpu.dot_dimension_numbers<[1], [1], [0], [0], [0, 0, 1, 0], [], []>} : vector<16x8xf32>, vector<16x8xf32>, vector<16x16xf32> -> vector<16x16xf32>
    "tpu.trace_stop"() : () -> ()
    %cst_160 = arith.constant 0.353553385 : f32
    %157 = vector.broadcast %cst_160 : f32 to vector<16x16xf32>
    %158 = arith.mulf %156, %157 : vector<16x16xf32>
    %159 = arith.addf %158, %0 : vector<16x16xf32>
    %cst_161 = arith.constant dense<0xFF800000> : vector<16xf32>
    %160 = vector.multi_reduction <maximumf>, %159, %cst_161 [1] : vector<16x16xf32> to vector<16xf32>
    %161 = vector.shape_cast %160 : vector<16xf32> to vector<16x1xf32>
    %162 = vector.broadcast %161 : vector<16x1xf32> to vector<16x16xf32>
    %163 = arith.subf %159, %162 : vector<16x16xf32>
    %164 = math.exp %163 : vector<16x16xf32>
    %cst_162 = arith.constant dense<0.000000e+00> : vector<16xf32>
    %165 = vector.multi_reduction <add>, %164, %cst_162 [1] : vector<16x16xf32> to vector<16xf32>
    %166 = vector.shape_cast %165 : vector<16xf32> to vector<16x1xf32>
    %167 = tpu.reciprocal %166 {approx = true} : vector<16x1xf32> -> vector<16x1xf32>
    %168 = vector.broadcast %167 : vector<16x1xf32> to vector<16x16xf32>
    %169 = arith.mulf %164, %168 : vector<16x16xf32>
    %cst_163 = arith.constant dense<0.000000e+00> : vector<16x8xf32>
    %170 = tpu.matmul %169, %155, %cst_163 {dimension_numbers = #tpu.dot_dimension_numbers<[1], [0], [0], [1], [0, 0, 1, 1], [], []>} : vector<16x16xf32>, vector<16x8xf32>, vector<16x8xf32> -> vector<16x8xf32>
    %c0_164 = arith.constant 0 : index
    %c24 = arith.constant 24 : index
    %171 = vector.load %arg23[%c0_164, %c24] : memref<16x32xf32, #tpu.memory_space<vmem>>, vector<16x8xf32>
    tpu.vector_store %arg23[%c0_164, %c24], %170 {strides = array<i32>} : memref<16x32xf32, #tpu.memory_space<vmem>>, vector<16x8xf32>,
    %c0_165 = arith.constant 0 : index
    %c0_166 = arith.constant 0 : index
    %172 = vector.load %arg23[%c0_165, %c0_166] : memref<16x32xf32, #tpu.memory_space<vmem>>, vector<16x32xf32>
    %c0_167 = arith.constant 0 : index
    %c0_168 = arith.constant 0 : index
    %c0_169 = arith.constant 0 : index
    %173 = vector.load %arg6[%c0_167, %c0_168, %c0_169] : memref<2x32x32xf32, #tpu.memory_space<vmem>>, vector<1x32x32xf32>
    %174 = vector.shape_cast %173 : vector<1x32x32xf32> to vector<32x32xf32>
    %cst_170 = arith.constant dense<0.000000e+00> : vector<16x32xf32>
    %175 = tpu.matmul %172, %174, %cst_170 {dimension_numbers = #tpu.dot_dimension_numbers<[1], [0], [0], [1], [0, 0, 1, 1], [], []>} : vector<16x32xf32>, vector<32x32xf32>, vector<16x32xf32> -> vector<16x32xf32>
    %c0_171 = arith.constant 0 : index
    %c0_172 = arith.constant 0 : index
    %c0_173 = arith.constant 0 : index
    %176 = vector.load %arg7[%c0_171, %c0_172, %c0_173] : memref<2x1x32xf32, #tpu.memory_space<vmem>>, vector<1x1x32xf32>
    %177 = vector.shape_cast %176 : vector<1x1x32xf32> to vector<1x32xf32>
    %178 = vector.broadcast %177 : vector<1x32xf32> to vector<16x32xf32>
    %179 = arith.addf %175, %178 : vector<16x32xf32>
    %180 = arith.addf %179, %23 : vector<16x32xf32>
    %c0_174 = arith.constant 0 : index
    %c0_175 = arith.constant 0 : index
    %c0_176 = arith.constant 0 : index
    %181 = vector.load %arg8[%c0_174, %c0_175, %c0_176] : memref<2x1x32xf32, #tpu.memory_space<vmem>>, vector<1x1x32xf32>
    %182 = vector.shape_cast %181 : vector<1x1x32xf32> to vector<1x32xf32>
    %c0_177 = arith.constant 0 : index
    %c0_178 = arith.constant 0 : index
    %c0_179 = arith.constant 0 : index
    %183 = vector.load %arg9[%c0_177, %c0_178, %c0_179] : memref<2x1x32xf32, #tpu.memory_space<vmem>>, vector<1x1x32xf32>
    %184 = vector.shape_cast %183 : vector<1x1x32xf32> to vector<1x32xf32>
    %cst_180 = arith.constant dense<0.000000e+00> : vector<16xf32>
    %185 = vector.multi_reduction <add>, %180, %cst_180 [1] : vector<16x32xf32> to vector<16xf32>
    %186 = vector.shape_cast %185 : vector<16xf32> to vector<16x1xf32>
    %cst_181 = arith.constant 3.200000e+01 : f32
    %187 = vector.broadcast %cst_181 : f32 to vector<16x1xf32>
    %188 = arith.divf %186, %187 : vector<16x1xf32>
    %189 = vector.broadcast %188 : vector<16x1xf32> to vector<16x32xf32>
    %190 = arith.subf %180, %189 : vector<16x32xf32>
    %191 = arith.mulf %190, %190 : vector<16x32xf32>
    %cst_182 = arith.constant dense<0.000000e+00> : vector<16xf32>
    %192 = vector.multi_reduction <add>, %191, %cst_182 [1] : vector<16x32xf32> to vector<16xf32>
    %193 = vector.shape_cast %192 : vector<16xf32> to vector<16x1xf32>
    %cst_183 = arith.constant 3.200000e+01 : f32
    %194 = vector.broadcast %cst_183 : f32 to vector<16x1xf32>
    %195 = arith.divf %193, %194 : vector<16x1xf32>
    %cst_184 = arith.constant 9.99999996E-13 : f32
    %196 = vector.broadcast %cst_184 : f32 to vector<16x1xf32>
    %197 = arith.addf %195, %196 : vector<16x1xf32>
    %198 = math.rsqrt %197 : vector<16x1xf32>
    %199 = vector.broadcast %198 : vector<16x1xf32> to vector<16x32xf32>
    %200 = arith.mulf %190, %199 : vector<16x32xf32>
    %201 = vector.broadcast %182 : vector<1x32xf32> to vector<16x32xf32>
    %202 = arith.mulf %200, %201 : vector<16x32xf32>
    %203 = vector.broadcast %184 : vector<1x32xf32> to vector<16x32xf32>
    %204 = arith.addf %202, %203 : vector<16x32xf32>
    %c0_185 = arith.constant 0 : index
    %c0_186 = arith.constant 0 : index
    %c0_187 = arith.constant 0 : index
    %205 = vector.load %arg10[%c0_185, %c0_186, %c0_187] : memref<2x32x64xf32, #tpu.memory_space<vmem>>, vector<1x32x64xf32>
    %206 = vector.shape_cast %205 : vector<1x32x64xf32> to vector<32x64xf32>
    %cst_188 = arith.constant dense<0.000000e+00> : vector<16x64xf32>
    %207 = tpu.matmul %204, %206, %cst_188 {dimension_numbers = #tpu.dot_dimension_numbers<[1], [0], [0], [1], [0, 0, 1, 1], [], []>} : vector<16x32xf32>, vector<32x64xf32>, vector<16x64xf32> -> vector<16x64xf32>
    %c0_189 = arith.constant 0 : index
    %c0_190 = arith.constant 0 : index
    %c0_191 = arith.constant 0 : index
    %208 = vector.load %arg11[%c0_189, %c0_190, %c0_191] : memref<2x1x64xf32, #tpu.memory_space<vmem>>, vector<1x1x64xf32>
    %209 = vector.shape_cast %208 : vector<1x1x64xf32> to vector<1x64xf32>
    %210 = vector.broadcast %209 : vector<1x64xf32> to vector<16x64xf32>
    %211 = arith.addf %207, %210 : vector<16x64xf32>
    %cst_192 = arith.constant 5.000000e-01 : f32
    %212 = vector.broadcast %cst_192 : f32 to vector<16x64xf32>
    %213 = arith.mulf %212, %211 : vector<16x64xf32>
    %cst_193 = arith.constant 0.707106769 : f32
    %214 = vector.broadcast %cst_193 : f32 to vector<16x64xf32>
    %215 = arith.mulf %211, %214 : vector<16x64xf32>
    %216 = math.absf %215 : vector<16x64xf32>
    %cst_194 = arith.constant 0.327591091 : f32
    %217 = vector.broadcast %cst_194 : f32 to vector<16x64xf32>
    %218 = arith.mulf %217, %216 : vector<16x64xf32>
    %cst_195 = arith.constant 1.000000e+00 : f32
    %219 = vector.broadcast %cst_195 : f32 to vector<16x64xf32>
    %220 = arith.addf %219, %218 : vector<16x64xf32>
    %cst_196 = arith.constant 1.000000e+00 : f32
    %221 = vector.broadcast %cst_196 : f32 to vector<16x64xf32>
    %222 = arith.divf %221, %220 : vector<16x64xf32>
    %cst_197 = arith.constant 1.06140542 : f32
    %223 = vector.broadcast %cst_197 : f32 to vector<16x64xf32>
    %224 = arith.mulf %223, %222 : vector<16x64xf32>
    %cst_198 = arith.constant -1.45315206 : f32
    %225 = vector.broadcast %cst_198 : f32 to vector<16x64xf32>
    %226 = arith.addf %224, %225 : vector<16x64xf32>
    %227 = arith.mulf %226, %222 : vector<16x64xf32>
    %cst_199 = arith.constant 1.42141378 : f32
    %228 = vector.broadcast %cst_199 : f32 to vector<16x64xf32>
    %229 = arith.addf %227, %228 : vector<16x64xf32>
    %230 = arith.mulf %229, %222 : vector<16x64xf32>
    %cst_200 = arith.constant -0.284496725 : f32
    %231 = vector.broadcast %cst_200 : f32 to vector<16x64xf32>
    %232 = arith.addf %230, %231 : vector<16x64xf32>
    %233 = arith.mulf %232, %222 : vector<16x64xf32>
    %cst_201 = arith.constant 0.254829586 : f32
    %234 = vector.broadcast %cst_201 : f32 to vector<16x64xf32>
    %235 = arith.addf %233, %234 : vector<16x64xf32>
    %236 = arith.mulf %235, %222 : vector<16x64xf32>
    %cst_202 = arith.constant 0.000000e+00 : f32
    %237 = vector.broadcast %cst_202 : f32 to vector<16x64xf32>
    %238 = arith.subf %237, %216 : vector<16x64xf32>
    %239 = arith.mulf %238, %216 : vector<16x64xf32>
    %240 = math.exp %239 : vector<16x64xf32>
    %241 = arith.mulf %236, %240 : vector<16x64xf32>
    %cst_203 = arith.constant 1.000000e+00 : f32
    %242 = vector.broadcast %cst_203 : f32 to vector<16x64xf32>
    %243 = arith.subf %242, %241 : vector<16x64xf32>
    %cst_204 = arith.constant 0.000000e+00 : f32
    %244 = vector.broadcast %cst_204 : f32 to vector<16x64xf32>
    %245 = arith.cmpf oge, %215, %244 : vector<16x64xf32>
    %cst_205 = arith.constant 0.000000e+00 : f32
    %246 = vector.broadcast %cst_205 : f32 to vector<16x64xf32>
    %247 = arith.subf %246, %243 : vector<16x64xf32>
    %248 = arith.select %245, %243, %247 : vector<16x64xi1>, vector<16x64xf32>
    %cst_206 = arith.constant 1.000000e+00 : f32
    %249 = vector.broadcast %cst_206 : f32 to vector<16x64xf32>
    %250 = arith.addf %249, %248 : vector<16x64xf32>
    %251 = arith.mulf %213, %250 : vector<16x64xf32>
    %c0_207 = arith.constant 0 : index
    %c0_208 = arith.constant 0 : index
    %c0_209 = arith.constant 0 : index
    %252 = vector.load %arg12[%c0_207, %c0_208, %c0_209] : memref<2x64x32xf32, #tpu.memory_space<vmem>>, vector<1x64x32xf32>
    %253 = vector.shape_cast %252 : vector<1x64x32xf32> to vector<64x32xf32>
    %cst_210 = arith.constant dense<0.000000e+00> : vector<16x32xf32>
    %254 = tpu.matmul %251, %253, %cst_210 {dimension_numbers = #tpu.dot_dimension_numbers<[1], [0], [0], [1], [0, 0, 1, 1], [], []>} : vector<16x64xf32>, vector<64x32xf32>, vector<16x32xf32> -> vector<16x32xf32>
    %c0_211 = arith.constant 0 : index
    %c0_212 = arith.constant 0 : index
    %c0_213 = arith.constant 0 : index
    %255 = vector.load %arg13[%c0_211, %c0_212, %c0_213] : memref<2x1x32xf32, #tpu.memory_space<vmem>>, vector<1x1x32xf32>
    %256 = vector.shape_cast %255 : vector<1x1x32xf32> to vector<1x32xf32>
    %257 = vector.broadcast %256 : vector<1x32xf32> to vector<16x32xf32>
    %258 = arith.addf %254, %257 : vector<16x32xf32>
    %259 = arith.addf %258, %204 : vector<16x32xf32>
    %c0_214 = arith.constant 0 : index
    %c0_215 = arith.constant 0 : index
    %c0_216 = arith.constant 0 : index
    %260 = vector.load %arg14[%c0_214, %c0_215, %c0_216] : memref<2x1x32xf32, #tpu.memory_space<vmem>>, vector<1x1x32xf32>
    %261 = vector.shape_cast %260 : vector<1x1x32xf32> to vector<1x32xf32>
    %c0_217 = arith.constant 0 : index
    %c0_218 = arith.constant 0 : index
    %c0_219 = arith.constant 0 : index
    %262 = vector.load %arg15[%c0_217, %c0_218, %c0_219] : memref<2x1x32xf32, #tpu.memory_space<vmem>>, vector<1x1x32xf32>
    %263 = vector.shape_cast %262 : vector<1x1x32xf32> to vector<1x32xf32>
    %cst_220 = arith.constant dense<0.000000e+00> : vector<16xf32>
    %264 = vector.multi_reduction <add>, %259, %cst_220 [1] : vector<16x32xf32> to vector<16xf32>
    %265 = vector.shape_cast %264 : vector<16xf32> to vector<16x1xf32>
    %cst_221 = arith.constant 3.200000e+01 : f32
    %266 = vector.broadcast %cst_221 : f32 to vector<16x1xf32>
    %267 = arith.divf %265, %266 : vector<16x1xf32>
    %268 = vector.broadcast %267 : vector<16x1xf32> to vector<16x32xf32>
    %269 = arith.subf %259, %268 : vector<16x32xf32>
    %270 = arith.mulf %269, %269 : vector<16x32xf32>
    %cst_222 = arith.constant dense<0.000000e+00> : vector<16xf32>
    %271 = vector.multi_reduction <add>, %270, %cst_222 [1] : vector<16x32xf32> to vector<16xf32>
    %272 = vector.shape_cast %271 : vector<16xf32> to vector<16x1xf32>
    %cst_223 = arith.constant 3.200000e+01 : f32
    %273 = vector.broadcast %cst_223 : f32 to vector<16x1xf32>
    %274 = arith.divf %272, %273 : vector<16x1xf32>
    %cst_224 = arith.constant 9.99999996E-13 : f32
    %275 = vector.broadcast %cst_224 : f32 to vector<16x1xf32>
    %276 = arith.addf %274, %275 : vector<16x1xf32>
    %277 = math.rsqrt %276 : vector<16x1xf32>
    %278 = vector.broadcast %277 : vector<16x1xf32> to vector<16x32xf32>
    %279 = arith.mulf %269, %278 : vector<16x32xf32>
    %280 = vector.broadcast %261 : vector<1x32xf32> to vector<16x32xf32>
    %281 = arith.mulf %279, %280 : vector<16x32xf32>
    %282 = vector.broadcast %263 : vector<1x32xf32> to vector<16x32xf32>
    %283 = arith.addf %281, %282 : vector<16x32xf32>
    %c1_225 = arith.constant 1 : index
    %c0_226 = arith.constant 0 : index
    %c0_227 = arith.constant 0 : index
    %c0_228 = arith.constant 0 : index
    %c0_229 = arith.constant 0 : index
    %284 = vector.load %arg4[%c1_225, %c0_226, %c0_227, %c0_228, %c0_229] : memref<2x3x4x32x8xf32, #tpu.memory_space<vmem>>, vector<1x1x1x32x8xf32>
    %285 = vector.shape_cast %284 : vector<1x1x1x32x8xf32> to vector<32x8xf32>
    %cst_230 = arith.constant dense<0.000000e+00> : vector<16x8xf32>
    %286 = tpu.matmul %283, %285, %cst_230 {dimension_numbers = #tpu.dot_dimension_numbers<[1], [0], [0], [1], [0, 0, 1, 1], [], []>} : vector<16x32xf32>, vector<32x8xf32>, vector<16x8xf32> -> vector<16x8xf32>
    %c1_231 = arith.constant 1 : index
    %c0_232 = arith.constant 0 : index
    %c0_233 = arith.constant 0 : index
    %c0_234 = arith.constant 0 : index
    %c0_235 = arith.constant 0 : index
    %287 = vector.load %arg5[%c1_231, %c0_232, %c0_233, %c0_234, %c0_235] : memref<2x3x4x1x8xf32, #tpu.memory_space<vmem>>, vector<1x1x1x1x8xf32>
    %288 = vector.shape_cast %287 : vector<1x1x1x1x8xf32> to vector<1x8xf32>
    %289 = vector.broadcast %288 : vector<1x8xf32> to vector<16x8xf32>
    %290 = arith.addf %286, %289 : vector<16x8xf32>
    %c1_236 = arith.constant 1 : index
    %c1_237 = arith.constant 1 : index
    %c0_238 = arith.constant 0 : index
    %c0_239 = arith.constant 0 : index
    %c0_240 = arith.constant 0 : index
    %291 = vector.load %arg4[%c1_236, %c1_237, %c0_238, %c0_239, %c0_240] : memref<2x3x4x32x8xf32, #tpu.memory_space<vmem>>, vector<1x1x1x32x8xf32>
    %292 = vector.shape_cast %291 : vector<1x1x1x32x8xf32> to vector<32x8xf32>
    %cst_241 = arith.constant dense<0.000000e+00> : vector<16x8xf32>
    %293 = tpu.matmul %283, %292, %cst_241 {dimension_numbers = #tpu.dot_dimension_numbers<[1], [0], [0], [1], [0, 0, 1, 1], [], []>} : vector<16x32xf32>, vector<32x8xf32>, vector<16x8xf32> -> vector<16x8xf32>
    %c1_242 = arith.constant 1 : index
    %c1_243 = arith.constant 1 : index
    %c0_244 = arith.constant 0 : index
    %c0_245 = arith.constant 0 : index
    %c0_246 = arith.constant 0 : index
    %294 = vector.load %arg5[%c1_242, %c1_243, %c0_244, %c0_245, %c0_246] : memref<2x3x4x1x8xf32, #tpu.memory_space<vmem>>, vector<1x1x1x1x8xf32>
    %295 = vector.shape_cast %294 : vector<1x1x1x1x8xf32> to vector<1x8xf32>
    %296 = vector.broadcast %295 : vector<1x8xf32> to vector<16x8xf32>
    %297 = arith.addf %293, %296 : vector<16x8xf32>
    %c1_247 = arith.constant 1 : index
    %c2_248 = arith.constant 2 : index
    %c0_249 = arith.constant 0 : index
    %c0_250 = arith.constant 0 : index
    %c0_251 = arith.constant 0 : index
    %298 = vector.load %arg4[%c1_247, %c2_248, %c0_249, %c0_250, %c0_251] : memref<2x3x4x32x8xf32, #tpu.memory_space<vmem>>, vector<1x1x1x32x8xf32>
    %299 = vector.shape_cast %298 : vector<1x1x1x32x8xf32> to vector<32x8xf32>
    %cst_252 = arith.constant dense<0.000000e+00> : vector<16x8xf32>
    %300 = tpu.matmul %283, %299, %cst_252 {dimension_numbers = #tpu.dot_dimension_numbers<[1], [0], [0], [1], [0, 0, 1, 1], [], []>} : vector<16x32xf32>, vector<32x8xf32>, vector<16x8xf32> -> vector<16x8xf32>
    %c1_253 = arith.constant 1 : index
    %c2_254 = arith.constant 2 : index
    %c0_255 = arith.constant 0 : index
    %c0_256 = arith.constant 0 : index
    %c0_257 = arith.constant 0 : index
    %301 = vector.load %arg5[%c1_253, %c2_254, %c0_255, %c0_256, %c0_257] : memref<2x3x4x1x8xf32, #tpu.memory_space<vmem>>, vector<1x1x1x1x8xf32>
    %302 = vector.shape_cast %301 : vector<1x1x1x1x8xf32> to vector<1x8xf32>
    %303 = vector.broadcast %302 : vector<1x8xf32> to vector<16x8xf32>
    %304 = arith.addf %300, %303 : vector<16x8xf32>
    "tpu.trace_start"() <{level = 10 : i32, message = "md,nd->mn"}> : () -> ()
    %cst_258 = arith.constant dense<0.000000e+00> : vector<16x16xf32>
    %305 = tpu.matmul %290, %297, %cst_258 {dimension_numbers = #tpu.dot_dimension_numbers<[1], [1], [0], [0], [0, 0, 1, 0], [], []>} : vector<16x8xf32>, vector<16x8xf32>, vector<16x16xf32> -> vector<16x16xf32>
    "tpu.trace_stop"() : () -> ()
    %cst_259 = arith.constant 0.353553385 : f32
    %306 = vector.broadcast %cst_259 : f32 to vector<16x16xf32>
    %307 = arith.mulf %305, %306 : vector<16x16xf32>
    %308 = arith.addf %307, %0 : vector<16x16xf32>
    %cst_260 = arith.constant dense<0xFF800000> : vector<16xf32>
    %309 = vector.multi_reduction <maximumf>, %308, %cst_260 [1] : vector<16x16xf32> to vector<16xf32>
    %310 = vector.shape_cast %309 : vector<16xf32> to vector<16x1xf32>
    %311 = vector.broadcast %310 : vector<16x1xf32> to vector<16x16xf32>
    %312 = arith.subf %308, %311 : vector<16x16xf32>
    %313 = math.exp %312 : vector<16x16xf32>
    %cst_261 = arith.constant dense<0.000000e+00> : vector<16xf32>
    %314 = vector.multi_reduction <add>, %313, %cst_261 [1] : vector<16x16xf32> to vector<16xf32>
    %315 = vector.shape_cast %314 : vector<16xf32> to vector<16x1xf32>
    %316 = tpu.reciprocal %315 {approx = true} : vector<16x1xf32> -> vector<16x1xf32>
    %317 = vector.broadcast %316 : vector<16x1xf32> to vector<16x16xf32>
    %318 = arith.mulf %313, %317 : vector<16x16xf32>
    %cst_262 = arith.constant dense<0.000000e+00> : vector<16x8xf32>
    %319 = tpu.matmul %318, %304, %cst_262 {dimension_numbers = #tpu.dot_dimension_numbers<[1], [0], [0], [1], [0, 0, 1, 1], [], []>} : vector<16x16xf32>, vector<16x8xf32>, vector<16x8xf32> -> vector<16x8xf32>
    %c0_263 = arith.constant 0 : index
    %c0_264 = arith.constant 0 : index
    %320 = vector.load %arg23[%c0_263, %c0_264] : memref<16x32xf32, #tpu.memory_space<vmem>>, vector<16x8xf32>
    tpu.vector_store %arg23[%c0_263, %c0_264], %319 {strides = array<i32>} : memref<16x32xf32, #tpu.memory_space<vmem>>, vector<16x8xf32>,
    %c1_265 = arith.constant 1 : index
    %c0_266 = arith.constant 0 : index
    %c1_267 = arith.constant 1 : index
    %c0_268 = arith.constant 0 : index
    %c0_269 = arith.constant 0 : index
    %321 = vector.load %arg4[%c1_265, %c0_266, %c1_267, %c0_268, %c0_269] : memref<2x3x4x32x8xf32, #tpu.memory_space<vmem>>, vector<1x1x1x32x8xf32>
    %322 = vector.shape_cast %321 : vector<1x1x1x32x8xf32> to vector<32x8xf32>
    %cst_270 = arith.constant dense<0.000000e+00> : vector<16x8xf32>
    %323 = tpu.matmul %283, %322, %cst_270 {dimension_numbers = #tpu.dot_dimension_numbers<[1], [0], [0], [1], [0, 0, 1, 1], [], []>} : vector<16x32xf32>, vector<32x8xf32>, vector<16x8xf32> -> vector<16x8xf32>
    %c1_271 = arith.constant 1 : index
    %c0_272 = arith.constant 0 : index
    %c1_273 = arith.constant 1 : index
    %c0_274 = arith.constant 0 : index
    %c0_275 = arith.constant 0 : index
    %324 = vector.load %arg5[%c1_271, %c0_272, %c1_273, %c0_274, %c0_275] : memref<2x3x4x1x8xf32, #tpu.memory_space<vmem>>, vector<1x1x1x1x8xf32>
    %325 = vector.shape_cast %324 : vector<1x1x1x1x8xf32> to vector<1x8xf32>
    %326 = vector.broadcast %325 : vector<1x8xf32> to vector<16x8xf32>
    %327 = arith.addf %323, %326 : vector<16x8xf32>
    %c1_276 = arith.constant 1 : index
    %c1_277 = arith.constant 1 : index
    %c1_278 = arith.constant 1 : index
    %c0_279 = arith.constant 0 : index
    %c0_280 = arith.constant 0 : index
    %328 = vector.load %arg4[%c1_276, %c1_277, %c1_278, %c0_279, %c0_280] : memref<2x3x4x32x8xf32, #tpu.memory_space<vmem>>, vector<1x1x1x32x8xf32>
    %329 = vector.shape_cast %328 : vector<1x1x1x32x8xf32> to vector<32x8xf32>
    %cst_281 = arith.constant dense<0.000000e+00> : vector<16x8xf32>
    %330 = tpu.matmul %283, %329, %cst_281 {dimension_numbers = #tpu.dot_dimension_numbers<[1], [0], [0], [1], [0, 0, 1, 1], [], []>} : vector<16x32xf32>, vector<32x8xf32>, vector<16x8xf32> -> vector<16x8xf32>
    %c1_282 = arith.constant 1 : index
    %c1_283 = arith.constant 1 : index
    %c1_284 = arith.constant 1 : index
    %c0_285 = arith.constant 0 : index
    %c0_286 = arith.constant 0 : index
    %331 = vector.load %arg5[%c1_282, %c1_283, %c1_284, %c0_285, %c0_286] : memref<2x3x4x1x8xf32, #tpu.memory_space<vmem>>, vector<1x1x1x1x8xf32>
    %332 = vector.shape_cast %331 : vector<1x1x1x1x8xf32> to vector<1x8xf32>
    %333 = vector.broadcast %332 : vector<1x8xf32> to vector<16x8xf32>
    %334 = arith.addf %330, %333 : vector<16x8xf32>
    %c1_287 = arith.constant 1 : index
    %c2_288 = arith.constant 2 : index
    %c1_289 = arith.constant 1 : index
    %c0_290 = arith.constant 0 : index
    %c0_291 = arith.constant 0 : index
    %335 = vector.load %arg4[%c1_287, %c2_288, %c1_289, %c0_290, %c0_291] : memref<2x3x4x32x8xf32, #tpu.memory_space<vmem>>, vector<1x1x1x32x8xf32>
    %336 = vector.shape_cast %335 : vector<1x1x1x32x8xf32> to vector<32x8xf32>
    %cst_292 = arith.constant dense<0.000000e+00> : vector<16x8xf32>
    %337 = tpu.matmul %283, %336, %cst_292 {dimension_numbers = #tpu.dot_dimension_numbers<[1], [0], [0], [1], [0, 0, 1, 1], [], []>} : vector<16x32xf32>, vector<32x8xf32>, vector<16x8xf32> -> vector<16x8xf32>
    %c1_293 = arith.constant 1 : index
    %c2_294 = arith.constant 2 : index
    %c1_295 = arith.constant 1 : index
    %c0_296 = arith.constant 0 : index
    %c0_297 = arith.constant 0 : index
    %338 = vector.load %arg5[%c1_293, %c2_294, %c1_295, %c0_296, %c0_297] : memref<2x3x4x1x8xf32, #tpu.memory_space<vmem>>, vector<1x1x1x1x8xf32>
    %339 = vector.shape_cast %338 : vector<1x1x1x1x8xf32> to vector<1x8xf32>
    %340 = vector.broadcast %339 : vector<1x8xf32> to vector<16x8xf32>
    %341 = arith.addf %337, %340 : vector<16x8xf32>
    "tpu.trace_start"() <{level = 10 : i32, message = "md,nd->mn"}> : () -> ()
    %cst_298 = arith.constant dense<0.000000e+00> : vector<16x16xf32>
    %342 = tpu.matmul %327, %334, %cst_298 {dimension_numbers = #tpu.dot_dimension_numbers<[1], [1], [0], [0], [0, 0, 1, 0], [], []>} : vector<16x8xf32>, vector<16x8xf32>, vector<16x16xf32> -> vector<16x16xf32>
    "tpu.trace_stop"() : () -> ()
    %cst_299 = arith.constant 0.353553385 : f32
    %343 = vector.broadcast %cst_299 : f32 to vector<16x16xf32>
    %344 = arith.mulf %342, %343 : vector<16x16xf32>
    %345 = arith.addf %344, %0 : vector<16x16xf32>
    %cst_300 = arith.constant dense<0xFF800000> : vector<16xf32>
    %346 = vector.multi_reduction <maximumf>, %345, %cst_300 [1] : vector<16x16xf32> to vector<16xf32>
    %347 = vector.shape_cast %346 : vector<16xf32> to vector<16x1xf32>
    %348 = vector.broadcast %347 : vector<16x1xf32> to vector<16x16xf32>
    %349 = arith.subf %345, %348 : vector<16x16xf32>
    %350 = math.exp %349 : vector<16x16xf32>
    %cst_301 = arith.constant dense<0.000000e+00> : vector<16xf32>
    %351 = vector.multi_reduction <add>, %350, %cst_301 [1] : vector<16x16xf32> to vector<16xf32>
    %352 = vector.shape_cast %351 : vector<16xf32> to vector<16x1xf32>
    %353 = tpu.reciprocal %352 {approx = true} : vector<16x1xf32> -> vector<16x1xf32>
    %354 = vector.broadcast %353 : vector<16x1xf32> to vector<16x16xf32>
    %355 = arith.mulf %350, %354 : vector<16x16xf32>
    %cst_302 = arith.constant dense<0.000000e+00> : vector<16x8xf32>
    %356 = tpu.matmul %355, %341, %cst_302 {dimension_numbers = #tpu.dot_dimension_numbers<[1], [0], [0], [1], [0, 0, 1, 1], [], []>} : vector<16x16xf32>, vector<16x8xf32>, vector<16x8xf32> -> vector<16x8xf32>
    %c0_303 = arith.constant 0 : index
    %c8_304 = arith.constant 8 : index
    %357 = vector.load %arg23[%c0_303, %c8_304] : memref<16x32xf32, #tpu.memory_space<vmem>>, vector<16x8xf32>
    tpu.vector_store %arg23[%c0_303, %c8_304], %356 {strides = array<i32>} : memref<16x32xf32, #tpu.memory_space<vmem>>, vector<16x8xf32>,
    %c1_305 = arith.constant 1 : index
    %c0_306 = arith.constant 0 : index
    %c2_307 = arith.constant 2 : index
    %c0_308 = arith.constant 0 : index
    %c0_309 = arith.constant 0 : index
    %358 = vector.load %arg4[%c1_305, %c0_306, %c2_307, %c0_308, %c0_309] : memref<2x3x4x32x8xf32, #tpu.memory_space<vmem>>, vector<1x1x1x32x8xf32>
    %359 = vector.shape_cast %358 : vector<1x1x1x32x8xf32> to vector<32x8xf32>
    %cst_310 = arith.constant dense<0.000000e+00> : vector<16x8xf32>
    %360 = tpu.matmul %283, %359, %cst_310 {dimension_numbers = #tpu.dot_dimension_numbers<[1], [0], [0], [1], [0, 0, 1, 1], [], []>} : vector<16x32xf32>, vector<32x8xf32>, vector<16x8xf32> -> vector<16x8xf32>
    %c1_311 = arith.constant 1 : index
    %c0_312 = arith.constant 0 : index
    %c2_313 = arith.constant 2 : index
    %c0_314 = arith.constant 0 : index
    %c0_315 = arith.constant 0 : index
    %361 = vector.load %arg5[%c1_311, %c0_312, %c2_313, %c0_314, %c0_315] : memref<2x3x4x1x8xf32, #tpu.memory_space<vmem>>, vector<1x1x1x1x8xf32>
    %362 = vector.shape_cast %361 : vector<1x1x1x1x8xf32> to vector<1x8xf32>
    %363 = vector.broadcast %362 : vector<1x8xf32> to vector<16x8xf32>
    %364 = arith.addf %360, %363 : vector<16x8xf32>
    %c1_316 = arith.constant 1 : index
    %c1_317 = arith.constant 1 : index
    %c2_318 = arith.constant 2 : index
    %c0_319 = arith.constant 0 : index
    %c0_320 = arith.constant 0 : index
    %365 = vector.load %arg4[%c1_316, %c1_317, %c2_318, %c0_319, %c0_320] : memref<2x3x4x32x8xf32, #tpu.memory_space<vmem>>, vector<1x1x1x32x8xf32>
    %366 = vector.shape_cast %365 : vector<1x1x1x32x8xf32> to vector<32x8xf32>
    %cst_321 = arith.constant dense<0.000000e+00> : vector<16x8xf32>
    %367 = tpu.matmul %283, %366, %cst_321 {dimension_numbers = #tpu.dot_dimension_numbers<[1], [0], [0], [1], [0, 0, 1, 1], [], []>} : vector<16x32xf32>, vector<32x8xf32>, vector<16x8xf32> -> vector<16x8xf32>
    %c1_322 = arith.constant 1 : index
    %c1_323 = arith.constant 1 : index
    %c2_324 = arith.constant 2 : index
    %c0_325 = arith.constant 0 : index
    %c0_326 = arith.constant 0 : index
    %368 = vector.load %arg5[%c1_322, %c1_323, %c2_324, %c0_325, %c0_326] : memref<2x3x4x1x8xf32, #tpu.memory_space<vmem>>, vector<1x1x1x1x8xf32>
    %369 = vector.shape_cast %368 : vector<1x1x1x1x8xf32> to vector<1x8xf32>
    %370 = vector.broadcast %369 : vector<1x8xf32> to vector<16x8xf32>
    %371 = arith.addf %367, %370 : vector<16x8xf32>
    %c1_327 = arith.constant 1 : index
    %c2_328 = arith.constant 2 : index
    %c2_329 = arith.constant 2 : index
    %c0_330 = arith.constant 0 : index
    %c0_331 = arith.constant 0 : index
    %372 = vector.load %arg4[%c1_327, %c2_328, %c2_329, %c0_330, %c0_331] : memref<2x3x4x32x8xf32, #tpu.memory_space<vmem>>, vector<1x1x1x32x8xf32>
    %373 = vector.shape_cast %372 : vector<1x1x1x32x8xf32> to vector<32x8xf32>
    %cst_332 = arith.constant dense<0.000000e+00> : vector<16x8xf32>
    %374 = tpu.matmul %283, %373, %cst_332 {dimension_numbers = #tpu.dot_dimension_numbers<[1], [0], [0], [1], [0, 0, 1, 1], [], []>} : vector<16x32xf32>, vector<32x8xf32>, vector<16x8xf32> -> vector<16x8xf32>
    %c1_333 = arith.constant 1 : index
    %c2_334 = arith.constant 2 : index
    %c2_335 = arith.constant 2 : index
    %c0_336 = arith.constant 0 : index
    %c0_337 = arith.constant 0 : index
    %375 = vector.load %arg5[%c1_333, %c2_334, %c2_335, %c0_336, %c0_337] : memref<2x3x4x1x8xf32, #tpu.memory_space<vmem>>, vector<1x1x1x1x8xf32>
    %376 = vector.shape_cast %375 : vector<1x1x1x1x8xf32> to vector<1x8xf32>
    %377 = vector.broadcast %376 : vector<1x8xf32> to vector<16x8xf32>
    %378 = arith.addf %374, %377 : vector<16x8xf32>
    "tpu.trace_start"() <{level = 10 : i32, message = "md,nd->mn"}> : () -> ()
    %cst_338 = arith.constant dense<0.000000e+00> : vector<16x16xf32>
    %379 = tpu.matmul %364, %371, %cst_338 {dimension_numbers = #tpu.dot_dimension_numbers<[1], [1], [0], [0], [0, 0, 1, 0], [], []>} : vector<16x8xf32>, vector<16x8xf32>, vector<16x16xf32> -> vector<16x16xf32>
    "tpu.trace_stop"() : () -> ()
    %cst_339 = arith.constant 0.353553385 : f32
    %380 = vector.broadcast %cst_339 : f32 to vector<16x16xf32>
    %381 = arith.mulf %379, %380 : vector<16x16xf32>
    %382 = arith.addf %381, %0 : vector<16x16xf32>
    %cst_340 = arith.constant dense<0xFF800000> : vector<16xf32>
    %383 = vector.multi_reduction <maximumf>, %382, %cst_340 [1] : vector<16x16xf32> to vector<16xf32>
    %384 = vector.shape_cast %383 : vector<16xf32> to vector<16x1xf32>
    %385 = vector.broadcast %384 : vector<16x1xf32> to vector<16x16xf32>
    %386 = arith.subf %382, %385 : vector<16x16xf32>
    %387 = math.exp %386 : vector<16x16xf32>
    %cst_341 = arith.constant dense<0.000000e+00> : vector<16xf32>
    %388 = vector.multi_reduction <add>, %387, %cst_341 [1] : vector<16x16xf32> to vector<16xf32>
    %389 = vector.shape_cast %388 : vector<16xf32> to vector<16x1xf32>
    %390 = tpu.reciprocal %389 {approx = true} : vector<16x1xf32> -> vector<16x1xf32>
    %391 = vector.broadcast %390 : vector<16x1xf32> to vector<16x16xf32>
    %392 = arith.mulf %387, %391 : vector<16x16xf32>
    %cst_342 = arith.constant dense<0.000000e+00> : vector<16x8xf32>
    %393 = tpu.matmul %392, %378, %cst_342 {dimension_numbers = #tpu.dot_dimension_numbers<[1], [0], [0], [1], [0, 0, 1, 1], [], []>} : vector<16x16xf32>, vector<16x8xf32>, vector<16x8xf32> -> vector<16x8xf32>
    %c0_343 = arith.constant 0 : index
    %c16_344 = arith.constant 16 : index
    %394 = vector.load %arg23[%c0_343, %c16_344] : memref<16x32xf32, #tpu.memory_space<vmem>>, vector<16x8xf32>
    tpu.vector_store %arg23[%c0_343, %c16_344], %393 {strides = array<i32>} : memref<16x32xf32, #tpu.memory_space<vmem>>, vector<16x8xf32>,
    %c1_345 = arith.constant 1 : index
    %c0_346 = arith.constant 0 : index
    %c3_347 = arith.constant 3 : index
    %c0_348 = arith.constant 0 : index
    %c0_349 = arith.constant 0 : index
    %395 = vector.load %arg4[%c1_345, %c0_346, %c3_347, %c0_348, %c0_349] : memref<2x3x4x32x8xf32, #tpu.memory_space<vmem>>, vector<1x1x1x32x8xf32>
    %396 = vector.shape_cast %395 : vector<1x1x1x32x8xf32> to vector<32x8xf32>
    %cst_350 = arith.constant dense<0.000000e+00> : vector<16x8xf32>
    %397 = tpu.matmul %283, %396, %cst_350 {dimension_numbers = #tpu.dot_dimension_numbers<[1], [0], [0], [1], [0, 0, 1, 1], [], []>} : vector<16x32xf32>, vector<32x8xf32>, vector<16x8xf32> -> vector<16x8xf32>
    %c1_351 = arith.constant 1 : index
    %c0_352 = arith.constant 0 : index
    %c3_353 = arith.constant 3 : index
    %c0_354 = arith.constant 0 : index
    %c0_355 = arith.constant 0 : index
    %398 = vector.load %arg5[%c1_351, %c0_352, %c3_353, %c0_354, %c0_355] : memref<2x3x4x1x8xf32, #tpu.memory_space<vmem>>, vector<1x1x1x1x8xf32>
    %399 = vector.shape_cast %398 : vector<1x1x1x1x8xf32> to vector<1x8xf32>
    %400 = vector.broadcast %399 : vector<1x8xf32> to vector<16x8xf32>
    %401 = arith.addf %397, %400 : vector<16x8xf32>
    %c1_356 = arith.constant 1 : index
    %c1_357 = arith.constant 1 : index
    %c3_358 = arith.constant 3 : index
    %c0_359 = arith.constant 0 : index
    %c0_360 = arith.constant 0 : index
    %402 = vector.load %arg4[%c1_356, %c1_357, %c3_358, %c0_359, %c0_360] : memref<2x3x4x32x8xf32, #tpu.memory_space<vmem>>, vector<1x1x1x32x8xf32>
    %403 = vector.shape_cast %402 : vector<1x1x1x32x8xf32> to vector<32x8xf32>
    %cst_361 = arith.constant dense<0.000000e+00> : vector<16x8xf32>
    %404 = tpu.matmul %283, %403, %cst_361 {dimension_numbers = #tpu.dot_dimension_numbers<[1], [0], [0], [1], [0, 0, 1, 1], [], []>} : vector<16x32xf32>, vector<32x8xf32>, vector<16x8xf32> -> vector<16x8xf32>
    %c1_362 = arith.constant 1 : index
    %c1_363 = arith.constant 1 : index
    %c3_364 = arith.constant 3 : index
    %c0_365 = arith.constant 0 : index
    %c0_366 = arith.constant 0 : index
    %405 = vector.load %arg5[%c1_362, %c1_363, %c3_364, %c0_365, %c0_366] : memref<2x3x4x1x8xf32, #tpu.memory_space<vmem>>, vector<1x1x1x1x8xf32>
    %406 = vector.shape_cast %405 : vector<1x1x1x1x8xf32> to vector<1x8xf32>
    %407 = vector.broadcast %406 : vector<1x8xf32> to vector<16x8xf32>
    %408 = arith.addf %404, %407 : vector<16x8xf32>
    %c1_367 = arith.constant 1 : index
    %c2_368 = arith.constant 2 : index
    %c3_369 = arith.constant 3 : index
    %c0_370 = arith.constant 0 : index
    %c0_371 = arith.constant 0 : index
    %409 = vector.load %arg4[%c1_367, %c2_368, %c3_369, %c0_370, %c0_371] : memref<2x3x4x32x8xf32, #tpu.memory_space<vmem>>, vector<1x1x1x32x8xf32>
    %410 = vector.shape_cast %409 : vector<1x1x1x32x8xf32> to vector<32x8xf32>
    %cst_372 = arith.constant dense<0.000000e+00> : vector<16x8xf32>
    %411 = tpu.matmul %283, %410, %cst_372 {dimension_numbers = #tpu.dot_dimension_numbers<[1], [0], [0], [1], [0, 0, 1, 1], [], []>} : vector<16x32xf32>, vector<32x8xf32>, vector<16x8xf32> -> vector<16x8xf32>
    %c1_373 = arith.constant 1 : index
    %c2_374 = arith.constant 2 : index
    %c3_375 = arith.constant 3 : index
    %c0_376 = arith.constant 0 : index
    %c0_377 = arith.constant 0 : index
    %412 = vector.load %arg5[%c1_373, %c2_374, %c3_375, %c0_376, %c0_377] : memref<2x3x4x1x8xf32, #tpu.memory_space<vmem>>, vector<1x1x1x1x8xf32>
    %413 = vector.shape_cast %412 : vector<1x1x1x1x8xf32> to vector<1x8xf32>
    %414 = vector.broadcast %413 : vector<1x8xf32> to vector<16x8xf32>
    %415 = arith.addf %411, %414 : vector<16x8xf32>
    "tpu.trace_start"() <{level = 10 : i32, message = "md,nd->mn"}> : () -> ()
    %cst_378 = arith.constant dense<0.000000e+00> : vector<16x16xf32>
    %416 = tpu.matmul %401, %408, %cst_378 {dimension_numbers = #tpu.dot_dimension_numbers<[1], [1], [0], [0], [0, 0, 1, 0], [], []>} : vector<16x8xf32>, vector<16x8xf32>, vector<16x16xf32> -> vector<16x16xf32>
    "tpu.trace_stop"() : () -> ()
    %cst_379 = arith.constant 0.353553385 : f32
    %417 = vector.broadcast %cst_379 : f32 to vector<16x16xf32>
    %418 = arith.mulf %416, %417 : vector<16x16xf32>
    %419 = arith.addf %418, %0 : vector<16x16xf32>
    %cst_380 = arith.constant dense<0xFF800000> : vector<16xf32>
    %420 = vector.multi_reduction <maximumf>, %419, %cst_380 [1] : vector<16x16xf32> to vector<16xf32>
    %421 = vector.shape_cast %420 : vector<16xf32> to vector<16x1xf32>
    %422 = vector.broadcast %421 : vector<16x1xf32> to vector<16x16xf32>
    %423 = arith.subf %419, %422 : vector<16x16xf32>
    %424 = math.exp %423 : vector<16x16xf32>
    %cst_381 = arith.constant dense<0.000000e+00> : vector<16xf32>
    %425 = vector.multi_reduction <add>, %424, %cst_381 [1] : vector<16x16xf32> to vector<16xf32>
    %426 = vector.shape_cast %425 : vector<16xf32> to vector<16x1xf32>
    %427 = tpu.reciprocal %426 {approx = true} : vector<16x1xf32> -> vector<16x1xf32>
    %428 = vector.broadcast %427 : vector<16x1xf32> to vector<16x16xf32>
    %429 = arith.mulf %424, %428 : vector<16x16xf32>
    %cst_382 = arith.constant dense<0.000000e+00> : vector<16x8xf32>
    %430 = tpu.matmul %429, %415, %cst_382 {dimension_numbers = #tpu.dot_dimension_numbers<[1], [0], [0], [1], [0, 0, 1, 1], [], []>} : vector<16x16xf32>, vector<16x8xf32>, vector<16x8xf32> -> vector<16x8xf32>
    %c0_383 = arith.constant 0 : index
    %c24_384 = arith.constant 24 : index
    %431 = vector.load %arg23[%c0_383, %c24_384] : memref<16x32xf32, #tpu.memory_space<vmem>>, vector<16x8xf32>
    tpu.vector_store %arg23[%c0_383, %c24_384], %430 {strides = array<i32>} : memref<16x32xf32, #tpu.memory_space<vmem>>, vector<16x8xf32>,
    %c0_385 = arith.constant 0 : index
    %c0_386 = arith.constant 0 : index
    %432 = vector.load %arg23[%c0_385, %c0_386] : memref<16x32xf32, #tpu.memory_space<vmem>>, vector<16x32xf32>
    %c1_387 = arith.constant 1 : index
    %c0_388 = arith.constant 0 : index
    %c0_389 = arith.constant 0 : index
    %433 = vector.load %arg6[%c1_387, %c0_388, %c0_389] : memref<2x32x32xf32, #tpu.memory_space<vmem>>, vector<1x32x32xf32>
    %434 = vector.shape_cast %433 : vector<1x32x32xf32> to vector<32x32xf32>
    %cst_390 = arith.constant dense<0.000000e+00> : vector<16x32xf32>
    %435 = tpu.matmul %432, %434, %cst_390 {dimension_numbers = #tpu.dot_dimension_numbers<[1], [0], [0], [1], [0, 0, 1, 1], [], []>} : vector<16x32xf32>, vector<32x32xf32>, vector<16x32xf32> -> vector<16x32xf32>
    %c1_391 = arith.constant 1 : index
    %c0_392 = arith.constant 0 : index
    %c0_393 = arith.constant 0 : index
    %436 = vector.load %arg7[%c1_391, %c0_392, %c0_393] : memref<2x1x32xf32, #tpu.memory_space<vmem>>, vector<1x1x32xf32>
    %437 = vector.shape_cast %436 : vector<1x1x32xf32> to vector<1x32xf32>
    %438 = vector.broadcast %437 : vector<1x32xf32> to vector<16x32xf32>
    %439 = arith.addf %435, %438 : vector<16x32xf32>
    %440 = arith.addf %439, %283 : vector<16x32xf32>
    %c1_394 = arith.constant 1 : index
    %c0_395 = arith.constant 0 : index
    %c0_396 = arith.constant 0 : index
    %441 = vector.load %arg8[%c1_394, %c0_395, %c0_396] : memref<2x1x32xf32, #tpu.memory_space<vmem>>, vector<1x1x32xf32>
    %442 = vector.shape_cast %441 : vector<1x1x32xf32> to vector<1x32xf32>
    %c1_397 = arith.constant 1 : index
    %c0_398 = arith.constant 0 : index
    %c0_399 = arith.constant 0 : index
    %443 = vector.load %arg9[%c1_397, %c0_398, %c0_399] : memref<2x1x32xf32, #tpu.memory_space<vmem>>, vector<1x1x32xf32>
    %444 = vector.shape_cast %443 : vector<1x1x32xf32> to vector<1x32xf32>
    %cst_400 = arith.constant dense<0.000000e+00> : vector<16xf32>
    %445 = vector.multi_reduction <add>, %440, %cst_400 [1] : vector<16x32xf32> to vector<16xf32>
    %446 = vector.shape_cast %445 : vector<16xf32> to vector<16x1xf32>
    %cst_401 = arith.constant 3.200000e+01 : f32
    %447 = vector.broadcast %cst_401 : f32 to vector<16x1xf32>
    %448 = arith.divf %446, %447 : vector<16x1xf32>
    %449 = vector.broadcast %448 : vector<16x1xf32> to vector<16x32xf32>
    %450 = arith.subf %440, %449 : vector<16x32xf32>
    %451 = arith.mulf %450, %450 : vector<16x32xf32>
    %cst_402 = arith.constant dense<0.000000e+00> : vector<16xf32>
    %452 = vector.multi_reduction <add>, %451, %cst_402 [1] : vector<16x32xf32> to vector<16xf32>
    %453 = vector.shape_cast %452 : vector<16xf32> to vector<16x1xf32>
    %cst_403 = arith.constant 3.200000e+01 : f32
    %454 = vector.broadcast %cst_403 : f32 to vector<16x1xf32>
    %455 = arith.divf %453, %454 : vector<16x1xf32>
    %cst_404 = arith.constant 9.99999996E-13 : f32
    %456 = vector.broadcast %cst_404 : f32 to vector<16x1xf32>
    %457 = arith.addf %455, %456 : vector<16x1xf32>
    %458 = math.rsqrt %457 : vector<16x1xf32>
    %459 = vector.broadcast %458 : vector<16x1xf32> to vector<16x32xf32>
    %460 = arith.mulf %450, %459 : vector<16x32xf32>
    %461 = vector.broadcast %442 : vector<1x32xf32> to vector<16x32xf32>
    %462 = arith.mulf %460, %461 : vector<16x32xf32>
    %463 = vector.broadcast %444 : vector<1x32xf32> to vector<16x32xf32>
    %464 = arith.addf %462, %463 : vector<16x32xf32>
    %c1_405 = arith.constant 1 : index
    %c0_406 = arith.constant 0 : index
    %c0_407 = arith.constant 0 : index
    %465 = vector.load %arg10[%c1_405, %c0_406, %c0_407] : memref<2x32x64xf32, #tpu.memory_space<vmem>>, vector<1x32x64xf32>
    %466 = vector.shape_cast %465 : vector<1x32x64xf32> to vector<32x64xf32>
    %cst_408 = arith.constant dense<0.000000e+00> : vector<16x64xf32>
    %467 = tpu.matmul %464, %466, %cst_408 {dimension_numbers = #tpu.dot_dimension_numbers<[1], [0], [0], [1], [0, 0, 1, 1], [], []>} : vector<16x32xf32>, vector<32x64xf32>, vector<16x64xf32> -> vector<16x64xf32>
    %c1_409 = arith.constant 1 : index
    %c0_410 = arith.constant 0 : index
    %c0_411 = arith.constant 0 : index
    %468 = vector.load %arg11[%c1_409, %c0_410, %c0_411] : memref<2x1x64xf32, #tpu.memory_space<vmem>>, vector<1x1x64xf32>
    %469 = vector.shape_cast %468 : vector<1x1x64xf32> to vector<1x64xf32>
    %470 = vector.broadcast %469 : vector<1x64xf32> to vector<16x64xf32>
    %471 = arith.addf %467, %470 : vector<16x64xf32>
    %cst_412 = arith.constant 5.000000e-01 : f32
    %472 = vector.broadcast %cst_412 : f32 to vector<16x64xf32>
    %473 = arith.mulf %472, %471 : vector<16x64xf32>
    %cst_413 = arith.constant 0.707106769 : f32
    %474 = vector.broadcast %cst_413 : f32 to vector<16x64xf32>
    %475 = arith.mulf %471, %474 : vector<16x64xf32>
    %476 = math.absf %475 : vector<16x64xf32>
    %cst_414 = arith.constant 0.327591091 : f32
    %477 = vector.broadcast %cst_414 : f32 to vector<16x64xf32>
    %478 = arith.mulf %477, %476 : vector<16x64xf32>
    %cst_415 = arith.constant 1.000000e+00 : f32
    %479 = vector.broadcast %cst_415 : f32 to vector<16x64xf32>
    %480 = arith.addf %479, %478 : vector<16x64xf32>
    %cst_416 = arith.constant 1.000000e+00 : f32
    %481 = vector.broadcast %cst_416 : f32 to vector<16x64xf32>
    %482 = arith.divf %481, %480 : vector<16x64xf32>
    %cst_417 = arith.constant 1.06140542 : f32
    %483 = vector.broadcast %cst_417 : f32 to vector<16x64xf32>
    %484 = arith.mulf %483, %482 : vector<16x64xf32>
    %cst_418 = arith.constant -1.45315206 : f32
    %485 = vector.broadcast %cst_418 : f32 to vector<16x64xf32>
    %486 = arith.addf %484, %485 : vector<16x64xf32>
    %487 = arith.mulf %486, %482 : vector<16x64xf32>
    %cst_419 = arith.constant 1.42141378 : f32
    %488 = vector.broadcast %cst_419 : f32 to vector<16x64xf32>
    %489 = arith.addf %487, %488 : vector<16x64xf32>
    %490 = arith.mulf %489, %482 : vector<16x64xf32>
    %cst_420 = arith.constant -0.284496725 : f32
    %491 = vector.broadcast %cst_420 : f32 to vector<16x64xf32>
    %492 = arith.addf %490, %491 : vector<16x64xf32>
    %493 = arith.mulf %492, %482 : vector<16x64xf32>
    %cst_421 = arith.constant 0.254829586 : f32
    %494 = vector.broadcast %cst_421 : f32 to vector<16x64xf32>
    %495 = arith.addf %493, %494 : vector<16x64xf32>
    %496 = arith.mulf %495, %482 : vector<16x64xf32>
    %cst_422 = arith.constant 0.000000e+00 : f32
    %497 = vector.broadcast %cst_422 : f32 to vector<16x64xf32>
    %498 = arith.subf %497, %476 : vector<16x64xf32>
    %499 = arith.mulf %498, %476 : vector<16x64xf32>
    %500 = math.exp %499 : vector<16x64xf32>
    %501 = arith.mulf %496, %500 : vector<16x64xf32>
    %cst_423 = arith.constant 1.000000e+00 : f32
    %502 = vector.broadcast %cst_423 : f32 to vector<16x64xf32>
    %503 = arith.subf %502, %501 : vector<16x64xf32>
    %cst_424 = arith.constant 0.000000e+00 : f32
    %504 = vector.broadcast %cst_424 : f32 to vector<16x64xf32>
    %505 = arith.cmpf oge, %475, %504 : vector<16x64xf32>
    %cst_425 = arith.constant 0.000000e+00 : f32
    %506 = vector.broadcast %cst_425 : f32 to vector<16x64xf32>
    %507 = arith.subf %506, %503 : vector<16x64xf32>
    %508 = arith.select %505, %503, %507 : vector<16x64xi1>, vector<16x64xf32>
    %cst_426 = arith.constant 1.000000e+00 : f32
    %509 = vector.broadcast %cst_426 : f32 to vector<16x64xf32>
    %510 = arith.addf %509, %508 : vector<16x64xf32>
    %511 = arith.mulf %473, %510 : vector<16x64xf32>
    %c1_427 = arith.constant 1 : index
    %c0_428 = arith.constant 0 : index
    %c0_429 = arith.constant 0 : index
    %512 = vector.load %arg12[%c1_427, %c0_428, %c0_429] : memref<2x64x32xf32, #tpu.memory_space<vmem>>, vector<1x64x32xf32>
    %513 = vector.shape_cast %512 : vector<1x64x32xf32> to vector<64x32xf32>
    %cst_430 = arith.constant dense<0.000000e+00> : vector<16x32xf32>
    %514 = tpu.matmul %511, %513, %cst_430 {dimension_numbers = #tpu.dot_dimension_numbers<[1], [0], [0], [1], [0, 0, 1, 1], [], []>} : vector<16x64xf32>, vector<64x32xf32>, vector<16x32xf32> -> vector<16x32xf32>
    %c1_431 = arith.constant 1 : index
    %c0_432 = arith.constant 0 : index
    %c0_433 = arith.constant 0 : index
    %515 = vector.load %arg13[%c1_431, %c0_432, %c0_433] : memref<2x1x32xf32, #tpu.memory_space<vmem>>, vector<1x1x32xf32>
    %516 = vector.shape_cast %515 : vector<1x1x32xf32> to vector<1x32xf32>
    %517 = vector.broadcast %516 : vector<1x32xf32> to vector<16x32xf32>
    %518 = arith.addf %514, %517 : vector<16x32xf32>
    %519 = arith.addf %518, %464 : vector<16x32xf32>
    %c1_434 = arith.constant 1 : index
    %c0_435 = arith.constant 0 : index
    %c0_436 = arith.constant 0 : index
    %520 = vector.load %arg14[%c1_434, %c0_435, %c0_436] : memref<2x1x32xf32, #tpu.memory_space<vmem>>, vector<1x1x32xf32>
    %521 = vector.shape_cast %520 : vector<1x1x32xf32> to vector<1x32xf32>
    %c1_437 = arith.constant 1 : index
    %c0_438 = arith.constant 0 : index
    %c0_439 = arith.constant 0 : index
    %522 = vector.load %arg15[%c1_437, %c0_438, %c0_439] : memref<2x1x32xf32, #tpu.memory_space<vmem>>, vector<1x1x32xf32>
    %523 = vector.shape_cast %522 : vector<1x1x32xf32> to vector<1x32xf32>
    %cst_440 = arith.constant dense<0.000000e+00> : vector<16xf32>
    %524 = vector.multi_reduction <add>, %519, %cst_440 [1] : vector<16x32xf32> to vector<16xf32>
    %525 = vector.shape_cast %524 : vector<16xf32> to vector<16x1xf32>
    %cst_441 = arith.constant 3.200000e+01 : f32
    %526 = vector.broadcast %cst_441 : f32 to vector<16x1xf32>
    %527 = arith.divf %525, %526 : vector<16x1xf32>
    %528 = vector.broadcast %527 : vector<16x1xf32> to vector<16x32xf32>
    %529 = arith.subf %519, %528 : vector<16x32xf32>
    %530 = arith.mulf %529, %529 : vector<16x32xf32>
    %cst_442 = arith.constant dense<0.000000e+00> : vector<16xf32>
    %531 = vector.multi_reduction <add>, %530, %cst_442 [1] : vector<16x32xf32> to vector<16xf32>
    %532 = vector.shape_cast %531 : vector<16xf32> to vector<16x1xf32>
    %cst_443 = arith.constant 3.200000e+01 : f32
    %533 = vector.broadcast %cst_443 : f32 to vector<16x1xf32>
    %534 = arith.divf %532, %533 : vector<16x1xf32>
    %cst_444 = arith.constant 9.99999996E-13 : f32
    %535 = vector.broadcast %cst_444 : f32 to vector<16x1xf32>
    %536 = arith.addf %534, %535 : vector<16x1xf32>
    %537 = math.rsqrt %536 : vector<16x1xf32>
    %538 = vector.broadcast %537 : vector<16x1xf32> to vector<16x32xf32>
    %539 = arith.mulf %529, %538 : vector<16x32xf32>
    %540 = vector.broadcast %521 : vector<1x32xf32> to vector<16x32xf32>
    %541 = arith.mulf %539, %540 : vector<16x32xf32>
    %542 = vector.broadcast %523 : vector<1x32xf32> to vector<16x32xf32>
    %543 = arith.addf %541, %542 : vector<16x32xf32>
    %544 = vector.shape_cast %543 : vector<16x32xf32> to vector<2x8x32xf32>
    %c0_445 = arith.constant 0 : index
    %c0_446 = arith.constant 0 : index
    %545 = vector.load %arg16[%c0_445, %c0_446] : memref<2x32xf32, #tpu.memory_space<vmem>>, vector<1x32xf32>
    %546 = vector.shape_cast %545 : vector<1x32xf32> to vector<1x1x32xf32>
    %c1_447 = arith.constant 1 : index
    %c0_448 = arith.constant 0 : index
    %547 = vector.load %arg16[%c1_447, %c0_448] : memref<2x32xf32, #tpu.memory_space<vmem>>, vector<1x32xf32>
    %548 = vector.shape_cast %547 : vector<1x32xf32> to vector<1x1x32xf32>
    %549 = vector.broadcast %546 : vector<1x1x32xf32> to vector<2x8x32xf32>
    %550 = arith.mulf %544, %549 : vector<2x8x32xf32>
    %cst_449 = arith.constant dense<0.000000e+00> : vector<2x8xf32>
    %551 = vector.multi_reduction <add>, %550, %cst_449 [2] : vector<2x8x32xf32> to vector<2x8xf32>
    %c0_450 = arith.constant 0 : index
    %552 = memref.load %arg17[%c0_450] : memref<2xf32, #tpu.memory_space<smem>>
    %553 = vector.broadcast %552 : f32 to vector<2x8xf32>
    %554 = arith.addf %551, %553 : vector<2x8xf32>
    %555 = vector.broadcast %548 : vector<1x1x32xf32> to vector<2x8x32xf32>
    %556 = arith.mulf %544, %555 : vector<2x8x32xf32>
    %cst_451 = arith.constant dense<0.000000e+00> : vector<2x8xf32>
    %557 = vector.multi_reduction <add>, %556, %cst_451 [2] : vector<2x8x32xf32> to vector<2x8xf32>
    %c1_452 = arith.constant 1 : index
    %558 = memref.load %arg17[%c1_452] : memref<2xf32, #tpu.memory_space<smem>>
    %559 = vector.broadcast %558 : f32 to vector<2x8xf32>
    %560 = arith.addf %557, %559 : vector<2x8xf32>
    %c0_453 = arith.constant 0 : index
    %c0_454 = arith.constant 0 : index
    %561 = vector.load %arg20[%c0_453, %c0_454] : memref<2x8xf32, #tpu.memory_space<vmem>>, vector<2x8xf32>
    tpu.vector_store %arg20[%c0_453, %c0_454], %554 {strides = array<i32>} : memref<2x8xf32, #tpu.memory_space<vmem>>, vector<2x8xf32>,
    %c0_455 = arith.constant 0 : index
    %c0_456 = arith.constant 0 : index
    %562 = vector.load %arg21[%c0_455, %c0_456] : memref<2x8xf32, #tpu.memory_space<vmem>>, vector<2x8xf32>
    tpu.vector_store %arg21[%c0_455, %c0_456], %560 {strides = array<i32>} : memref<2x8xf32, #tpu.memory_space<vmem>>, vector<2x8xf32>,
    %c0_457 = arith.constant 0 : index
    %c0_458 = arith.constant 0 : index
    %563 = vector.load %arg18[%c0_457, %c0_458] : memref<2x1xi32, #tpu.memory_space<vmem>>, vector<2x1xi32>
    %cst_459 = arith.constant dense<0xFF800000> : vector<2xf32>
    %564 = vector.multi_reduction <maximumf>, %554, %cst_459 [1] : vector<2x8xf32> to vector<2xf32>
    %565 = vector.shape_cast %564 : vector<2xf32> to vector<2x1xf32>
    %566 = vector.broadcast %565 : vector<2x1xf32> to vector<2x8xf32>
    %567 = arith.subf %554, %566 : vector<2x8xf32>
    %568 = math.exp %567 : vector<2x8xf32>
    %cst_460 = arith.constant dense<0.000000e+00> : vector<2xf32>
    %569 = vector.multi_reduction <add>, %568, %cst_460 [1] : vector<2x8xf32> to vector<2xf32>
    %570 = vector.shape_cast %569 : vector<2xf32> to vector<2x1xf32>
    %571 = math.log %570 : vector<2x1xf32>
    %572 = vector.broadcast %571 : vector<2x1xf32> to vector<2x8xf32>
    %573 = arith.subf %567, %572 : vector<2x8xf32>
    %574 = tpu.iota {dimensions = array<i32: 1>} : vector<2x8xi32>
    %575 = vector.broadcast %563 : vector<2x1xi32> to vector<2x8xi32>
    %576 = arith.cmpi eq, %574, %575 : vector<2x8xi32>
    %577 = arith.extui %576 : vector<2x8xi1> to vector<2x8xi32>
    %578 = arith.sitofp %577 : vector<2x8xi32> to vector<2x8xf32>
    %579 = arith.mulf %578, %573 : vector<2x8xf32>
    %cst_461 = arith.constant dense<0.000000e+00> : vector<2xf32>
    %580 = vector.multi_reduction <add>, %579, %cst_461 [1] : vector<2x8xf32> to vector<2xf32>
    %581 = vector.shape_cast %580 : vector<2xf32> to vector<2x1xf32>
    %cst_462 = arith.constant 0.000000e+00 : f32
    %582 = vector.broadcast %cst_462 : f32 to vector<2x1xf32>
    %583 = arith.subf %582, %581 : vector<2x1xf32>
    %c8_i32 = arith.constant 8 : i32
    %584 = vector.broadcast %c8_i32 : i32 to vector<2x1xi32>
    %585 = arith.cmpi ne, %563, %584 : vector<2x1xi32>
    %586 = arith.extui %585 : vector<2x1xi1> to vector<2x1xi32>
    %587 = arith.sitofp %586 : vector<2x1xi32> to vector<2x1xf32>
    %588 = arith.mulf %583, %587 : vector<2x1xf32>
    %cst_463 = arith.constant dense<0.000000e+00> : vector<1xf32>
    %589 = vector.multi_reduction <add>, %588, %cst_463 [0] : vector<2x1xf32> to vector<1xf32>
    %590 = vector.shape_cast %589 : vector<1xf32> to vector<1x1xf32>
    %cst_464 = arith.constant dense<0.000000e+00> : vector<1xf32>
    %591 = vector.multi_reduction <add>, %587, %cst_464 [0] : vector<2x1xf32> to vector<1xf32>
    %592 = vector.shape_cast %591 : vector<1xf32> to vector<1x1xf32>
    %cst_465 = arith.constant 1.000000e+00 : f32
    %593 = vector.broadcast %cst_465 : f32 to vector<1x1xf32>
    %594 = arith.maximumf %592, %593 : vector<1x1xf32>
    %595 = arith.divf %590, %594 : vector<1x1xf32>
    %c0_466 = arith.constant 0 : index
    %c0_467 = arith.constant 0 : index
    %596 = vector.load %arg19[%c0_466, %c0_467] : memref<2x1xi32, #tpu.memory_space<vmem>>, vector<2x1xi32>
    %cst_468 = arith.constant dense<0xFF800000> : vector<2xf32>
    %597 = vector.multi_reduction <maximumf>, %560, %cst_468 [1] : vector<2x8xf32> to vector<2xf32>
    %598 = vector.shape_cast %597 : vector<2xf32> to vector<2x1xf32>
    %599 = vector.broadcast %598 : vector<2x1xf32> to vector<2x8xf32>
    %600 = arith.subf %560, %599 : vector<2x8xf32>
    %601 = math.exp %600 : vector<2x8xf32>
    %cst_469 = arith.constant dense<0.000000e+00> : vector<2xf32>
    %602 = vector.multi_reduction <add>, %601, %cst_469 [1] : vector<2x8xf32> to vector<2xf32>
    %603 = vector.shape_cast %602 : vector<2xf32> to vector<2x1xf32>
    %604 = math.log %603 : vector<2x1xf32>
    %605 = vector.broadcast %604 : vector<2x1xf32> to vector<2x8xf32>
    %606 = arith.subf %600, %605 : vector<2x8xf32>
    %607 = tpu.iota {dimensions = array<i32: 1>} : vector<2x8xi32>
    %608 = vector.broadcast %596 : vector<2x1xi32> to vector<2x8xi32>
    %609 = arith.cmpi eq, %607, %608 : vector<2x8xi32>
    %610 = arith.extui %609 : vector<2x8xi1> to vector<2x8xi32>
    %611 = arith.sitofp %610 : vector<2x8xi32> to vector<2x8xf32>
    %612 = arith.mulf %611, %606 : vector<2x8xf32>
    %cst_470 = arith.constant dense<0.000000e+00> : vector<2xf32>
    %613 = vector.multi_reduction <add>, %612, %cst_470 [1] : vector<2x8xf32> to vector<2xf32>
    %614 = vector.shape_cast %613 : vector<2xf32> to vector<2x1xf32>
    %cst_471 = arith.constant 0.000000e+00 : f32
    %615 = vector.broadcast %cst_471 : f32 to vector<2x1xf32>
    %616 = arith.subf %615, %614 : vector<2x1xf32>
    %c8_i32_472 = arith.constant 8 : i32
    %617 = vector.broadcast %c8_i32_472 : i32 to vector<2x1xi32>
    %618 = arith.cmpi ne, %596, %617 : vector<2x1xi32>
    %619 = arith.extui %618 : vector<2x1xi1> to vector<2x1xi32>
    %620 = arith.sitofp %619 : vector<2x1xi32> to vector<2x1xf32>
    %621 = arith.mulf %616, %620 : vector<2x1xf32>
    %cst_473 = arith.constant dense<0.000000e+00> : vector<1xf32>
    %622 = vector.multi_reduction <add>, %621, %cst_473 [0] : vector<2x1xf32> to vector<1xf32>
    %623 = vector.shape_cast %622 : vector<1xf32> to vector<1x1xf32>
    %cst_474 = arith.constant dense<0.000000e+00> : vector<1xf32>
    %624 = vector.multi_reduction <add>, %620, %cst_474 [0] : vector<2x1xf32> to vector<1xf32>
    %625 = vector.shape_cast %624 : vector<1xf32> to vector<1x1xf32>
    %cst_475 = arith.constant 1.000000e+00 : f32
    %626 = vector.broadcast %cst_475 : f32 to vector<1x1xf32>
    %627 = arith.maximumf %625, %626 : vector<1x1xf32>
    %628 = arith.divf %623, %627 : vector<1x1xf32>
    %629 = arith.addf %595, %628 : vector<1x1xf32>
    %cst_476 = arith.constant 5.000000e-01 : f32
    %630 = vector.broadcast %cst_476 : f32 to vector<1x1xf32>
    %631 = arith.mulf %630, %629 : vector<1x1xf32>
    %c0_477 = arith.constant 0 : index
    %c0_478 = arith.constant 0 : index
    %632 = vector.load %arg22[%c0_477, %c0_478] : memref<1x1xf32, #tpu.memory_space<vmem>>, vector<1x1xf32>
    tpu.vector_store %arg22[%c0_477, %c0_478], %631 {strides = array<i32>} : memref<1x1xf32, #tpu.memory_space<vmem>>, vector<1x1xf32>,
    return
  }
}

</mosaic_0001>

<bundles_post_ra>
// kernel: bert_for_event_trigger_and_type.1
= control target key start
LH: loop header
LB: loop body
LE: loop exit
PB: predicated region body
PF: predicated region fallthrough
CT: control target
= control target key end

     0   :  { %s7712_s0 = inlined_call_operand.vmem [shape: f32[16,32], index: 0, kind: input, shape index: {}]   ;;  %s7713_s1 = inlined_call_operand.vmem [shape: f32[16,16], index: 1, kind: input, shape index: {}]   ;;  %s7714_s2 = inlined_call_operand.vmem [shape: f32[1,32], index: 2, kind: input, shape index: {}]   ;;  %s7715_s3 = inlined_call_operand.vmem [shape: f32[1,32], index: 3, kind: input, shape index: {}]   ;;  %s7716_s4 = inlined_call_operand.vmem [shape: f32[2,3,4,32,8], index: 4, kind: input, shape index: {}]   ;;  %s7717_s5 = inlined_call_operand.vmem [shape: f32[2,3,4,1,8], index: 5, kind: input, shape index: {}]   ;;  %s7718_s6 = inlined_call_operand.vmem [shape: f32[2,32,32], index: 6, kind: input, shape index: {}]   ;;  %s7719_s7 = inlined_call_operand.vmem [shape: f32[2,1,32], index: 7, kind: input, shape index: {}]   ;;  %s7720_s8 = inlined_call_operand.vmem [shape: f32[2,1,32], index: 8, kind: input, shape index: {}]   ;;  %s7721_s9 = inlined_call_operand.vmem [shape: f32[2,1,32], index: 9, kind: input, shape index: {}]   ;;  %s7722_s10 = inlined_call_operand.vmem [shape: f32[2,32,64], index: 10, kind: input, shape index: {}]   ;;  %s7723_s11 = inlined_call_operand.vmem [shape: f32[2,1,64], index: 11, kind: input, shape index: {}]   ;;  %s7724_s12 = inlined_call_operand.vmem [shape: f32[2,64,32], index: 12, kind: input, shape index: {}]   ;;  %s7725_s13 = inlined_call_operand.vmem [shape: f32[2,1,32], index: 13, kind: input, shape index: {}]   ;;  %s7726_s14 = inlined_call_operand.vmem [shape: f32[2,1,32], index: 14, kind: input, shape index: {}]   ;;  %s7727_s15 = inlined_call_operand.vmem [shape: f32[2,1,32], index: 15, kind: input, shape index: {}]   ;;  %s7728_s16 = inlined_call_operand.vmem [shape: f32[2,32], index: 16, kind: input, shape index: {}]   ;;  %s7729_s17 = inlined_call_operand.vmem [shape: f32[2], index: 17, kind: input, shape index: {}]   ;;  %s7730_s18 = inlined_call_operand.vmem [shape: s32[2,1], index: 18, kind: input, shape index: {}]   ;;  %s7731_s19 = inlined_call_operand.vmem [shape: s32[2,1], index: 19, kind: input, shape index: {}]   ;;  %s7732_s20 = inlined_call_operand.hbm [shape: f32[2,8], index: 20, kind: output, shape index: {0}]   ;;  %s7733_s21 = inlined_call_operand.hbm [shape: f32[2,8], index: 21, kind: output, shape index: {1}]   ;;  %s7734_s22 = inlined_call_operand.hbm [shape: f32[1,1], index: 22, kind: output, shape index: {2}]  }
   0x1   :  { %7740 = sst [smem:[#allocation13_spill]] %s7712_s0 }
   0x2   :  { %7741 = sst [smem:[#allocation14_spill]] %s7713_s1 }
   0x3   :  { %7742 = sst [smem:[#allocation15_spill]] %s7714_s2 }
   0x4   :  { %7743 = sst [smem:[#allocation16_spill]] %s7715_s3 }
   0x5   :  { %7744 = sst [smem:[#allocation17_spill]] %s7716_s4 }
   0x6   :  { %7745 = sst [smem:[#allocation18_spill]] %s7717_s5 }
   0x7   :  { %7746 = sst [smem:[#allocation19_spill]] %s7718_s6 }
   0x8   :  { %28 = vsyncpa [#allocation5], 0 }
   0x9   :  { %29 = vsyncpa [#allocation4], 0 }
   0xa   :  { %30 = vsyncpa [#allocation8], 0  ;;  %s71_s29 = sshll.u32 %s7729_s17, 4  ;;  %s72_s29 = int_to_ptr.vmem [resolvable:$true] %s71_s29 }
   0xb   :  { %s6536_s30 = scalar_lea.vmem %s72_s29, 16  ;;  %p6541_p1 = scmp.lt.s32.totalorder %s72_s29, %s72_s29 }
   0xc   :  { %p6537_p0 = scmp.ne.s32.totalorder %s72_s29, %s6536_s30  ;;  %p6542_p2 = scmp.lt.s32.totalorder %s6536_s30, %s6536_s30 }
   0xe   :  { %p6543_p3 = por %p6542_p2, %p6541_p1 }
  0x10   :  { %p6544_p4 = pnand %p6543_p3, %p6537_p0 }
  0x12   :  { %6547 = shalt.err (!%p6544_p4)
}
  0x13   :  { %s6620_s4 = smov [#allocation3]  }
  0x14   :  { %74 = dma.vmem_to_smem %s72_s29, 16, %s6620_s4, [#allocation5]  }
  0x15   :  { %6614 = dma.done.wait [#allocation5], 16  }
  0x16   :  { %6615 = vsyncadd [#allocation5], 4294967280 }
  0x17   :  { %82 = sfence }
  0x18   :  { %s7747_s1 = sld [smem:[#allocation13_spill]]  ;;  %vm89_vm0 = vcmask 261120   ;;  %s7748_s25 = sld [smem:[#allocation17_spill]]  ;;  %vm401_vm1 = vcmask 64512   ;;  %vm493_vm3 = vcmask 130048   ;;  %vm1065_vm4 = vcmask 130112  }
  0x19   :  { %s7749_s29 = sld [smem:[#allocation15_spill]]  ;;  %s7750_s0 = sld [smem:[#allocation16_spill]]  ;;  %vm6833_vm2 = vmpackc.low %vm401_vm1, %vm401_vm1  ;;  %vm1534_vm5 = vcmask 195712   ;;  %vm2003_vm6 = vcmask 261312   ;;  %vm2307_vm9 = vcmask 523264   ;;  %vm4789_vm12 = vcmask 1041409  }
  0x1a   :  { %s7751_s26 = sld [smem:[#allocation18_spill]]  ;;  %s7754_s23 = sld [smem:[#allocation14_spill]]  ;;  %vm4792_vm13 = vcmask 58368  }
  0x1b   :  { %s6621_s4 = smov 8   ;;  %s7755_s17 = sld [smem:[#allocation19_spill]] }
  0x1e   :  { %v85_v0 = vld [vmem:[%s7747_s1] sm:$0xff]  ;;  %v86_v1 = vld [vmem:[%s7747_s1 + $0x8] sm:$0xff]  ;;  %v135_v20 = vld [vmem:[%s7748_s25 + $0x10] sm:$0xff] }
  0x1f   :  { %v90_v2 = vsel %vm89_vm0, %v85_v0, 0.0  ;;  %v93_v3 = vsel %vm89_vm0, %v86_v1, 0.0  ;;  %v133_v14 = vld [vmem:[%s7748_s25] sm:$0xff]  ;;  %v134_v15 = vld [vmem:[%s7748_s25 + $0x8] sm:$0xff]  ;;  %v136_v21 = vld [vmem:[%s7748_s25 + $0x18] sm:$0xff] }
  0x20   :  { %91 = vadd.xlane.f32.xlu0 %v90_v2  ;;  %v6071_v16 = vpack.c.bf16 %v134_v15, %v133_v14  ;;  %v5081_v17 = vld [vmem:[%s7748_s25 + $0x100] sm:$0xff]  ;;  %v5082_v18 = vld [vmem:[%s7748_s25 + $0x108] sm:$0xff]  ;;  %v6075_v22 = vpack.c.bf16 %v136_v21, %v135_v20  ;;  %v5083_v23 = vld [vmem:[%s7748_s25 + $0x110] sm:$0xff] }
  0x21   :  { %v6087_v19 = vpack.c.bf16 %v5082_v18, %v5081_v17  ;;  %v5084_v24 = vld [vmem:[%s7748_s25 + $0x118] sm:$0xff]  ;;  %v5073_v26 = vld [vmem:[%s7748_s25 + $0x80] sm:$0xff]  ;;  %v5074_v27 = vld [vmem:[%s7748_s25 + $0x88] sm:$0xff] }
  0x22   :  { %6072 = vmatprep.subr.bf16.mxu1 %v6071_v16  ;;  %v6091_v25 = vpack.c.bf16 %v5084_v24, %v5083_v23  ;;  %v6079_v28 = vpack.c.bf16 %v5074_v27, %v5073_v26  ;;  %v5068_v36 = vld [vmem:[%s7749_s29] ss:$0 sm:$0xff]  ;;  %v5075_v43 = vld [vmem:[%s7748_s25 + $0x90] sm:$0xff]  ;;  %v5076_v44 = vld [vmem:[%s7748_s25 + $0x98] sm:$0xff]  ;;  %s6623_s29 = smov 24  }
  0x23   :  { %6074 = vmatpush3.bf16.msra.mxu1 %v6071_v16  ;;  %6088 = vmatprep.subr.bf16.mxu0 %v6087_v19  ;;  %v5069_v38 = vld [vmem:[%s7750_s0] ss:$0 sm:$0xff]  ;;  %v6083_v47 = vpack.c.bf16 %v5076_v44, %v5075_v43  ;;  %v5086_v48 = vld [vmem:[%s7751_s26 + $0x8] ss:$0 sm:$0xff]  ;;  %v5078_v58 = vld [vmem:[%s7751_s26 + $0x4] ss:$0 sm:$0xff] }
  0x24   :  { %94 = vadd.xlane.f32.xlu0 %v93_v3  ;;  %6090 = vmatpush3.bf16.msra.mxu0 %v6087_v19  ;;  %v5070_v49 = vld [vmem:[%s7751_s26] ss:$0 sm:$0xff]  ;;  %v5096_v63 = vld [vmem:[%s7748_s25 + $0x28] sm:$0xff]  ;;  %v5100_v24 = vld [vmem:[%s7751_s26 + $0x1] ss:$0 sm:$0xff]  ;;  %s6622_s0 = smov 16  }
  0x25   :  { %6076 = vmatprep.subr.bf16.mxu1 %v6075_v22  ;;  %6092 = vmatprep.subr.bf16.mxu0 %v6091_v25  ;;  %v5095_v62 = vld [vmem:[%s7748_s25 + $0x20] sm:$0xff]  ;;  %v6871_v15 = vld [vmem:[%s7754_s23 + $0x8] sm:$0xff] }
  0x26   :  { %v6105_v3 = vpack.c.bf16 %v5096_v63, %v5095_v62  ;;  %v6876_v18 = vld [vmem:[%s7754_s23] sm:$0xff] }
  0x27   :  { %6078 = vmatpush3.bf16.msra.mxu1 %v6075_v22 }
  0x28   :  { %6094 = vmatpush3.bf16.msra.mxu0 %v6091_v25  ;;  %6080 = vmatprep.subr.bf16.mxu1 %v6079_v28 }
  0xad   :  { %v92_v4 = vpop.xlane.xlu0 %91 }
  0xae   :  { %v97_v5 = vmul.f32 0.03125, %v92_v4  ;;  %v5097_v4 = vld [vmem:[%s7748_s25 + $0x30] sm:$0xff] }
  0xb0   :  { %v99_v6 = vsub.f32 %v85_v0, %v97_v5  ;;  %v5098_v5 = vld [vmem:[%s7748_s25 + $0x38] sm:$0xff] }
  0xb1   :  { %v95_v7 = vpop.xlane.xlu0 %94 }
  0xb2   :  { %v98_v8 = vmul.f32 0.03125, %v95_v7  ;;  %v101_v9 = vmul.f32 %v99_v6, %v99_v6  ;;  %v6109_v7 = vpack.c.bf16 %v5098_v5, %v5097_v4 }
  0xb4   :  { %v100_v10 = vsub.f32 %v86_v1, %v98_v8  ;;  %v103_v11 = vsel %vm89_vm0, %v101_v9, 0.0  ;;  %v5111_v8 = vld [vmem:[%s7748_s25 + $0x120] sm:$0xff]  ;;  %v5112_v9 = vld [vmem:[%s7748_s25 + $0x128] sm:$0xff] }
  0xb5   :  { %104 = vadd.xlane.f32.xlu1 %v103_v11  ;;  %v5113_v11 = vld [vmem:[%s7748_s25 + $0x130] sm:$0xff] }
  0xb6   :  { %v102_v12 = vmul.f32 %v100_v10, %v100_v10 }
  0xb8   :  { %v106_v13 = vsel %vm89_vm0, %v102_v12, 0.0  ;;  %v5114_v12 = vld [vmem:[%s7748_s25 + $0x138] sm:$0xff] }
  0xb9   :  { %107 = vadd.xlane.f32.xlu1 %v106_v13  ;;  %v6125_v13 = vpack.c.bf16 %v5114_v12, %v5113_v11  ;;  %v5142_v11 = vld [vmem:[%s7748_s25 + $0x148] sm:$0xff] }
 0x142   :  { %v105_v29 = vpop.xlane.xlu1 %104 }
 0x143   :  { %v109_v30 = vmul.f32 0.03125, %v105_v29 }
 0x145   :  { %v111_v31 = vadd.f32 1e-12, %v109_v30 }
 0x146   :  { %v108_v32 = vpop.xlane.xlu1 %107 }
 0x147   :  { %6418 = vrsqrt.f32 %v111_v31  ;;  %v110_v33 = vmul.f32 0.03125, %v108_v32 }
 0x149   :  { %v112_v34 = vadd.f32 1e-12, %v110_v33 }
 0x14b   :  { %6420 = vrsqrt.f32 %v112_v34 }
 0x151   :  { %v6419_v35 = vpop.eup %6418 }
 0x152   :  { %v115_v37 = vmul.f32 %v6419_v35, %v99_v6 }
 0x154   :  { %v123_v39 = vmul.f32 %v5068_v36, %v115_v37 }
 0x155   :  { %v6421_v40 = vpop.eup %6420 }
 0x156   :  { %v6793_v41 = vadd.f32 %v5069_v38, %v123_v39  ;;  %v116_v42 = vmul.f32 %v6421_v40, %v100_v10  ;;  %v6121_v10 = vpack.c.bf16 %v5112_v9, %v5111_v8  ;;  %v5128_v8 = vld [vmem:[%s7748_s25 + $0x58] sm:$0xff] }
 0x158   :  { %v124_v45 = vmul.f32 %v5068_v36, %v116_v42  ;;  %5621 = vmatprep.mubr.msk.f32.mxu1 %vm89_vm0, %v6793_v41  ;;  %5643 = vmatprep.mubr.msk.f32.mxu0 %vm89_vm0, %v6793_v41 }
 0x15a   :  { %v6805_v46 = vadd.f32 %v5069_v38, %v124_v45  ;;  %v5103_v45 = vld [vmem:[%s7748_s25 + $0xa0] sm:$0xff] }
 0x15c   :  { %5622 = vmatmul.mubr.msk.f32.vlgmr.msra.gmra.mrb[0].mxu1 %vm89_vm0, %v6805_v46  ;;  %5644 = vmatmul.mubr.msk.f32.vlgmr.msra.gmra.mrb[0].mxu0 %vm89_vm0, %v6805_v46 }
 0x15d   :  { %6082 = vmatpush3.bf16.msra.mxu1 %v6079_v28  ;;  %5632 = vmatprep.mubr.msk.f32.mxu1 %vm89_vm0, %v6793_v41  ;;  %v5116_v28 = vld [vmem:[%s7751_s26 + $0x9] ss:$0 sm:$0xff] }
 0x15e   :  { %6084 = vmatprep.subr.bf16.mxu1 %v6083_v47 }
 0x161   :  { %6086 = vmatpush3.bf16.msra.mxu1 %v6083_v47  ;;  %v5104_v47 = vld [vmem:[%s7748_s25 + $0xa8] sm:$0xff] }
 0x164   :  { %5633 = vmatmul.mubr.msk.f32.vlgmr.msra.gmra.mrb[2].mxu1 %vm89_vm0, %v6805_v46 }
 0x22f   :  { %v5623_v50 = vpop.f32.mrb[0].mxu1  ;;  %v5645_v51 = vpop.f32.mrb[0].mxu0 }
 0x230   :  { %v398_v52 = vadd.f32 %v5645_v51, %v5086_v48  ;;  %v216_v53 = vpop.f32.mrb[1].mxu1  ;;  %v392_v54 = vpop.f32.mrb[1].mxu0  ;;  %v222_v6 = vadd.f32 %v5623_v50, %v5070_v49 }
 0x231   :  { %v217_v55 = vadd.f32 %v5070_v49, %v216_v53  ;;  %v393_v56 = vadd.f32 %v5086_v48, %v392_v54  ;;  %v6113_v48 = vpack.c.bf16 %v5104_v47, %v5103_v45  ;;  %v5106_v53 = vld [vmem:[%s7748_s25 + $0xb8] sm:$0xff] }
 0x233   :  { %v6101_v57 = vpack.c.bf16 %v398_v52, %v393_v56  ;;  %5650 = vmatprep.mubr.msk.f32.mxu1 %vm401_vm1, %v217_v55  ;;  %v5105_v52 = vld [vmem:[%s7748_s25 + $0xb0] sm:$0xff] }
 0x235   :  { %6102 = vmatprep.subr.bf16.mxu0 %v6101_v57 }
 0x236   :  { %6104 = vmatpush3.bf16.msra.mxu0 %v6101_v57  ;;  %v6117_v57 = vpack.c.bf16 %v5106_v53, %v5105_v52 }
 0x237   :  { %v5634_v59 = vpop.f32.mrb[2].mxu1  ;;  %6114 = vmatprep.subr.bf16.mxu0 %v6113_v48 }
 0x238   :  { %v310_v60 = vadd.f32 %v5634_v59, %v5078_v58  ;;  %v304_v61 = vpop.f32.mrb[3].mxu1 }
 0x239   :  { %v305_v0 = vadd.f32 %v5078_v58, %v304_v61  ;;  %v5108_v61 = vld [vmem:[%s7751_s26 + $0x5] ss:$0 sm:$0xff] }
 0x23b   :  { %v6095_v2 = vpack.c.bf16 %v310_v60, %v305_v0 }
 0x23d   :  { %6097 = vmatprep.subr.msk.bf16.mxu1 %vm6833_vm2, %v6095_v2 }
 0x23e   :  { %6100 = vmatpush3.bf16.xpose.msk.msra.mxu1 %vm6833_vm2, %v6095_v2  ;;  %v5125_v2 = vld [vmem:[%s7748_s25 + $0x40] sm:$0xff] }
 0x23f   :  { %6106 = vmatprep.subr.bf16.mxu1 %v6105_v3 }
 0x245   :  { %5651 = vmatmul.mubr.msk.f32.vlgmr.msra.gmra.mrb[4].mxu1 %vm401_vm1, %v222_v6 }
 0x246   :  { %6108 = vmatpush3.bf16.msra.mxu1 %v6105_v3  ;;  %5668 = vmatprep.mubr.msk.f32.mxu1 %vm89_vm0, %v6793_v41  ;;  %v5126_v3 = vld [vmem:[%s7748_s25 + $0x48] sm:$0xff] }
 0x247   :  { %6110 = vmatprep.subr.bf16.mxu1 %v6109_v7  ;;  %v6139_v6 = vpack.c.bf16 %v5126_v3, %v5125_v2 }
 0x24a   :  { %6112 = vmatpush3.bf16.msra.mxu1 %v6109_v7  ;;  %v5127_v7 = vld [vmem:[%s7748_s25 + $0x50] sm:$0xff] }
 0x24b   :  { %6122 = vmatprep.subr.bf16.mxu1 %v6121_v10  ;;  %v6143_v9 = vpack.c.bf16 %v5128_v8, %v5127_v7 }
 0x24d   :  { %5669 = vmatmul.mubr.msk.f32.vlgmr.msra.gmra.mrb[6].mxu1 %vm89_vm0, %v6805_v46 }
 0x24e   :  { %6124 = vmatpush3.bf16.msra.mxu1 %v6121_v10  ;;  %5690 = vmatprep.mubr.msk.f32.mxu1 %vm89_vm0, %v6793_v41  ;;  %v5141_v10 = vld [vmem:[%s7748_s25 + $0x140] sm:$0xff] }
 0x24f   :  { %6126 = vmatprep.subr.bf16.mxu1 %v6125_v13  ;;  %v6155_v12 = vpack.c.bf16 %v5142_v11, %v5141_v10  ;;  %v5158_v10 = vld [vmem:[%s7748_s25 + $0x78] sm:$0xff] }
 0x252   :  { %6128 = vmatpush3.bf16.msra.mxu1 %v6125_v13  ;;  %v5143_v13 = vld [vmem:[%s7748_s25 + $0x150] sm:$0xff] }
 0x255   :  { %5691 = vmatmul.mubr.msk.f32.vlgmr.msra.gmra.mrb[8].mxu1 %vm89_vm0, %v6805_v46 }
 0x318   :  { %v5652_v14 = vpop.f32.mrb[4].mxu1 }
 0x319   :  { %v490_v16 = vmul.f32 0.35355338, %v5652_v14  ;;  %v480_v17 = vpop.f32.mrb[5].mxu1  ;;  %v5144_v14 = vld [vmem:[%s7748_s25 + $0x158] sm:$0xff] }
 0x31a   :  { %v489_v19 = vmul.f32 0.35355338, %v480_v17 }
 0x31b   :  { %v492_v20 = vadd.f32 %v490_v16, %v6871_v15  ;;  %v6159_v16 = vpack.c.bf16 %v5144_v14, %v5143_v13  ;;  %v5172_v13 = vld [vmem:[%s7748_s25 + $0x168] sm:$0xff] }
 0x31c   :  { %v491_v21 = vadd.f32 %v489_v19, %v6876_v18 }
 0x31d   :  { %v497_v22 = vsel %vm493_vm3, %v492_v20, -inf }
 0x31e   :  { %498 = vmax.xlane.f32.xlu1 %v497_v22  ;;  %v494_v23 = vsel %vm493_vm3, %v491_v21, -inf }
 0x31f   :  { %495 = vmax.xlane.f32.xlu0 %v494_v23 }
 0x320   :  { %v5670_v25 = vpop.f32.mrb[6].mxu1 }
 0x321   :  { %v6885_v26 = vadd.f32 %v5670_v25, %v5100_v24  ;;  %v678_v27 = vpop.f32.mrb[7].mxu1 }
 0x322   :  { %v679_v58 = vadd.f32 %v5100_v24, %v678_v27 }
 0x328   :  { %v5692_v29 = vpop.f32.mrb[8].mxu1 }
 0x329   :  { %v860_v30 = vadd.f32 %v5692_v29, %v5116_v28  ;;  %v854_v31 = vpop.f32.mrb[9].mxu1 }
 0x32a   :  { %v855_v32 = vadd.f32 %v5116_v28, %v854_v31 }
 0x32c   :  { %v6135_v33 = vpack.c.bf16 %v860_v30, %v855_v32  ;;  %v5146_v30 = vld [vmem:[%s7751_s26 + $0xa] ss:$0 sm:$0xff] }
 0x32e   :  { %6136 = vmatprep.subr.bf16.mxu1 %v6135_v33 }
 0x32f   :  { %6138 = vmatpush3.bf16.msra.mxu1 %v6135_v33 }
 0x3ab   :  { %v499_v34 = vpop.xlane.xlu1 %498 }
 0x3ac   :  { %v501_v35 = vsub.f32 %v492_v20, %v499_v34  ;;  %v496_v36 = vpop.xlane.xlu0 %495 }
 0x3ad   :  { %v500_v37 = vsub.f32 %v491_v21, %v496_v36 }
 0x3ae   :  { %v504_v38 = vmul.f32 1.442695, %v501_v35 }
 0x3af   :  { %v502_v39 = vmul.f32 1.442695, %v500_v37 }
 0x3b0   :  { %6422 = vpow2.f32 %v504_v38 }
 0x3b1   :  { %6424 = vpow2.f32 %v502_v39 }
 0x3ba   :  { %v6423_v40 = vpop.eup %6422 }
 0x3bb   :  { %v6425_v42 = vpop.eup %6424  ;;  %v509_v43 = vsel %vm493_vm3, %v6423_v40, 0.0 }
 0x3bc   :  { %510 = vadd.xlane.f32.xlu1 %v509_v43  ;;  %v506_v44 = vsel %vm493_vm3, %v6425_v42, 0.0 }
 0x3bd   :  { %507 = vadd.xlane.f32.xlu0 %v506_v44 }
 0x449   :  { %v511_v49 = vpop.xlane.xlu1 %510 }
 0x44a   :  { %6426 = vrcp.f32 %v511_v49  ;;  %v508_v50 = vpop.xlane.xlu0 %507  ;;  %v5134_v49 = vld [vmem:[%s7748_s25 + $0xc8] sm:$0xff] }
 0x44b   :  { %6428 = vrcp.f32 %v508_v50 }
 0x454   :  { %v6427_v51 = vpop.eup %6426 }
 0x455   :  { %v6429_v54 = vpop.eup %6428  ;;  %v515_v56 = vmul.f32 %v6427_v51, %v6423_v40 }
 0x456   :  { %v514_v55 = vmul.f32 %v6429_v54, %v6425_v42  ;;  %v5135_v54 = vld [vmem:[%s7748_s25 + $0xd0] sm:$0xff] }
 0x458   :  { %5657 = vmatprep.mubr.msk.f32.mxu0 %vm493_vm3, %v514_v55  ;;  %v5136_v55 = vld [vmem:[%s7748_s25 + $0xd8] sm:$0xff] }
 0x459   :  { %5658 = vmatmul.mubr.msk.f32.vlgmr.msra.gmra.mrb[2].mxu0 %vm493_vm3, %v515_v56 }
 0x45a   :  { %6116 = vmatpush3.bf16.msra.mxu0 %v6113_v48  ;;  %5679 = vmatprep.mubr.msk.f32.mxu0 %vm89_vm0, %v6793_v41  ;;  %v5133_v48 = vld [vmem:[%s7748_s25 + $0xc0] sm:$0xff] }
 0x45b   :  { %6118 = vmatprep.subr.bf16.mxu0 %v6117_v57  ;;  %v6147_v50 = vpack.c.bf16 %v5134_v49, %v5133_v48 }
 0x45d   :  { %6148 = vmatprep.subr.bf16.mxu1 %v6147_v50 }
 0x45e   :  { %6120 = vmatpush3.bf16.msra.mxu0 %v6117_v57 }
 0x461   :  { %5680 = vmatmul.mubr.msk.f32.vlgmr.msra.gmra.mrb[4].mxu0 %vm89_vm0, %v6805_v46 }
 0x462   :  { %5697 = vmatprep.mubr.msk.f32.mxu0 %vm401_vm1, %v679_v58 }
 0x52c   :  { %v5659_v59 = vpop.f32.mrb[2].mxu0 }
 0x52d   :  { %598 = vst.msk [vmem:[#allocation2 + $0x8] sm:$0xff] %vm401_vm1, %v5659_v59  ;;  %v588_v60 = vpop.f32.mrb[3].mxu0  ;;  %v6151_v59 = vpack.c.bf16 %v5136_v55, %v5135_v54 }
 0x52e   :  { %597 = vst.msk [vmem:[#allocation2] sm:$0xff] %vm401_vm1, %v588_v60 }
 0x534   :  { %v5681_v62 = vpop.f32.mrb[4].mxu0 }
 0x535   :  { %v772_v63 = vadd.f32 %v5681_v62, %v5108_v61  ;;  %v766_v0 = vpop.f32.mrb[5].mxu0 }
 0x536   :  { %v767_v4 = vadd.f32 %v5108_v61, %v766_v0 }
 0x538   :  { %v6129_v5 = vpack.c.bf16 %v772_v63, %v767_v4  ;;  %v5138_v63 = vld [vmem:[%s7751_s26 + $0x6] ss:$0 sm:$0xff] }
 0x539   :  { %v5155_v4 = vld [vmem:[%s7748_s25 + $0x60] sm:$0xff] }
 0x53a   :  { %6131 = vmatprep.subr.msk.bf16.mxu0 %vm6833_vm2, %v6129_v5 }
 0x53b   :  { %6134 = vmatpush3.bf16.xpose.msk.msra.mxu0 %vm6833_vm2, %v6129_v5  ;;  %v5156_v5 = vld [vmem:[%s7748_s25 + $0x68] sm:$0xff] }
 0x53c   :  { %6140 = vmatprep.subr.bf16.mxu0 %v6139_v6  ;;  %v6173_v8 = vpack.c.bf16 %v5156_v5, %v5155_v4  ;;  %v5168_v4 = vld [vmem:[%s7751_s26 + $0x7] ss:$0 sm:$0xff] }
 0x542   :  { %5698 = vmatmul.mubr.msk.f32.vlgmr.msra.gmra.mrb[6].mxu0 %vm401_vm1, %v6885_v26  ;;  %v5130_v26 = vld [vmem:[%s7751_s26 + $0x2] ss:$0 sm:$0xff] }
 0x543   :  { %6142 = vmatpush3.bf16.msra.mxu0 %v6139_v6  ;;  %5715 = vmatprep.mubr.msk.f32.mxu0 %vm89_vm0, %v6793_v41 }
 0x544   :  { %6144 = vmatprep.subr.bf16.mxu0 %v6143_v9 }
 0x547   :  { %6146 = vmatpush3.bf16.msra.mxu0 %v6143_v9  ;;  %v5157_v9 = vld [vmem:[%s7748_s25 + $0x70] sm:$0xff] }
 0x548   :  { %6156 = vmatprep.subr.bf16.mxu0 %v6155_v12  ;;  %v6177_v11 = vpack.c.bf16 %v5158_v10, %v5157_v9 }
 0x54a   :  { %5716 = vmatmul.mubr.msk.f32.vlgmr.msra.gmra.mrb[8].mxu0 %vm89_vm0, %v6805_v46 }
 0x54b   :  { %6158 = vmatpush3.bf16.msra.mxu0 %v6155_v12  ;;  %5737 = vmatprep.mubr.msk.f32.mxu0 %vm89_vm0, %v6793_v41  ;;  %v5171_v12 = vld [vmem:[%s7748_s25 + $0x160] sm:$0xff] }
 0x54c   :  { %6160 = vmatprep.subr.bf16.mxu0 %v6159_v16  ;;  %v6189_v14 = vpack.c.bf16 %v5172_v13, %v5171_v12 }
 0x54f   :  { %6162 = vmatpush3.bf16.msra.mxu0 %v6159_v16  ;;  %v5173_v16 = vld [vmem:[%s7748_s25 + $0x170] sm:$0xff] }
 0x552   :  { %5738 = vmatmul.mubr.msk.f32.vlgmr.msra.gmra.mrb[10].mxu0 %vm89_vm0, %v6805_v46 }
 0x615   :  { %v5699_v17 = vpop.f32.mrb[6].mxu0 }
 0x616   :  { %v951_v19 = vmul.f32 0.35355338, %v5699_v17  ;;  %v941_v20 = vpop.f32.mrb[7].mxu0  ;;  %v5174_v17 = vld [vmem:[%s7748_s25 + $0x178] sm:$0xff] }
 0x617   :  { %v950_v21 = vmul.f32 0.35355338, %v941_v20 }
 0x618   :  { %v953_v22 = vadd.f32 %v951_v19, %v6871_v15  ;;  %v6193_v19 = vpack.c.bf16 %v5174_v17, %v5173_v16 }
 0x619   :  { %v952_v23 = vadd.f32 %v950_v21, %v6876_v18 }
 0x61a   :  { %v957_v24 = vsel %vm493_vm3, %v953_v22, -inf }
 0x61b   :  { %958 = vmax.xlane.f32.xlu1 %v957_v24  ;;  %v954_v25 = vsel %vm493_vm3, %v952_v23, -inf }
 0x61c   :  { %955 = vmax.xlane.f32.xlu0 %v954_v25 }
 0x61d   :  { %v5717_v27 = vpop.f32.mrb[8].mxu0 }
 0x61e   :  { %v6961_v28 = vadd.f32 %v5717_v27, %v5130_v26  ;;  %v1147_v29 = vpop.f32.mrb[9].mxu0 }
 0x61f   :  { %v1148_v60 = vadd.f32 %v5130_v26, %v1147_v29 }
 0x625   :  { %v5739_v31 = vpop.f32.mrb[10].mxu0 }
 0x626   :  { %v1329_v32 = vadd.f32 %v5739_v31, %v5146_v30  ;;  %v1323_v33 = vpop.f32.mrb[11].mxu0 }
 0x627   :  { %v1324_v34 = vadd.f32 %v5146_v30, %v1323_v33 }
 0x629   :  { %v6169_v35 = vpack.c.bf16 %v1329_v32, %v1324_v34  ;;  %v5176_v32 = vld [vmem:[%s7751_s26 + $0xb] ss:$0 sm:$0xff] }
 0x62b   :  { %6170 = vmatprep.subr.bf16.mxu0 %v6169_v35 }
 0x62c   :  { %6172 = vmatpush3.bf16.msra.mxu0 %v6169_v35 }
 0x6a8   :  { %v959_v36 = vpop.xlane.xlu1 %958 }
 0x6a9   :  { %v961_v37 = vsub.f32 %v953_v22, %v959_v36  ;;  %v956_v38 = vpop.xlane.xlu0 %955 }
 0x6aa   :  { %v960_v39 = vsub.f32 %v952_v23, %v956_v38 }
 0x6ab   :  { %v964_v40 = vmul.f32 1.442695, %v961_v37 }
 0x6ac   :  { %v962_v42 = vmul.f32 1.442695, %v960_v39 }
 0x6ad   :  { %6430 = vpow2.f32 %v964_v40 }
 0x6ae   :  { %6432 = vpow2.f32 %v962_v42 }
 0x6b7   :  { %v6431_v43 = vpop.eup %6430 }
 0x6b8   :  { %v6433_v44 = vpop.eup %6432  ;;  %v969_v45 = vsel %vm493_vm3, %v6431_v43, 0.0 }
 0x6b9   :  { %970 = vadd.xlane.f32.xlu1 %v969_v45  ;;  %v966_v47 = vsel %vm493_vm3, %v6433_v44, 0.0 }
 0x6ba   :  { %967 = vadd.xlane.f32.xlu0 %v966_v47 }
 0x746   :  { %v971_v51 = vpop.xlane.xlu1 %970 }
 0x747   :  { %6434 = vrcp.f32 %v971_v51  ;;  %v968_v52 = vpop.xlane.xlu0 %967  ;;  %v5164_v51 = vld [vmem:[%s7748_s25 + $0xe8] sm:$0xff] }
 0x748   :  { %6436 = vrcp.f32 %v968_v52 }
 0x751   :  { %v6435_v53 = vpop.eup %6434 }
 0x752   :  { %v6437_v56 = vpop.eup %6436  ;;  %v975_v58 = vmul.f32 %v6435_v53, %v6431_v43 }
 0x753   :  { %v974_v57 = vmul.f32 %v6437_v56, %v6433_v44  ;;  %v5165_v56 = vld [vmem:[%s7748_s25 + $0xf0] sm:$0xff] }
 0x755   :  { %5704 = vmatprep.mubr.msk.f32.mxu1 %vm493_vm3, %v974_v57  ;;  %v5166_v57 = vld [vmem:[%s7748_s25 + $0xf8] sm:$0xff] }
 0x756   :  { %5705 = vmatmul.mubr.msk.f32.vlgmr.msra.gmra.mrb[10].mxu1 %vm493_vm3, %v975_v58 }
 0x757   :  { %6150 = vmatpush3.bf16.msra.mxu1 %v6147_v50  ;;  %5726 = vmatprep.mubr.msk.f32.mxu1 %vm89_vm0, %v6793_v41  ;;  %v5163_v50 = vld [vmem:[%s7748_s25 + $0xe0] sm:$0xff] }
 0x758   :  { %6152 = vmatprep.subr.bf16.mxu1 %v6151_v59  ;;  %v6181_v52 = vpack.c.bf16 %v5164_v51, %v5163_v50  ;;  %v5185_v50 = vld [vmem:[%s7719_s7] ss:$0 sm:$0xff] }
 0x75a   :  { %6182 = vmatprep.subr.bf16.mxu0 %v6181_v52 }
 0x75b   :  { %6154 = vmatpush3.bf16.msra.mxu1 %v6151_v59 }
 0x75e   :  { %5727 = vmatmul.mubr.msk.f32.vlgmr.msra.gmra.mrb[12].mxu1 %vm89_vm0, %v6805_v46 }
 0x75f   :  { %5744 = vmatprep.mubr.msk.f32.mxu1 %vm401_vm1, %v1148_v60 }
 0x829   :  { %v6987_v61 = vpop.f32.mrb[10].mxu1 }
 0x82a   :  { %v6989_v62 = vpop.f32.mrb[11].mxu1 }
 0x831   :  { %v5728_v0 = vpop.f32.mrb[12].mxu1 }
 0x832   :  { %v1241_v2 = vadd.f32 %v5728_v0, %v5138_v63  ;;  %v1235_v3 = vpop.f32.mrb[13].mxu1 }
 0x833   :  { %v1236_v6 = vadd.f32 %v5138_v63, %v1235_v3  ;;  %v6185_v63 = vpack.c.bf16 %v5166_v57, %v5165_v56 }
 0x835   :  { %v6163_v7 = vpack.c.bf16 %v1241_v2, %v1236_v6 }
 0x837   :  { %6165 = vmatprep.subr.msk.bf16.mxu1 %vm6833_vm2, %v6163_v7 }
 0x838   :  { %6168 = vmatpush3.bf16.xpose.msk.msra.mxu1 %vm6833_vm2, %v6163_v7 }
 0x839   :  { %6174 = vmatprep.subr.bf16.mxu1 %v6173_v8 }
 0x83f   :  { %5745 = vmatmul.mubr.msk.f32.vlgmr.msra.gmra.mrb[14].mxu1 %vm401_vm1, %v6961_v28  ;;  %v5160_v28 = vld [vmem:[%s7751_s26 + $0x3] ss:$0 sm:$0xff] }
 0x840   :  { %6176 = vmatpush3.bf16.msra.mxu1 %v6173_v8  ;;  %5762 = vmatprep.mubr.msk.f32.mxu1 %vm89_vm0, %v6793_v41 }
 0x841   :  { %6178 = vmatprep.subr.bf16.mxu1 %v6177_v11 }
 0x844   :  { %6180 = vmatpush3.bf16.msra.mxu1 %v6177_v11 }
 0x845   :  { %6190 = vmatprep.subr.bf16.mxu1 %v6189_v14 }
 0x847   :  { %5763 = vmatmul.mubr.msk.f32.vlgmr.msra.gmra.mrb[16].mxu1 %vm89_vm0, %v6805_v46 }
 0x848   :  { %6192 = vmatpush3.bf16.msra.mxu1 %v6189_v14  ;;  %5784 = vmatprep.mubr.msk.f32.mxu1 %vm89_vm0, %v6793_v41 }
 0x849   :  { %6194 = vmatprep.subr.bf16.mxu1 %v6193_v19 }
 0x84c   :  { %6196 = vmatpush3.bf16.msra.mxu1 %v6193_v19 }
 0x84f   :  { %5785 = vmatmul.mubr.msk.f32.vlgmr.msra.gmra.mrb[18].mxu1 %vm89_vm0, %v6805_v46 }
 0x912   :  { %v5746_v20 = vpop.f32.mrb[14].mxu1 }
 0x913   :  { %v1420_v21 = vmul.f32 0.35355338, %v5746_v20  ;;  %v1410_v22 = vpop.f32.mrb[15].mxu1 }
 0x914   :  { %v1419_v23 = vmul.f32 0.35355338, %v1410_v22 }
 0x915   :  { %v1422_v24 = vadd.f32 %v1420_v21, %v6871_v15 }
 0x916   :  { %v1421_v25 = vadd.f32 %v1419_v23, %v6876_v18 }
 0x917   :  { %v1426_v26 = vsel %vm493_vm3, %v1422_v24, -inf }
 0x918   :  { %1427 = vmax.xlane.f32.xlu1 %v1426_v26  ;;  %v1423_v27 = vsel %vm493_vm3, %v1421_v25, -inf }
 0x919   :  { %1424 = vmax.xlane.f32.xlu0 %v1423_v27 }
 0x91a   :  { %v5764_v29 = vpop.f32.mrb[16].mxu1 }
 0x91b   :  { %v1622_v30 = vadd.f32 %v5764_v29, %v5160_v28  ;;  %v1616_v31 = vpop.f32.mrb[17].mxu1 }
 0x91c   :  { %v1617_v0 = vadd.f32 %v5160_v28, %v1616_v31 }
 0x922   :  { %v5786_v33 = vpop.f32.mrb[18].mxu1 }
 0x923   :  { %v1798_v34 = vadd.f32 %v5786_v33, %v5176_v32  ;;  %v1792_v35 = vpop.f32.mrb[19].mxu1 }
 0x924   :  { %v1793_v36 = vadd.f32 %v5176_v32, %v1792_v35 }
 0x926   :  { %v6203_v37 = vpack.c.bf16 %v1798_v34, %v1793_v36  ;;  %v2008_v36 = vld [vmem:[%s7755_s17] sm:$0xff] }
 0x928   :  { %6204 = vmatprep.subr.bf16.mxu1 %v6203_v37 }
 0x929   :  { %6206 = vmatpush3.bf16.msra.mxu1 %v6203_v37  ;;  %v2009_v37 = vld [vmem:[%s7755_s17 + $0x8] sm:$0xff] }
 0x9a5   :  { %v1428_v38 = vpop.xlane.xlu1 %1427 }
 0x9a6   :  { %v1430_v39 = vsub.f32 %v1422_v24, %v1428_v38  ;;  %v1425_v40 = vpop.xlane.xlu0 %1424  ;;  %v6207_v38 = vpack.c.bf16 %v2009_v37, %v2008_v36  ;;  %v2299_v36 = vld [vmem:[%s7724_s12 + $0x38] sm:$0xff] }
 0x9a7   :  { %v1429_v42 = vsub.f32 %v1421_v25, %v1425_v40  ;;  %v2011_v40 = vld [vmem:[%s7755_s17 + $0x18] sm:$0xff] }
 0x9a8   :  { %v1433_v43 = vmul.f32 1.442695, %v1430_v39  ;;  %v2010_v39 = vld [vmem:[%s7755_s17 + $0x10] sm:$0xff] }
 0x9a9   :  { %v1431_v44 = vmul.f32 1.442695, %v1429_v42  ;;  %v6211_v42 = vpack.c.bf16 %v2011_v40, %v2010_v39 }
 0x9aa   :  { %6438 = vpow2.f32 %v1433_v43 }
 0x9ab   :  { %6440 = vpow2.f32 %v1431_v44 }
 0x9b4   :  { %v6439_v45 = vpop.eup %6438 }
 0x9b5   :  { %v6441_v47 = vpop.eup %6440  ;;  %v1438_v48 = vsel %vm493_vm3, %v6439_v45, 0.0 }
 0x9b6   :  { %1439 = vadd.xlane.f32.xlu1 %v1438_v48  ;;  %v1435_v49 = vsel %vm493_vm3, %v6441_v47, 0.0 }
 0x9b7   :  { %1436 = vadd.xlane.f32.xlu0 %v1435_v49 }
 0xa43   :  { %v1440_v53 = vpop.xlane.xlu1 %1439 }
 0xa44   :  { %6442 = vrcp.f32 %v1440_v53  ;;  %v1437_v54 = vpop.xlane.xlu0 %1436 }
 0xa45   :  { %6444 = vrcp.f32 %v1437_v54 }
 0xa4e   :  { %v6443_v55 = vpop.eup %6442 }
 0xa4f   :  { %v6445_v58 = vpop.eup %6444  ;;  %v1444_v60 = vmul.f32 %v6443_v55, %v6439_v45 }
 0xa50   :  { %v1443_v59 = vmul.f32 %v6445_v58, %v6441_v47 }
 0xa52   :  { %5751 = vmatprep.mubr.msk.f32.mxu0 %vm493_vm3, %v1443_v59 }
 0xa53   :  { %5752 = vmatmul.mubr.msk.f32.vlgmr.msra.gmra.mrb[12].mxu0 %vm493_vm3, %v1444_v60 }
 0xa54   :  { %6184 = vmatpush3.bf16.msra.mxu0 %v6181_v52  ;;  %5773 = vmatprep.mubr.msk.f32.mxu0 %vm89_vm0, %v6793_v41 }
 0xa55   :  { %6186 = vmatprep.subr.bf16.mxu0 %v6185_v63 }
 0xa58   :  { %6188 = vmatpush3.bf16.msra.mxu0 %v6185_v63 }
 0xa5b   :  { %5774 = vmatmul.mubr.msk.f32.vlgmr.msra.gmra.mrb[14].mxu0 %vm89_vm0, %v6805_v46 }
 0xa5c   :  { %5791 = vmatprep.mubr.msk.f32.mxu0 %vm401_vm1, %v1617_v0 }
 0xb26   :  { %v5753_v2 = vpop.f32.mrb[12].mxu0 }
 0xb27   :  { %v1517_v3 = vpop.f32.mrb[13].mxu0 }
 0xb2e   :  { %v5775_v5 = vpop.f32.mrb[14].mxu0 }
 0xb2f   :  { %v1710_v6 = vadd.f32 %v5775_v5, %v5168_v4  ;;  %v1704_v7 = vpop.f32.mrb[15].mxu0 }
 0xb30   :  { %v1705_v8 = vadd.f32 %v5168_v4, %v1704_v7  ;;  %v2147_v7 = vld [vmem:[%s7722_s10 + $0x8] sm:$0xff] }
 0xb32   :  { %v6197_v9 = vpack.c.bf16 %v1710_v6, %v1705_v8 }
 0xb34   :  { %6199 = vmatprep.subr.msk.bf16.mxu0 %vm6833_vm2, %v6197_v9 }
 0xb35   :  { %6202 = vmatpush3.bf16.xpose.msk.msra.mxu0 %vm6833_vm2, %v6197_v9  ;;  %v2148_v9 = vld [vmem:[%s7722_s10 + $0x10] sm:$0xff] }
 0xb36   :  { %6208 = vmatprep.subr.bf16.mxu0 %v6207_v38 }
 0xb3c   :  { %5792 = vmatmul.mubr.msk.f32.vlgmr.msra.gmra.mrb[16].mxu0 %vm401_vm1, %v1622_v30 }
 0xb3d   :  { %6210 = vmatpush3.bf16.msra.mxu0 %v6207_v38  ;;  %v5190_v38 = vld [vmem:[%s7723_s11] ss:$0 sm:$0xff] }
 0xb3e   :  { %6212 = vmatprep.subr.bf16.mxu0 %v6211_v42 }
 0xb41   :  { %6214 = vmatpush3.bf16.msra.mxu0 %v6211_v42 }
 0xc0f   :  { %v5793_v10 = vpop.f32.mrb[16].mxu0 }
 0xc10   :  { %v1889_v11 = vmul.f32 0.35355338, %v5793_v10  ;;  %v1879_v12 = vpop.f32.mrb[17].mxu0  ;;  %v2149_v10 = vld [vmem:[%s7722_s10 + $0x18] sm:$0xff] }
 0xc11   :  { %v1888_v13 = vmul.f32 0.35355338, %v1879_v12 }
 0xc12   :  { %v1891_v14 = vadd.f32 %v1889_v11, %v6871_v15  ;;  %v6219_v11 = vpack.c.bf16 %v2149_v10, %v2148_v9 }
 0xc13   :  { %v1890_v16 = vadd.f32 %v1888_v13, %v6876_v18 }
 0xc14   :  { %v1895_v17 = vsel %vm493_vm3, %v1891_v14, -inf }
 0xc15   :  { %1896 = vmax.xlane.f32.xlu1 %v1895_v17  ;;  %v1892_v19 = vsel %vm493_vm3, %v1890_v16, -inf }
 0xc16   :  { %1893 = vmax.xlane.f32.xlu0 %v1892_v19 }
 0xca2   :  { %v1897_v20 = vpop.xlane.xlu1 %1896 }
 0xca3   :  { %v1899_v21 = vsub.f32 %v1891_v14, %v1897_v20  ;;  %v1894_v22 = vpop.xlane.xlu0 %1893 }
 0xca4   :  { %v1898_v23 = vsub.f32 %v1890_v16, %v1894_v22 }
 0xca5   :  { %v1902_v24 = vmul.f32 1.442695, %v1899_v21  ;;  %v5188_v21 = vld [vmem:[%s7720_s8] ss:$0 sm:$0xff] }
 0xca6   :  { %v1900_v25 = vmul.f32 1.442695, %v1898_v23  ;;  %v5189_v23 = vld [vmem:[%s7721_s9] ss:$0 sm:$0xff] }
 0xca7   :  { %6446 = vpow2.f32 %v1902_v24 }
 0xca8   :  { %6448 = vpow2.f32 %v1900_v25 }
 0xcb1   :  { %v6447_v26 = vpop.eup %6446 }
 0xcb2   :  { %v6449_v27 = vpop.eup %6448  ;;  %v1907_v15 = vsel %vm493_vm3, %v6447_v26, 0.0 }
 0xcb3   :  { %1908 = vadd.xlane.f32.xlu1 %v1907_v15  ;;  %v1904_v18 = vsel %vm493_vm3, %v6449_v27, 0.0 }
 0xcb4   :  { %1905 = vadd.xlane.f32.xlu0 %v1904_v18 }
 0xcc4   :  { %1061 = vrot.lane.b32.xlu1 %v6987_v61, %s6621_s4 }
 0xcc8   :  { %1528 = vrot.lane.b32.xlu1 %v1517_v3, %s6622_s0 }
 0xcca   :  { %1059 = vrot.lane.b32.xlu0 %v6989_v62, %s6621_s4 }
 0xccc   :  { %1530 = vrot.lane.b32.xlu1 %v5753_v2, %s6622_s0 }
 0xd40   :  { %v1909_v28 = vpop.xlane.xlu1 %1908 }
 0xd41   :  { %6450 = vrcp.f32 %v1909_v28  ;;  %v1906_v29 = vpop.xlane.xlu0 %1905  ;;  %v2292_v28 = vld [vmem:[%s7724_s12] sm:$0xff] }
 0xd42   :  { %6452 = vrcp.f32 %v1906_v29  ;;  %v2293_v29 = vld [vmem:[%s7724_s12 + $0x8] sm:$0xff] }
 0xd44   :  { %v1062_v30 = vpop.permute.xlu1 %1061 }
 0xd45   :  { %1067 = vst.msk [vmem:[#allocation2 + $0x8] sm:$0xff] %vm1065_vm4, %v1062_v30  ;;  %v1060_v31 = vpop.permute.xlu0 %1059  ;;  %v6223_v30 = vpack.c.bf16 %v2293_v29, %v2292_v28 }
 0xd46   :  { %1066 = vst.msk [vmem:[#allocation2] sm:$0xff] %vm1065_vm4, %v1060_v31  ;;  %v2294_v31 = vld [vmem:[%s7724_s12 + $0x10] sm:$0xff] }
 0xd47   :  { %6224 = vmatprep.subr.bf16.mxu0 %v6223_v30 }
 0xd48   :  { %v1529_v61 = vpop.permute.xlu1 %1528 }
 0xd49   :  { %1535 = vst.msk [vmem:[#allocation2] sm:$0xff] %vm1534_vm5, %v1529_v61  ;;  %v2295_v61 = vld [vmem:[%s7724_s12 + $0x18] sm:$0xff] }
 0xd4b   :  { %v6451_v32 = vpop.eup %6450 }
 0xd4c   :  { %v6453_v33 = vpop.eup %6452  ;;  %v1531_v62 = vpop.permute.xlu1 %1530  ;;  %v1913_v35 = vmul.f32 %v6451_v32, %v6447_v26  ;;  %v6227_v32 = vpack.c.bf16 %v2295_v61, %v2294_v31 }
 0xd4d   :  { %1536 = vst.msk [vmem:[#allocation2 + $0x8] sm:$0xff] %vm1534_vm5, %v1531_v62  ;;  %v1912_v34 = vmul.f32 %v6453_v33, %v6449_v27  ;;  %v2296_v33 = vld [vmem:[%s7724_s12 + $0x20] sm:$0xff]  ;;  %v2297_v62 = vld [vmem:[%s7724_s12 + $0x28] sm:$0xff] }
 0xd4f   :  { %5798 = vmatprep.mubr.msk.f32.mxu1 %vm493_vm3, %v1912_v34  ;;  %v6231_v34 = vpack.c.bf16 %v2297_v62, %v2296_v33  ;;  %v5193_v33 = vld [vmem:[%s7725_s13] ss:$0 sm:$0xff] }
 0xd50   :  { %5799 = vmatmul.mubr.msk.f32.vlgmr.msra.gmra.mrb[20].mxu1 %vm493_vm3, %v1913_v35  ;;  %v2298_v35 = vld [vmem:[%s7724_s12 + $0x30] sm:$0xff] }
 0xd51   :  { %v6235_v37 = vpack.c.bf16 %v2299_v36, %v2298_v35 }
 0xe23   :  { %v5800_v43 = vpop.f32.mrb[20].mxu1 }
 0xe24   :  { %1999 = vrot.lane.b32.xlu1 %v5800_v43, %s6623_s29  ;;  %v1986_v44 = vpop.f32.mrb[21].mxu1 }
 0xe25   :  { %1997 = vrot.lane.b32.xlu0 %v1986_v44, %s6623_s29 }
 0xe96   :  { %v2000_v45 = vpop.permute.xlu1 %1999 }
 0xe97   :  { %2005 = vst.msk [vmem:[#allocation2 + $0x8] sm:$0xff] %vm2003_vm6, %v2000_v45  ;;  %v1998_v47 = vpop.permute.xlu0 %1997 }
 0xe98   :  { %2004 = vst.msk [vmem:[#allocation2] sm:$0xff] %vm2003_vm6, %v1998_v47 }
 0xe9e   :  { %v2007_v49 = vld [vmem:[#allocation2 + $0x8] sm:$0xff] }
 0xe9f   :  { %v2006_v48 = vld [vmem:[#allocation2] sm:$0xff] }
 0xea0   :  { %5809 = vmatprep.mubr.msk.f32.mxu0 %vm89_vm0, %v2006_v48 }
 0xea1   :  { %5810 = vmatmul.mubr.msk.f32.vlgmr.msra.gmra.mrb[18].mxu0 %vm89_vm0, %v2007_v49 }
 0xea2   :  { %6226 = vmatpush3.bf16.msra.mxu0 %v6223_v30 }
 0xea3   :  { %6228 = vmatprep.subr.bf16.mxu0 %v6227_v32 }
 0xea6   :  { %6230 = vmatpush3.bf16.msra.mxu0 %v6227_v32 }
 0xea7   :  { %6232 = vmatprep.subr.bf16.mxu0 %v6231_v34 }
 0xeaa   :  { %6234 = vmatpush3.bf16.msra.mxu0 %v6231_v34 }
 0xeab   :  { %6236 = vmatprep.subr.bf16.mxu0 %v6235_v37 }
 0xeae   :  { %6238 = vmatpush3.bf16.msra.mxu0 %v6235_v37 }
 0xf74   :  { %v5811_v51 = vpop.f32.mrb[18].mxu0 }
 0xf75   :  { %v2097_v52 = vadd.f32 %v5811_v51, %v5185_v50  ;;  %v2091_v53 = vpop.f32.mrb[19].mxu0 }
 0xf76   :  { %v2092_v54 = vadd.f32 %v5185_v50, %v2091_v53 }
 0xf77   :  { %v2101_v55 = vadd.f32 %v2097_v52, %v6805_v46 }
 0xf78   :  { %v2100_v56 = vadd.f32 %v2092_v54, %v6793_v41  ;;  %v2146_v41 = vld [vmem:[%s7722_s10] sm:$0xff] }
 0xf79   :  { %v2107_v57 = vsel %vm89_vm0, %v2101_v55, 0.0  ;;  %v6215_v8 = vpack.c.bf16 %v2147_v7, %v2146_v41 }
 0xf7a   :  { %2108 = vadd.xlane.f32.xlu1 %v2107_v57  ;;  %v2104_v58 = vsel %vm89_vm0, %v2100_v56, 0.0 }
 0xf7b   :  { %2105 = vadd.xlane.f32.xlu0 %v2104_v58  ;;  %6216 = vmatprep.subr.bf16.mxu1 %v6215_v8 }
 0xf7c   :  { %6218 = vmatpush3.bf16.msra.mxu1 %v6215_v8 }
 0xf7d   :  { %6220 = vmatprep.subr.bf16.mxu1 %v6219_v11 }
 0xf80   :  { %6222 = vmatpush3.bf16.msra.mxu1 %v6219_v11 }
0x1007   :  { %v2109_v59 = vpop.xlane.xlu1 %2108 }
0x1008   :  { %v2111_v60 = vmul.f32 0.03125, %v2109_v59  ;;  %v2106_v63 = vpop.xlane.xlu0 %2105 }
0x1009   :  { %v2110_v0 = vmul.f32 0.03125, %v2106_v63 }
0x100a   :  { %v2113_v2 = vsub.f32 %v2101_v55, %v2111_v60 }
0x100b   :  { %v2112_v3 = vsub.f32 %v2100_v56, %v2110_v0 }
0x100c   :  { %v2115_v6 = vmul.f32 %v2113_v2, %v2113_v2 }
0x100d   :  { %v2114_v4 = vmul.f32 %v2112_v3, %v2112_v3 }
0x100e   :  { %v2119_v46 = vsel %vm89_vm0, %v2115_v6, 0.0 }
0x100f   :  { %v2116_v5 = vsel %vm89_vm0, %v2114_v4, 0.0 }
0x1010   :  { %2117 = vadd.xlane.f32.xlu0 %v2116_v5 }
0x1014   :  { %2120 = vadd.xlane.f32.xlu0 %v2119_v46 }
0x109d   :  { %v2118_v12 = vpop.xlane.xlu0 %2117 }
0x109e   :  { %v2122_v13 = vmul.f32 0.03125, %v2118_v12 }
0x10a0   :  { %v2124_v14 = vadd.f32 1e-12, %v2122_v13 }
0x10a1   :  { %v2121_v16 = vpop.xlane.xlu0 %2120 }
0x10a2   :  { %6454 = vrsqrt.f32 %v2124_v14  ;;  %v2123_v17 = vmul.f32 0.03125, %v2121_v16 }
0x10a4   :  { %v2125_v19 = vadd.f32 1e-12, %v2123_v17 }
0x10a6   :  { %6456 = vrsqrt.f32 %v2125_v19 }
0x10ac   :  { %v6455_v20 = vpop.eup %6454 }
0x10ad   :  { %v2128_v22 = vmul.f32 %v6455_v20, %v2112_v3 }
0x10af   :  { %v2136_v24 = vmul.f32 %v5188_v21, %v2128_v22 }
0x10b0   :  { %v6457_v25 = vpop.eup %6456 }
0x10b1   :  { %v2129_v26 = vmul.f32 %v6457_v25, %v2113_v2  ;;  %v7134_v27 = vadd.f32 %v5189_v23, %v2136_v24 }
0x10b3   :  { %v2137_v15 = vmul.f32 %v5188_v21, %v2129_v26  ;;  %5820 = vmatprep.mubr.msk.f32.mxu1 %vm89_vm0, %v7134_v27 }
0x10b5   :  { %v7138_v18 = vadd.f32 %v5189_v23, %v2137_v15 }
0x10b7   :  { %5821 = vmatmul.mubr.msk.f32.vlgmr.msra.gmra.mrb[22].mxu1 %vm89_vm0, %v7138_v18 }
0x118a   :  { %v5822_v39 = vpop.f32.mrb[22].mxu1 }
0x118b   :  { %v2235_v40 = vadd.f32 %v5822_v39, %v5190_v38  ;;  %v2229_v42 = vpop.f32.mrb[23].mxu1 }
0x118c   :  { %v2230_v43 = vadd.f32 %v5190_v38, %v2229_v42 }
0x118d   :  { %v2241_v44 = vmul.f32 0.70710677, %v2235_v40  ;;  %v2239_v31 = vmul.f32 0.5, %v2235_v40 }
0x118e   :  { %v2240_v45 = vmul.f32 0.70710677, %v2230_v43  ;;  %v2238_v29 = vmul.f32 0.5, %v2230_v43 }
0x118f   :  { %v2243_v47 = vand.u32 2147483647, %v2241_v44  ;;  %vm2283_vm7 = vcmp.ge.f32.partialorder %v2241_v44, 0.0 }
0x1190   :  { %v2242_v48 = vand.u32 2147483647, %v2240_v45  ;;  %vm2282_vm8 = vcmp.ge.f32.partialorder %v2240_v45, 0.0 }
0x1191   :  { %v2245_v49 = vmul.f32 0.3275911, %v2243_v47  ;;  %v2271_v53 = vsub.f32 0.0, %v2243_v47 }
0x1192   :  { %v2244_v50 = vmul.f32 0.3275911, %v2242_v48  ;;  %v2270_v54 = vsub.f32 0.0, %v2242_v48 }
0x1193   :  { %v2247_v51 = vadd.f32 1.0, %v2245_v49  ;;  %v2273_v56 = vmul.f32 %v2271_v53, %v2243_v47 }
0x1194   :  { %v2246_v52 = vadd.f32 1.0, %v2244_v50  ;;  %v2272_v59 = vmul.f32 %v2270_v54, %v2242_v48  ;;  %v5214_v54 = vld [vmem:[%s7748_s25 + $0x280] sm:$0xff] }
0x1195   :  { %6458 = vrcp.f32 %v2247_v51  ;;  %v2276_v0 = vmul.f32 1.442695, %v2273_v56 }
0x1196   :  { %6460 = vrcp.f32 %v2246_v52  ;;  %v2274_v4 = vmul.f32 1.442695, %v2272_v59  ;;  %v5199_v52 = vld [vmem:[%s7748_s25 + $0x188] sm:$0xff] }
0x1197   :  { %6462 = vpow2.f32 %v2276_v0 }
0x1198   :  { %6464 = vpow2.f32 %v2274_v4 }
0x119f   :  { %v6459_v55 = vpop.eup %6458 }
0x11a0   :  { %v6461_v57 = vpop.eup %6460  ;;  %v2253_v58 = vmul.f32 1.0614054, %v6459_v55 }
0x11a1   :  { %v2252_v60 = vmul.f32 1.0614054, %v6461_v57  ;;  %v6463_v16 = vpop.eup %6462 }
0x11a2   :  { %v2255_v63 = vadd.f32 -1.4531521, %v2253_v58  ;;  %v6465_v19 = vpop.eup %6464  ;;  %v5201_v58 = vld [vmem:[%s7748_s25 + $0x198] sm:$0xff] }
0x11a3   :  { %v2254_v2 = vadd.f32 -1.4531521, %v2252_v60  ;;  %v5216_v60 = vld [vmem:[%s7748_s25 + $0x290] sm:$0xff] }
0x11a4   :  { %v2257_v3 = vmul.f32 %v6459_v55, %v2255_v63  ;;  %v5217_v63 = vld [vmem:[%s7748_s25 + $0x298] sm:$0xff] }
0x11a5   :  { %v2256_v5 = vmul.f32 %v6461_v57, %v2254_v2  ;;  %v6259_v0 = vpack.c.bf16 %v5217_v63, %v5216_v60  ;;  %v5206_v2 = vld [vmem:[%s7748_s25 + $0x200] sm:$0xff]  ;;  %v5233_v63 = vld [vmem:[%s7751_s26 + $0xd] ss:$0 sm:$0xff] }
0x11a6   :  { %v2259_v6 = vadd.f32 1.4214138, %v2257_v3  ;;  %v5207_v3 = vld [vmem:[%s7748_s25 + $0x208] sm:$0xff] }
0x11a7   :  { %v2258_v46 = vadd.f32 1.4214138, %v2256_v5  ;;  %v6247_v4 = vpack.c.bf16 %v5207_v3, %v5206_v2 }
0x11a8   :  { %v2261_v41 = vmul.f32 %v6459_v55, %v2259_v6 }
0x11a9   :  { %v2260_v7 = vmul.f32 %v6461_v57, %v2258_v46 }
0x11aa   :  { %v2263_v8 = vadd.f32 -0.28449672, %v2261_v41 }
0x11ab   :  { %v2262_v9 = vadd.f32 -0.28449672, %v2260_v7 }
0x11ac   :  { %v2265_v10 = vmul.f32 %v6459_v55, %v2263_v8 }
0x11ad   :  { %v2264_v11 = vmul.f32 %v6461_v57, %v2262_v9 }
0x11ae   :  { %v2267_v12 = vadd.f32 0.2548296, %v2265_v10  ;;  %v5196_v10 = vld [vmem:[%s7726_s14] ss:$0 sm:$0xff] }
0x11af   :  { %v2266_v13 = vadd.f32 0.2548296, %v2264_v11 }
0x11b0   :  { %v2269_v14 = vmul.f32 %v6459_v55, %v2267_v12  ;;  %v5215_v55 = vld [vmem:[%s7748_s25 + $0x288] sm:$0xff] }
0x11b1   :  { %v2268_v17 = vmul.f32 %v6461_v57, %v2266_v13  ;;  %v6255_v56 = vpack.c.bf16 %v5215_v55, %v5214_v54  ;;  %v5200_v57 = vld [vmem:[%s7748_s25 + $0x190] sm:$0xff]  ;;  %v7288_v55 = vld [vmem:[%s7754_s23 + $0x8] sm:$0xff] }
0x11b2   :  { %v2279_v20 = vmul.f32 %v6463_v16, %v2269_v14  ;;  %v6243_v59 = vpack.c.bf16 %v5201_v58, %v5200_v57  ;;  %v5197_v14 = vld [vmem:[%s7727_s15] ss:$0 sm:$0xff] }
0x11b3   :  { %v2278_v21 = vmul.f32 %v6465_v19, %v2268_v17  ;;  %6256 = vmatprep.subr.bf16.mxu0 %v6255_v56  ;;  %v5208_v19 = vld [vmem:[%s7748_s25 + $0x210] sm:$0xff]  ;;  %v7294_v57 = vld [vmem:[%s7754_s23] sm:$0xff] }
0x11b4   :  { %v2281_v22 = vsub.f32 1.0, %v2279_v20  ;;  %v5209_v20 = vld [vmem:[%s7748_s25 + $0x218] sm:$0xff] }
0x11b5   :  { %v2280_v23 = vsub.f32 1.0, %v2278_v21 }
0x11b6   :  { %v2285_v24 = vsub.f32 0.0, %v2281_v22 }
0x11b7   :  { %v2284_v25 = vsub.f32 0.0, %v2280_v23 }
0x11b8   :  { %v2287_v26 = vsel %vm2283_vm7, %v2281_v22, %v2285_v24  ;;  %v5219_v24 = vld [vmem:[%s7751_s26 + $0x14] ss:$0 sm:$0xff] }
0x11b9   :  { %v2289_v15 = vadd.f32 1.0, %v2287_v26  ;;  %v2286_v28 = vsel %vm2282_vm8, %v2280_v23, %v2284_v25  ;;  %v6251_v23 = vpack.c.bf16 %v5209_v20, %v5208_v19  ;;  %v5203_v25 = vld [vmem:[%s7751_s26 + $0xc] ss:$0 sm:$0xff]  ;;  %v5236_v20 = vld [vmem:[%s7748_s25 + $0x220] sm:$0xff] }
0x11ba   :  { %v2288_v30 = vadd.f32 1.0, %v2286_v28 }
0x11bb   :  { %v2291_v32 = vmul.f32 %v2289_v15, %v2239_v31 }
0x11bc   :  { %v2290_v61 = vmul.f32 %v2288_v30, %v2238_v29 }
0x11be   :  { %5839 = vmatprep.mubr.msk.f32.mxu0 %vm2307_vm9, %v2290_v61 }
0x11bf   :  { %5840 = vmatmul.mubr.msk.f32.vlgmr.msra.gmra.mrb[20].mxu0 %vm2307_vm9, %v2291_v32 }
0x11c0   :  { %6258 = vmatpush3.bf16.msra.mxu0 %v6255_v56 }
0x11c1   :  { %6260 = vmatprep.subr.bf16.mxu0 %v6259_v0 }
0x11c4   :  { %6262 = vmatpush3.bf16.msra.mxu0 %v6259_v0 }
0x1292   :  { %v5841_v62 = vpop.f32.mrb[20].mxu0 }
0x1293   :  { %v2386_v34 = vadd.f32 %v5841_v62, %v5193_v33  ;;  %v2380_v35 = vpop.f32.mrb[21].mxu0 }
0x1294   :  { %v2381_v36 = vadd.f32 %v5193_v33, %v2380_v35  ;;  %v5211_v33 = vld [vmem:[%s7751_s26 + $0x10] ss:$0 sm:$0xff] }
0x1295   :  { %v2390_v37 = vadd.f32 %v2386_v34, %v7138_v18 }
0x1296   :  { %v2389_v38 = vadd.f32 %v2381_v36, %v7134_v27  ;;  %v5198_v27 = vld [vmem:[%s7748_s25 + $0x180] sm:$0xff] }
0x1297   :  { %v2396_v39 = vsel %vm89_vm0, %v2390_v37, 0.0  ;;  %v6239_v53 = vpack.c.bf16 %v5199_v52, %v5198_v27  ;;  %v5228_v36 = vld [vmem:[%s7748_s25 + $0x1a0] sm:$0xff] }
0x1298   :  { %2397 = vadd.xlane.f32.xlu1 %v2396_v39  ;;  %v2393_v40 = vsel %vm89_vm0, %v2389_v38, 0.0 }
0x1299   :  { %2394 = vadd.xlane.f32.xlu0 %v2393_v40  ;;  %6240 = vmatprep.subr.bf16.mxu1 %v6239_v53 }
0x129a   :  { %6242 = vmatpush3.bf16.msra.mxu1 %v6239_v53 }
0x129b   :  { %6244 = vmatprep.subr.bf16.mxu1 %v6243_v59 }
0x129e   :  { %6246 = vmatpush3.bf16.msra.mxu1 %v6243_v59 }
0x129f   :  { %6248 = vmatprep.subr.bf16.mxu1 %v6247_v4 }
0x1325   :  { %v2398_v42 = vpop.xlane.xlu1 %2397 }
0x1326   :  { %v2400_v43 = vmul.f32 0.03125, %v2398_v42  ;;  %v2395_v44 = vpop.xlane.xlu0 %2394  ;;  %v5230_v42 = vld [vmem:[%s7748_s25 + $0x1b0] sm:$0xff] }
0x1327   :  { %v2399_v45 = vmul.f32 0.03125, %v2395_v44 }
0x1328   :  { %v2402_v47 = vsub.f32 %v2390_v37, %v2400_v43  ;;  %v5229_v37 = vld [vmem:[%s7748_s25 + $0x1a8] sm:$0xff]  ;;  %v5231_v43 = vld [vmem:[%s7748_s25 + $0x1b8] sm:$0xff] }
0x1329   :  { %v2401_v48 = vsub.f32 %v2389_v38, %v2399_v45  ;;  %v6273_v40 = vpack.c.bf16 %v5229_v37, %v5228_v36  ;;  %v6277_v45 = vpack.c.bf16 %v5231_v43, %v5230_v42 }
0x132a   :  { %v2404_v49 = vmul.f32 %v2402_v47, %v2402_v47 }
0x132b   :  { %v2403_v50 = vmul.f32 %v2401_v48, %v2401_v48 }
0x132c   :  { %v2408_v51 = vsel %vm89_vm0, %v2404_v49, 0.0 }
0x132d   :  { %2409 = vadd.xlane.f32.xlu1 %v2408_v51  ;;  %v2405_v18 = vsel %vm89_vm0, %v2403_v50, 0.0  ;;  %v5246_v50 = vld [vmem:[%s7748_s25 + $0x2b0] sm:$0xff]  ;;  %v5247_v51 = vld [vmem:[%s7748_s25 + $0x2b8] sm:$0xff] }
0x132e   :  { %2406 = vadd.xlane.f32.xlu0 %v2405_v18  ;;  %v6293_v18 = vpack.c.bf16 %v5247_v51, %v5246_v50  ;;  %v5275_v50 = vld [vmem:[%s7748_s25 + $0x2c8] sm:$0xff] }
0x13ba   :  { %v2410_v5 = vpop.xlane.xlu1 %2409 }
0x13bb   :  { %v2412_v6 = vmul.f32 0.03125, %v2410_v5  ;;  %v2407_v46 = vpop.xlane.xlu0 %2406 }
0x13bc   :  { %v2411_v41 = vmul.f32 0.03125, %v2407_v46 }
0x13bd   :  { %v2414_v7 = vadd.f32 1e-12, %v2412_v6 }
0x13be   :  { %v2413_v8 = vadd.f32 1e-12, %v2411_v41 }
0x13bf   :  { %6466 = vrsqrt.f32 %v2414_v7 }
0x13c0   :  { %6468 = vrsqrt.f32 %v2413_v8 }
0x13c9   :  { %v6467_v9 = vpop.eup %6466 }
0x13ca   :  { %v6469_v11 = vpop.eup %6468  ;;  %v2418_v12 = vmul.f32 %v6467_v9, %v2402_v47  ;;  %v5244_v47 = vld [vmem:[%s7748_s25 + $0x2a0] sm:$0xff] }
0x13cb   :  { %v2417_v13 = vmul.f32 %v6469_v11, %v2401_v48  ;;  %v5245_v48 = vld [vmem:[%s7748_s25 + $0x2a8] sm:$0xff] }
0x13cc   :  { %v2426_v16 = vmul.f32 %v5196_v10, %v2418_v12  ;;  %v6289_v49 = vpack.c.bf16 %v5245_v48, %v5244_v47  ;;  %v5261_v47 = vld [vmem:[%s7748_s25 + $0x1d8] sm:$0xff] }
0x13cd   :  { %v2425_v17 = vmul.f32 %v5196_v10, %v2417_v13 }
0x13ce   :  { %v7224_v22 = vadd.f32 %v5197_v14, %v2426_v16 }
0x13cf   :  { %v7222_v21 = vadd.f32 %v5197_v14, %v2425_v17 }
0x13d1   :  { %5850 = vmatprep.mubr.msk.f32.mxu1 %vm89_vm0, %v7222_v21  ;;  %5872 = vmatprep.mubr.msk.f32.mxu0 %vm89_vm0, %v7222_v21 }
0x13d2   :  { %5851 = vmatmul.mubr.msk.f32.vlgmr.msra.gmra.mrb[24].mxu1 %vm89_vm0, %v7224_v22  ;;  %5873 = vmatmul.mubr.msk.f32.vlgmr.msra.gmra.mrb[22].mxu0 %vm89_vm0, %v7224_v22 }
0x13d3   :  { %6250 = vmatpush3.bf16.msra.mxu1 %v6247_v4  ;;  %5861 = vmatprep.mubr.msk.f32.mxu1 %vm89_vm0, %v7222_v21  ;;  %v5249_v4 = vld [vmem:[%s7751_s26 + $0x15] ss:$0 sm:$0xff] }
0x13d4   :  { %6252 = vmatprep.subr.bf16.mxu1 %v6251_v23 }
0x13d7   :  { %6254 = vmatpush3.bf16.msra.mxu1 %v6251_v23  ;;  %v5237_v23 = vld [vmem:[%s7748_s25 + $0x228] sm:$0xff] }
0x13da   :  { %5862 = vmatmul.mubr.msk.f32.vlgmr.msra.gmra.mrb[26].mxu1 %vm89_vm0, %v7224_v22 }
0x14a5   :  { %v5852_v26 = vpop.f32.mrb[24].mxu1  ;;  %v5874_v15 = vpop.f32.mrb[22].mxu0 }
0x14a6   :  { %v2702_v28 = vadd.f32 %v5874_v15, %v5219_v24  ;;  %v2520_v29 = vpop.f32.mrb[25].mxu1  ;;  %v2696_v30 = vpop.f32.mrb[23].mxu0  ;;  %v2526_v44 = vadd.f32 %v5852_v26, %v5203_v25 }
0x14a7   :  { %v2521_v31 = vadd.f32 %v5203_v25, %v2520_v29  ;;  %v2697_v61 = vadd.f32 %v5219_v24, %v2696_v30  ;;  %v6281_v24 = vpack.c.bf16 %v5237_v23, %v5236_v20  ;;  %v5239_v29 = vld [vmem:[%s7748_s25 + $0x238] sm:$0xff] }
0x14a9   :  { %v6269_v32 = vpack.c.bf16 %v2702_v28, %v2697_v61  ;;  %5879 = vmatprep.mubr.msk.f32.mxu1 %vm401_vm1, %v2521_v31  ;;  %v5238_v28 = vld [vmem:[%s7748_s25 + $0x230] sm:$0xff] }
0x14ab   :  { %6270 = vmatprep.subr.bf16.mxu0 %v6269_v32 }
0x14ac   :  { %6272 = vmatpush3.bf16.msra.mxu0 %v6269_v32  ;;  %v6285_v32 = vpack.c.bf16 %v5239_v29, %v5238_v28 }
0x14ad   :  { %v5863_v62 = vpop.f32.mrb[26].mxu1  ;;  %6282 = vmatprep.subr.bf16.mxu0 %v6281_v24 }
0x14ae   :  { %v2614_v34 = vadd.f32 %v5863_v62, %v5211_v33  ;;  %v2608_v35 = vpop.f32.mrb[27].mxu1 }
0x14af   :  { %v2609_v38 = vadd.f32 %v5211_v33, %v2608_v35  ;;  %v5241_v35 = vld [vmem:[%s7751_s26 + $0x11] ss:$0 sm:$0xff] }
0x14b1   :  { %v6263_v39 = vpack.c.bf16 %v2614_v34, %v2609_v38 }
0x14b3   :  { %6265 = vmatprep.subr.msk.bf16.mxu1 %vm6833_vm2, %v6263_v39 }
0x14b4   :  { %6268 = vmatpush3.bf16.xpose.msk.msra.mxu1 %vm6833_vm2, %v6263_v39  ;;  %v5258_v39 = vld [vmem:[%s7748_s25 + $0x1c0] sm:$0xff] }
0x14b5   :  { %6274 = vmatprep.subr.bf16.mxu1 %v6273_v40 }
0x14bb   :  { %5880 = vmatmul.mubr.msk.f32.vlgmr.msra.gmra.mrb[28].mxu1 %vm401_vm1, %v2526_v44 }
0x14bc   :  { %6276 = vmatpush3.bf16.msra.mxu1 %v6273_v40  ;;  %5897 = vmatprep.mubr.msk.f32.mxu1 %vm89_vm0, %v7222_v21  ;;  %v5259_v40 = vld [vmem:[%s7748_s25 + $0x1c8] sm:$0xff] }
0x14bd   :  { %6278 = vmatprep.subr.bf16.mxu1 %v6277_v45  ;;  %v6307_v44 = vpack.c.bf16 %v5259_v40, %v5258_v39 }
0x14c0   :  { %6280 = vmatpush3.bf16.msra.mxu1 %v6277_v45  ;;  %v5260_v45 = vld [vmem:[%s7748_s25 + $0x1d0] sm:$0xff] }
0x14c1   :  { %6290 = vmatprep.subr.bf16.mxu1 %v6289_v49  ;;  %v6311_v48 = vpack.c.bf16 %v5261_v47, %v5260_v45 }
0x14c3   :  { %5898 = vmatmul.mubr.msk.f32.vlgmr.msra.gmra.mrb[30].mxu1 %vm89_vm0, %v7224_v22 }
0x14c4   :  { %6292 = vmatpush3.bf16.msra.mxu1 %v6289_v49  ;;  %5919 = vmatprep.mubr.msk.f32.mxu1 %vm89_vm0, %v7222_v21  ;;  %v5274_v49 = vld [vmem:[%s7748_s25 + $0x2c0] sm:$0xff] }
0x14c5   :  { %6294 = vmatprep.subr.bf16.mxu1 %v6293_v18  ;;  %v6323_v51 = vpack.c.bf16 %v5275_v50, %v5274_v49  ;;  %v5291_v49 = vld [vmem:[%s7748_s25 + $0x1f8] sm:$0xff] }
0x14c8   :  { %6296 = vmatpush3.bf16.msra.mxu1 %v6293_v18  ;;  %v5276_v18 = vld [vmem:[%s7748_s25 + $0x2d0] sm:$0xff] }
0x14cb   :  { %5920 = vmatmul.mubr.msk.f32.vlgmr.msra.gmra.mrb[32].mxu1 %vm89_vm0, %v7224_v22 }
0x158e   :  { %v5881_v27 = vpop.f32.mrb[28].mxu1 }
0x158f   :  { %v2793_v52 = vmul.f32 0.35355338, %v5881_v27  ;;  %v2783_v53 = vpop.f32.mrb[29].mxu1  ;;  %v5277_v27 = vld [vmem:[%s7748_s25 + $0x2d8] sm:$0xff] }
0x1590   :  { %v2792_v54 = vmul.f32 0.35355338, %v2783_v53 }
0x1591   :  { %v2795_v56 = vadd.f32 %v7288_v55, %v2793_v52  ;;  %v6327_v52 = vpack.c.bf16 %v5277_v27, %v5276_v18  ;;  %v5305_v18 = vld [vmem:[%s7748_s25 + $0x2e8] sm:$0xff] }
0x1592   :  { %v2794_v58 = vadd.f32 %v7294_v57, %v2792_v54 }
0x1593   :  { %v2799_v59 = vsel %vm493_vm3, %v2795_v56, -inf }
0x1594   :  { %2800 = vmax.xlane.f32.xlu1 %v2799_v59  ;;  %v2796_v60 = vsel %vm493_vm3, %v2794_v58, -inf }
0x1595   :  { %2797 = vmax.xlane.f32.xlu0 %v2796_v60 }
0x1596   :  { %v5899_v0 = vpop.f32.mrb[30].mxu1 }
0x1597   :  { %v7302_v2 = vadd.f32 %v5899_v0, %v5233_v63  ;;  %v2980_v3 = vpop.f32.mrb[31].mxu1 }
0x1598   :  { %v2981_v33 = vadd.f32 %v5233_v63, %v2980_v3 }
0x159e   :  { %v5921_v5 = vpop.f32.mrb[32].mxu1 }
0x159f   :  { %v3162_v6 = vadd.f32 %v5921_v5, %v5249_v4  ;;  %v3156_v46 = vpop.f32.mrb[33].mxu1 }
0x15a0   :  { %v3157_v41 = vadd.f32 %v5249_v4, %v3156_v46 }
0x15a2   :  { %v6303_v7 = vpack.c.bf16 %v3162_v6, %v3157_v41  ;;  %v5279_v6 = vld [vmem:[%s7751_s26 + $0x16] ss:$0 sm:$0xff] }
0x15a4   :  { %6304 = vmatprep.subr.bf16.mxu1 %v6303_v7 }
0x15a5   :  { %6306 = vmatpush3.bf16.msra.mxu1 %v6303_v7 }
0x1621   :  { %v2801_v8 = vpop.xlane.xlu1 %2800 }
0x1622   :  { %v2803_v9 = vsub.f32 %v2795_v56, %v2801_v8  ;;  %v2798_v10 = vpop.xlane.xlu0 %2797 }
0x1623   :  { %v2802_v11 = vsub.f32 %v2794_v58, %v2798_v10 }
0x1624   :  { %v2806_v12 = vmul.f32 1.442695, %v2803_v9 }
0x1625   :  { %v2804_v13 = vmul.f32 1.442695, %v2802_v11 }
0x1626   :  { %6470 = vpow2.f32 %v2806_v12 }
0x1627   :  { %6472 = vpow2.f32 %v2804_v13 }
0x1630   :  { %v6471_v14 = vpop.eup %6470 }
0x1631   :  { %v6473_v16 = vpop.eup %6472  ;;  %v2811_v17 = vsel %vm493_vm3, %v6471_v14, 0.0 }
0x1632   :  { %2812 = vadd.xlane.f32.xlu1 %v2811_v17  ;;  %v2808_v19 = vsel %vm493_vm3, %v6473_v16, 0.0 }
0x1633   :  { %2809 = vadd.xlane.f32.xlu0 %v2808_v19 }
0x16bf   :  { %v2813_v25 = vpop.xlane.xlu1 %2812 }
0x16c0   :  { %6474 = vrcp.f32 %v2813_v25  ;;  %v2810_v26 = vpop.xlane.xlu0 %2809  ;;  %v5267_v25 = vld [vmem:[%s7748_s25 + $0x248] sm:$0xff] }
0x16c1   :  { %6476 = vrcp.f32 %v2810_v26 }
0x16ca   :  { %v6475_v15 = vpop.eup %6474 }
0x16cb   :  { %v6477_v30 = vpop.eup %6476  ;;  %v2817_v61 = vmul.f32 %v6475_v15, %v6471_v14 }
0x16cc   :  { %v2816_v31 = vmul.f32 %v6477_v30, %v6473_v16  ;;  %v5268_v30 = vld [vmem:[%s7748_s25 + $0x250] sm:$0xff] }
0x16ce   :  { %5886 = vmatprep.mubr.msk.f32.mxu0 %vm493_vm3, %v2816_v31  ;;  %v5269_v31 = vld [vmem:[%s7748_s25 + $0x258] sm:$0xff] }
0x16cf   :  { %5887 = vmatmul.mubr.msk.f32.vlgmr.msra.gmra.mrb[24].mxu0 %vm493_vm3, %v2817_v61 }
0x16d0   :  { %6284 = vmatpush3.bf16.msra.mxu0 %v6281_v24  ;;  %5908 = vmatprep.mubr.msk.f32.mxu0 %vm89_vm0, %v7222_v21  ;;  %v5266_v24 = vld [vmem:[%s7748_s25 + $0x240] sm:$0xff] }
0x16d1   :  { %6286 = vmatprep.subr.bf16.mxu0 %v6285_v32  ;;  %v6315_v26 = vpack.c.bf16 %v5267_v25, %v5266_v24 }
0x16d3   :  { %6316 = vmatprep.subr.bf16.mxu1 %v6315_v26 }
0x16d4   :  { %6288 = vmatpush3.bf16.msra.mxu0 %v6285_v32 }
0x16d7   :  { %5909 = vmatmul.mubr.msk.f32.vlgmr.msra.gmra.mrb[26].mxu0 %vm89_vm0, %v7224_v22 }
0x16d8   :  { %5926 = vmatprep.mubr.msk.f32.mxu0 %vm401_vm1, %v2981_v33 }
0x17a2   :  { %v5888_v62 = vpop.f32.mrb[24].mxu0 }
0x17a3   :  { %2900 = vst.msk [vmem:[#allocation2 + $0x8] sm:$0xff] %vm401_vm1, %v5888_v62  ;;  %v2890_v34 = vpop.f32.mrb[25].mxu0  ;;  %v6319_v62 = vpack.c.bf16 %v5269_v31, %v5268_v30 }
0x17a4   :  { %2899 = vst.msk [vmem:[#allocation2] sm:$0xff] %vm401_vm1, %v2890_v34 }
0x17aa   :  { %v5910_v36 = vpop.f32.mrb[26].mxu0 }
0x17ab   :  { %v3074_v37 = vadd.f32 %v5910_v36, %v5241_v35  ;;  %v3068_v38 = vpop.f32.mrb[27].mxu0 }
0x17ac   :  { %v3069_v42 = vadd.f32 %v5241_v35, %v3068_v38 }
0x17ae   :  { %v6297_v43 = vpack.c.bf16 %v3074_v37, %v3069_v42  ;;  %v5271_v37 = vld [vmem:[%s7751_s26 + $0x12] ss:$0 sm:$0xff]  ;;  %v5288_v42 = vld [vmem:[%s7748_s25 + $0x1e0] sm:$0xff] }
0x17b0   :  { %6299 = vmatprep.subr.msk.bf16.mxu0 %vm6833_vm2, %v6297_v43 }
0x17b1   :  { %6302 = vmatpush3.bf16.xpose.msk.msra.mxu0 %vm6833_vm2, %v6297_v43  ;;  %v5289_v43 = vld [vmem:[%s7748_s25 + $0x1e8] sm:$0xff] }
0x17b2   :  { %6308 = vmatprep.subr.bf16.mxu0 %v6307_v44  ;;  %v6341_v47 = vpack.c.bf16 %v5289_v43, %v5288_v42  ;;  %v5301_v42 = vld [vmem:[%s7751_s26 + $0x13] ss:$0 sm:$0xff] }
0x17b8   :  { %5927 = vmatmul.mubr.msk.f32.vlgmr.msra.gmra.mrb[28].mxu0 %vm401_vm1, %v7302_v2  ;;  %v5263_v2 = vld [vmem:[%s7751_s26 + $0xe] ss:$0 sm:$0xff] }
0x17b9   :  { %6310 = vmatpush3.bf16.msra.mxu0 %v6307_v44  ;;  %5944 = vmatprep.mubr.msk.f32.mxu0 %vm89_vm0, %v7222_v21 }
0x17ba   :  { %6312 = vmatprep.subr.bf16.mxu0 %v6311_v48 }
0x17bd   :  { %6314 = vmatpush3.bf16.msra.mxu0 %v6311_v48  ;;  %v5290_v48 = vld [vmem:[%s7748_s25 + $0x1f0] sm:$0xff] }
0x17be   :  { %6324 = vmatprep.subr.bf16.mxu0 %v6323_v51  ;;  %v6345_v50 = vpack.c.bf16 %v5291_v49, %v5290_v48 }
0x17c0   :  { %5945 = vmatmul.mubr.msk.f32.vlgmr.msra.gmra.mrb[30].mxu0 %vm89_vm0, %v7224_v22 }
0x17c1   :  { %6326 = vmatpush3.bf16.msra.mxu0 %v6323_v51  ;;  %5966 = vmatprep.mubr.msk.f32.mxu0 %vm89_vm0, %v7222_v21  ;;  %v5304_v51 = vld [vmem:[%s7748_s25 + $0x2e0] sm:$0xff] }
0x17c2   :  { %6328 = vmatprep.subr.bf16.mxu0 %v6327_v52  ;;  %v6357_v27 = vpack.c.bf16 %v5305_v18, %v5304_v51 }
0x17c5   :  { %6330 = vmatpush3.bf16.msra.mxu0 %v6327_v52  ;;  %v5306_v52 = vld [vmem:[%s7748_s25 + $0x2f0] sm:$0xff] }
0x17c8   :  { %5967 = vmatmul.mubr.msk.f32.vlgmr.msra.gmra.mrb[32].mxu0 %vm89_vm0, %v7224_v22 }
0x188b   :  { %v5928_v53 = vpop.f32.mrb[28].mxu0 }
0x188c   :  { %v3253_v54 = vmul.f32 0.35355338, %v5928_v53  ;;  %v3243_v56 = vpop.f32.mrb[29].mxu0  ;;  %v5307_v53 = vld [vmem:[%s7748_s25 + $0x2f8] sm:$0xff] }
0x188d   :  { %v3252_v58 = vmul.f32 0.35355338, %v3243_v56 }
0x188e   :  { %v3255_v59 = vadd.f32 %v7288_v55, %v3253_v54  ;;  %v6361_v54 = vpack.c.bf16 %v5307_v53, %v5306_v52 }
0x188f   :  { %v3254_v60 = vadd.f32 %v7294_v57, %v3252_v58 }
0x1890   :  { %v3259_v63 = vsel %vm493_vm3, %v3255_v59, -inf }
0x1891   :  { %3260 = vmax.xlane.f32.xlu1 %v3259_v63  ;;  %v3256_v0 = vsel %vm493_vm3, %v3254_v60, -inf }
0x1892   :  { %3257 = vmax.xlane.f32.xlu0 %v3256_v0 }
0x1893   :  { %v5946_v3 = vpop.f32.mrb[30].mxu0 }
0x1894   :  { %v7378_v4 = vadd.f32 %v5946_v3, %v5263_v2  ;;  %v3448_v5 = vpop.f32.mrb[31].mxu0 }
0x1895   :  { %v3449_v34 = vadd.f32 %v5263_v2, %v3448_v5 }
0x189b   :  { %v5968_v46 = vpop.f32.mrb[32].mxu0 }
0x189c   :  { %v3630_v41 = vadd.f32 %v5968_v46, %v5279_v6  ;;  %v3624_v7 = vpop.f32.mrb[33].mxu0 }
0x189d   :  { %v3625_v8 = vadd.f32 %v5279_v6, %v3624_v7 }
0x189f   :  { %v6337_v9 = vpack.c.bf16 %v3630_v41, %v3625_v8  ;;  %v5309_v41 = vld [vmem:[%s7751_s26 + $0x17] ss:$0 sm:$0xff] }
0x18a1   :  { %6338 = vmatprep.subr.bf16.mxu0 %v6337_v9 }
0x18a2   :  { %6340 = vmatpush3.bf16.msra.mxu0 %v6337_v9 }
0x191e   :  { %v3261_v10 = vpop.xlane.xlu1 %3260 }
0x191f   :  { %v3263_v11 = vsub.f32 %v3255_v59, %v3261_v10  ;;  %v3258_v12 = vpop.xlane.xlu0 %3257 }
0x1920   :  { %v3262_v13 = vsub.f32 %v3254_v60, %v3258_v12 }
0x1921   :  { %v3266_v14 = vmul.f32 1.442695, %v3263_v11 }
0x1922   :  { %v3264_v16 = vmul.f32 1.442695, %v3262_v13 }
0x1923   :  { %6478 = vpow2.f32 %v3266_v14 }
0x1924   :  { %6480 = vpow2.f32 %v3264_v16 }
0x192d   :  { %v6479_v17 = vpop.eup %6478 }
0x192e   :  { %v6481_v19 = vpop.eup %6480  ;;  %v3271_v20 = vsel %vm493_vm3, %v6479_v17, 0.0 }
0x192f   :  { %3272 = vadd.xlane.f32.xlu1 %v3271_v20  ;;  %v3268_v23 = vsel %vm493_vm3, %v6481_v19, 0.0 }
0x1930   :  { %3269 = vadd.xlane.f32.xlu0 %v3268_v23 }
0x19bc   :  { %v3273_v15 = vpop.xlane.xlu1 %3272 }
0x19bd   :  { %6482 = vrcp.f32 %v3273_v15  ;;  %v3270_v28 = vpop.xlane.xlu0 %3269  ;;  %v5297_v15 = vld [vmem:[%s7748_s25 + $0x268] sm:$0xff] }
0x19be   :  { %6484 = vrcp.f32 %v3270_v28 }
0x19c7   :  { %v6483_v29 = vpop.eup %6482 }
0x19c8   :  { %v6485_v61 = vpop.eup %6484  ;;  %v3277_v33 = vmul.f32 %v6483_v29, %v6479_v17 }
0x19c9   :  { %v3276_v32 = vmul.f32 %v6485_v61, %v6481_v19  ;;  %v5298_v61 = vld [vmem:[%s7748_s25 + $0x270] sm:$0xff] }
0x19cb   :  { %5933 = vmatprep.mubr.msk.f32.mxu1 %vm493_vm3, %v3276_v32  ;;  %v5299_v32 = vld [vmem:[%s7748_s25 + $0x278] sm:$0xff] }
0x19cc   :  { %5934 = vmatmul.mubr.msk.f32.vlgmr.msra.gmra.mrb[34].mxu1 %vm493_vm3, %v3277_v33 }
0x19cd   :  { %6318 = vmatpush3.bf16.msra.mxu1 %v6315_v26  ;;  %5955 = vmatprep.mubr.msk.f32.mxu1 %vm89_vm0, %v7222_v21  ;;  %v5296_v26 = vld [vmem:[%s7748_s25 + $0x260] sm:$0xff] }
0x19ce   :  { %6320 = vmatprep.subr.bf16.mxu1 %v6319_v62  ;;  %v6349_v28 = vpack.c.bf16 %v5297_v15, %v5296_v26 }
0x19d0   :  { %6350 = vmatprep.subr.bf16.mxu0 %v6349_v28 }
0x19d1   :  { %6322 = vmatpush3.bf16.msra.mxu1 %v6319_v62 }
0x19d4   :  { %5956 = vmatmul.mubr.msk.f32.vlgmr.msra.gmra.mrb[36].mxu1 %vm89_vm0, %v7224_v22 }
0x19d5   :  { %5973 = vmatprep.mubr.msk.f32.mxu1 %vm401_vm1, %v3449_v34 }
0x1a9f   :  { %v7404_v35 = vpop.f32.mrb[34].mxu1 }
0x1aa0   :  { %v7406_v36 = vpop.f32.mrb[35].mxu1 }
0x1aa7   :  { %v5957_v38 = vpop.f32.mrb[36].mxu1 }
0x1aa8   :  { %v3542_v39 = vadd.f32 %v5957_v38, %v5271_v37  ;;  %v3536_v40 = vpop.f32.mrb[37].mxu1 }
0x1aa9   :  { %v3537_v44 = vadd.f32 %v5271_v37, %v3536_v40  ;;  %v6353_v37 = vpack.c.bf16 %v5299_v32, %v5298_v61 }
0x1aab   :  { %v6331_v45 = vpack.c.bf16 %v3542_v39, %v3537_v44 }
0x1aad   :  { %6333 = vmatprep.subr.msk.bf16.mxu1 %vm6833_vm2, %v6331_v45 }
0x1aae   :  { %6336 = vmatpush3.bf16.xpose.msk.msra.mxu1 %vm6833_vm2, %v6331_v45 }
0x1aaf   :  { %6342 = vmatprep.subr.bf16.mxu1 %v6341_v47 }
0x1ab5   :  { %5974 = vmatmul.mubr.msk.f32.vlgmr.msra.gmra.mrb[38].mxu1 %vm401_vm1, %v7378_v4  ;;  %v5293_v4 = vld [vmem:[%s7751_s26 + $0xf] ss:$0 sm:$0xff] }
0x1ab6   :  { %6344 = vmatpush3.bf16.msra.mxu1 %v6341_v47  ;;  %5991 = vmatprep.mubr.msk.f32.mxu1 %vm89_vm0, %v7222_v21 }
0x1ab7   :  { %6346 = vmatprep.subr.bf16.mxu1 %v6345_v50 }
0x1aba   :  { %6348 = vmatpush3.bf16.msra.mxu1 %v6345_v50 }
0x1abb   :  { %6358 = vmatprep.subr.bf16.mxu1 %v6357_v27 }
0x1abd   :  { %5992 = vmatmul.mubr.msk.f32.vlgmr.msra.gmra.mrb[40].mxu1 %vm89_vm0, %v7224_v22 }
0x1abe   :  { %6360 = vmatpush3.bf16.msra.mxu1 %v6357_v27  ;;  %6013 = vmatprep.mubr.msk.f32.mxu1 %vm89_vm0, %v7222_v21 }
0x1abf   :  { %6362 = vmatprep.subr.bf16.mxu1 %v6361_v54 }
0x1ac2   :  { %6364 = vmatpush3.bf16.msra.mxu1 %v6361_v54 }
0x1ac5   :  { %6014 = vmatmul.mubr.msk.f32.vlgmr.msra.gmra.mrb[42].mxu1 %vm89_vm0, %v7224_v22 }
0x1b88   :  { %v5975_v56 = vpop.f32.mrb[38].mxu1 }
0x1b89   :  { %v3721_v58 = vmul.f32 0.35355338, %v5975_v56  ;;  %v3711_v59 = vpop.f32.mrb[39].mxu1 }
0x1b8a   :  { %v3720_v60 = vmul.f32 0.35355338, %v3711_v59 }
0x1b8b   :  { %v3723_v63 = vadd.f32 %v7288_v55, %v3721_v58 }
0x1b8c   :  { %v3722_v0 = vadd.f32 %v7294_v57, %v3720_v60 }
0x1b8d   :  { %v3727_v2 = vsel %vm493_vm3, %v3723_v63, -inf }
0x1b8e   :  { %3728 = vmax.xlane.f32.xlu1 %v3727_v2  ;;  %v3724_v3 = vsel %vm493_vm3, %v3722_v0, -inf }
0x1b8f   :  { %3725 = vmax.xlane.f32.xlu0 %v3724_v3 }
0x1b90   :  { %v5993_v5 = vpop.f32.mrb[40].mxu1 }
0x1b91   :  { %v3922_v6 = vadd.f32 %v5993_v5, %v5293_v4  ;;  %v3916_v46 = vpop.f32.mrb[41].mxu1 }
0x1b92   :  { %v3917_v38 = vadd.f32 %v5293_v4, %v3916_v46 }
0x1b98   :  { %v6015_v7 = vpop.f32.mrb[42].mxu1 }
0x1b99   :  { %v4098_v8 = vadd.f32 %v6015_v7, %v5309_v41  ;;  %v4092_v9 = vpop.f32.mrb[43].mxu1 }
0x1b9a   :  { %v4093_v10 = vadd.f32 %v5309_v41, %v4092_v9  ;;  %v5318_v9 = vld [vmem:[%s7755_s17 + $0x20] sm:$0xff] }
0x1b9c   :  { %v6371_v11 = vpack.c.bf16 %v4098_v8, %v4093_v10  ;;  %v5319_v10 = vld [vmem:[%s7755_s17 + $0x28] sm:$0xff] }
0x1b9e   :  { %6372 = vmatprep.subr.bf16.mxu1 %v6371_v11 }
0x1b9f   :  { %6374 = vmatpush3.bf16.msra.mxu1 %v6371_v11  ;;  %v6375_v11 = vpack.c.bf16 %v5319_v10, %v5318_v9  ;;  %v5335_v10 = vld [vmem:[%s7723_s11 + $0x1] ss:$0 sm:$0xff] }
0x1c1b   :  { %v3729_v12 = vpop.xlane.xlu1 %3728 }
0x1c1c   :  { %v3731_v13 = vsub.f32 %v3723_v63, %v3729_v12  ;;  %v3726_v14 = vpop.xlane.xlu0 %3725  ;;  %v5320_v12 = vld [vmem:[%s7755_s17 + $0x30] sm:$0xff] }
0x1c1d   :  { %v3730_v16 = vsub.f32 %v3722_v0, %v3726_v14 }
0x1c1e   :  { %v3734_v17 = vmul.f32 1.442695, %v3731_v13  ;;  %v5321_v13 = vld [vmem:[%s7755_s17 + $0x38] sm:$0xff] }
0x1c1f   :  { %v3732_v19 = vmul.f32 1.442695, %v3730_v16  ;;  %v6379_v14 = vpack.c.bf16 %v5321_v13, %v5320_v12 }
0x1c20   :  { %6486 = vpow2.f32 %v3734_v17 }
0x1c21   :  { %6488 = vpow2.f32 %v3732_v19 }
0x1c2a   :  { %v6487_v20 = vpop.eup %6486 }
0x1c2b   :  { %v6489_v23 = vpop.eup %6488  ;;  %v3739_v24 = vsel %vm493_vm3, %v6487_v20, 0.0 }
0x1c2c   :  { %3740 = vadd.xlane.f32.xlu1 %v3739_v24  ;;  %v3736_v25 = vsel %vm493_vm3, %v6489_v23, 0.0 }
0x1c2d   :  { %3737 = vadd.xlane.f32.xlu0 %v3736_v25  ;;  %v5323_v25 = vld [vmem:[%s7719_s7 + $0x1] ss:$0 sm:$0xff]  ;;  %s6627_s7 = smov [#allocation6]  }
0x1cb9   :  { %v3741_v29 = vpop.xlane.xlu1 %3740 }
0x1cba   :  { %6490 = vrcp.f32 %v3741_v29  ;;  %v3738_v30 = vpop.xlane.xlu0 %3737 }
0x1cbb   :  { %6492 = vrcp.f32 %v3738_v30 }
0x1cc4   :  { %v6491_v31 = vpop.eup %6490 }
0x1cc5   :  { %v6493_v33 = vpop.eup %6492  ;;  %v3745_v34 = vmul.f32 %v6491_v31, %v6487_v20 }
0x1cc6   :  { %v3744_v62 = vmul.f32 %v6493_v33, %v6489_v23 }
0x1cc8   :  { %5980 = vmatprep.mubr.msk.f32.mxu0 %vm493_vm3, %v3744_v62 }
0x1cc9   :  { %5981 = vmatmul.mubr.msk.f32.vlgmr.msra.gmra.mrb[34].mxu0 %vm493_vm3, %v3745_v34 }
0x1cca   :  { %6352 = vmatpush3.bf16.msra.mxu0 %v6349_v28  ;;  %6002 = vmatprep.mubr.msk.f32.mxu0 %vm89_vm0, %v7222_v21 }
0x1ccb   :  { %6354 = vmatprep.subr.bf16.mxu0 %v6353_v37 }
0x1cce   :  { %6356 = vmatpush3.bf16.msra.mxu0 %v6353_v37 }
0x1cd1   :  { %6003 = vmatmul.mubr.msk.f32.vlgmr.msra.gmra.mrb[36].mxu0 %vm89_vm0, %v7224_v22 }
0x1cd2   :  { %6020 = vmatprep.mubr.msk.f32.mxu0 %vm401_vm1, %v3917_v38 }
0x1d9c   :  { %v5982_v39 = vpop.f32.mrb[34].mxu0 }
0x1d9d   :  { %v3818_v40 = vpop.f32.mrb[35].mxu0 }
0x1da4   :  { %v6004_v43 = vpop.f32.mrb[36].mxu0 }
0x1da5   :  { %v4010_v44 = vadd.f32 %v6004_v43, %v5301_v42  ;;  %v4004_v45 = vpop.f32.mrb[37].mxu0 }
0x1da6   :  { %v4005_v47 = vadd.f32 %v5301_v42, %v4004_v45 }
0x1da8   :  { %v6365_v48 = vpack.c.bf16 %v4010_v44, %v4005_v47  ;;  %v5331_v44 = vld [vmem:[%s7722_s10 + $0x28] sm:$0xff]  ;;  %v5332_v47 = vld [vmem:[%s7722_s10 + $0x30] sm:$0xff] }
0x1daa   :  { %6367 = vmatprep.subr.msk.bf16.mxu0 %vm6833_vm2, %v6365_v48 }
0x1dab   :  { %6370 = vmatpush3.bf16.xpose.msk.msra.mxu0 %vm6833_vm2, %v6365_v48  ;;  %v5333_v48 = vld [vmem:[%s7722_s10 + $0x38] sm:$0xff] }
0x1dac   :  { %6376 = vmatprep.subr.bf16.mxu0 %v6375_v11 }
0x1db2   :  { %6021 = vmatmul.mubr.msk.f32.vlgmr.msra.gmra.mrb[38].mxu0 %vm401_vm1, %v3922_v6 }
0x1db3   :  { %6378 = vmatpush3.bf16.msra.mxu0 %v6375_v11 }
0x1db4   :  { %6380 = vmatprep.subr.bf16.mxu0 %v6379_v14 }
0x1db7   :  { %6382 = vmatpush3.bf16.msra.mxu0 %v6379_v14 }
0x1e85   :  { %v6022_v49 = vpop.f32.mrb[38].mxu0 }
0x1e86   :  { %v4189_v50 = vmul.f32 0.35355338, %v6022_v49  ;;  %v4179_v51 = vpop.f32.mrb[39].mxu0  ;;  %v6387_v49 = vpack.c.bf16 %v5333_v48, %v5332_v47 }
0x1e87   :  { %v4188_v18 = vmul.f32 0.35355338, %v4179_v51 }
0x1e88   :  { %v4191_v27 = vadd.f32 %v7288_v55, %v4189_v50 }
0x1e89   :  { %v4190_v52 = vadd.f32 %v7294_v57, %v4188_v18 }
0x1e8a   :  { %v4195_v53 = vsel %vm493_vm3, %v4191_v27, -inf }
0x1e8b   :  { %4196 = vmax.xlane.f32.xlu1 %v4195_v53  ;;  %v4192_v54 = vsel %vm493_vm3, %v4190_v52, -inf }
0x1e8c   :  { %4193 = vmax.xlane.f32.xlu0 %v4192_v54 }
0x1f18   :  { %v4197_v56 = vpop.xlane.xlu1 %4196 }
0x1f19   :  { %v4199_v58 = vsub.f32 %v4191_v27, %v4197_v56  ;;  %v4194_v1 = vpop.xlane.xlu0 %4193  ;;  %v5328_v56 = vld [vmem:[%s7720_s8 + $0x1] ss:$0 sm:$0xff] }
0x1f1a   :  { %v4198_v59 = vsub.f32 %v4190_v52, %v4194_v1  ;;  %v5329_v1 = vld [vmem:[%s7721_s9 + $0x1] ss:$0 sm:$0xff] }
0x1f1b   :  { %v4202_v60 = vmul.f32 1.442695, %v4199_v58 }
0x1f1c   :  { %v4200_v63 = vmul.f32 1.442695, %v4198_v59 }
0x1f1d   :  { %6494 = vpow2.f32 %v4202_v60 }
0x1f1e   :  { %6496 = vpow2.f32 %v4200_v63 }
0x1f27   :  { %v6495_v0 = vpop.eup %6494 }
0x1f28   :  { %v6497_v2 = vpop.eup %6496  ;;  %v4207_v55 = vsel %vm493_vm3, %v6495_v0, 0.0 }
0x1f29   :  { %4208 = vadd.xlane.f32.xlu1 %v4207_v55  ;;  %v4204_v57 = vsel %vm493_vm3, %v6497_v2, 0.0 }
0x1f2a   :  { %4205 = vadd.xlane.f32.xlu0 %v4204_v57  ;;  %v5338_v57 = vld [vmem:[%s7724_s12 + $0x40] sm:$0xff] }
0x1f3a   :  { %3363 = vrot.lane.b32.xlu1 %v7404_v35, %s6621_s4 }
0x1f3e   :  { %3829 = vrot.lane.b32.xlu1 %v3818_v40, %s6622_s0 }
0x1f40   :  { %3361 = vrot.lane.b32.xlu0 %v7406_v36, %s6621_s4 }
0x1f42   :  { %3831 = vrot.lane.b32.xlu1 %v5982_v39, %s6622_s0 }
0x1fb6   :  { %v4209_v3 = vpop.xlane.xlu1 %4208 }
0x1fb7   :  { %6498 = vrcp.f32 %v4209_v3  ;;  %v4206_v4 = vpop.xlane.xlu0 %4205  ;;  %v5339_v3 = vld [vmem:[%s7724_s12 + $0x48] sm:$0xff] }
0x1fb8   :  { %6500 = vrcp.f32 %v4206_v4  ;;  %v6391_v4 = vpack.c.bf16 %v5339_v3, %v5338_v57 }
0x1fba   :  { %v3364_v5 = vpop.permute.xlu1 %3363  ;;  %6392 = vmatprep.subr.bf16.mxu0 %v6391_v4 }
0x1fbb   :  { %3368 = vst.msk [vmem:[#allocation2 + $0x8] sm:$0xff] %vm1065_vm4, %v3364_v5  ;;  %v3362_v6 = vpop.permute.xlu0 %3361  ;;  %v5340_v5 = vld [vmem:[%s7724_s12 + $0x50] sm:$0xff] }
0x1fbc   :  { %3367 = vst.msk [vmem:[#allocation2] sm:$0xff] %vm1065_vm4, %v3362_v6  ;;  %v5341_v6 = vld [vmem:[%s7724_s12 + $0x58] sm:$0xff] }
0x1fbe   :  { %v3830_v46 = vpop.permute.xlu1 %3829 }
0x1fbf   :  { %3835 = vst.msk [vmem:[#allocation2] sm:$0xff] %vm1534_vm5, %v3830_v46  ;;  %v6395_v46 = vpack.c.bf16 %v5341_v6, %v5340_v5 }
0x1fc1   :  { %v6499_v35 = vpop.eup %6498 }
0x1fc2   :  { %v6501_v41 = vpop.eup %6500  ;;  %v3832_v7 = vpop.permute.xlu1 %3831  ;;  %v4213_v8 = vmul.f32 %v6499_v35, %v6495_v0  ;;  %v5342_v35 = vld [vmem:[%s7724_s12 + $0x60] sm:$0xff] }
0x1fc3   :  { %3836 = vst.msk [vmem:[#allocation2 + $0x8] sm:$0xff] %vm1534_vm5, %v3832_v7  ;;  %v4212_v36 = vmul.f32 %v6501_v41, %v6497_v2  ;;  %v5343_v41 = vld [vmem:[%s7724_s12 + $0x68] sm:$0xff] }
0x1fc4   :  { %v6399_v7 = vpack.c.bf16 %v5343_v41, %v5342_v35 }
0x1fc5   :  { %6027 = vmatprep.mubr.msk.f32.mxu1 %vm493_vm3, %v4212_v36  ;;  %v5344_v36 = vld [vmem:[%s7724_s12 + $0x70] sm:$0xff] }
0x1fc6   :  { %6028 = vmatmul.mubr.msk.f32.vlgmr.msra.gmra.mrb[44].mxu1 %vm493_vm3, %v4213_v8  ;;  %v5345_v8 = vld [vmem:[%s7724_s12 + $0x78] sm:$0xff] }
0x1fc7   :  { %v6403_v9 = vpack.c.bf16 %v5345_v8, %v5344_v36 }
0x2099   :  { %v6029_v16 = vpop.f32.mrb[44].mxu1 }
0x209a   :  { %4299 = vrot.lane.b32.xlu1 %v6029_v16, %s6623_s29  ;;  %v4286_v17 = vpop.f32.mrb[45].mxu1 }
0x209b   :  { %4297 = vrot.lane.b32.xlu0 %v4286_v17, %s6623_s29  ;;  %s5032_s29 = sshll.u32 %s6627_s7, 4  ;;  %s5033_s29 = int_to_ptr.vmem [resolvable:$true] %s5032_s29 }
0x210c   :  { %v4300_v19 = vpop.permute.xlu1 %4299 }
0x210d   :  { %4304 = vst.msk [vmem:[#allocation2 + $0x8] sm:$0xff] %vm2003_vm6, %v4300_v19  ;;  %v4298_v20 = vpop.permute.xlu0 %4297 }
0x210e   :  { %4303 = vst.msk [vmem:[#allocation2] sm:$0xff] %vm2003_vm6, %v4298_v20 }
0x2114   :  { %v4306_v24 = vld [vmem:[#allocation2 + $0x8] sm:$0xff] }
0x2115   :  { %v4305_v23 = vld [vmem:[#allocation2] sm:$0xff] }
0x2116   :  { %6038 = vmatprep.mubr.msk.f32.mxu0 %vm89_vm0, %v4305_v23 }
0x2117   :  { %6039 = vmatmul.mubr.msk.f32.vlgmr.msra.gmra.mrb[40].mxu0 %vm89_vm0, %v4306_v24 }
0x2118   :  { %6394 = vmatpush3.bf16.msra.mxu0 %v6391_v4 }
0x2119   :  { %6396 = vmatprep.subr.bf16.mxu0 %v6395_v46 }
0x211c   :  { %6398 = vmatpush3.bf16.msra.mxu0 %v6395_v46  ;;  %v5347_v46 = vld [vmem:[%s7725_s13 + $0x1] ss:$0 sm:$0xff] }
0x211d   :  { %6400 = vmatprep.subr.bf16.mxu0 %v6399_v7 }
0x2120   :  { %6402 = vmatpush3.bf16.msra.mxu0 %v6399_v7 }
0x2121   :  { %6404 = vmatprep.subr.bf16.mxu0 %v6403_v9 }
0x2124   :  { %6406 = vmatpush3.bf16.msra.mxu0 %v6403_v9 }
0x21ea   :  { %v6040_v26 = vpop.f32.mrb[40].mxu0 }
0x21eb   :  { %v4398_v15 = vadd.f32 %v6040_v26, %v5323_v25  ;;  %v4392_v28 = vpop.f32.mrb[41].mxu0 }
0x21ec   :  { %v4393_v29 = vadd.f32 %v5323_v25, %v4392_v28 }
0x21ed   :  { %v4402_v30 = vadd.f32 %v4398_v15, %v7224_v22 }
0x21ee   :  { %v4401_v31 = vadd.f32 %v4393_v29, %v7222_v21  ;;  %v5330_v21 = vld [vmem:[%s7722_s10 + $0x20] sm:$0xff] }
0x21ef   :  { %v4410_v61 = vsel %vm89_vm0, %v4402_v30, 0.0  ;;  %v6383_v45 = vpack.c.bf16 %v5331_v44, %v5330_v21 }
0x21f0   :  { %4411 = vadd.xlane.f32.xlu1 %v4410_v61  ;;  %v4407_v32 = vsel %vm89_vm0, %v4401_v31, 0.0 }
0x21f1   :  { %4408 = vadd.xlane.f32.xlu0 %v4407_v32  ;;  %6384 = vmatprep.subr.bf16.mxu1 %v6383_v45 }
0x21f2   :  { %6386 = vmatpush3.bf16.msra.mxu1 %v6383_v45 }
0x21f3   :  { %6388 = vmatprep.subr.bf16.mxu1 %v6387_v49 }
0x21f6   :  { %6390 = vmatpush3.bf16.msra.mxu1 %v6387_v49 }
0x227d   :  { %v4412_v33 = vpop.xlane.xlu1 %4411 }
0x227e   :  { %v4414_v62 = vmul.f32 0.03125, %v4412_v33  ;;  %v4409_v34 = vpop.xlane.xlu0 %4408 }
0x227f   :  { %v4413_v37 = vmul.f32 0.03125, %v4409_v34 }
0x2280   :  { %v4416_v38 = vsub.f32 %v4402_v30, %v4414_v62 }
0x2281   :  { %v4415_v39 = vsub.f32 %v4401_v31, %v4413_v37 }
0x2282   :  { %v4418_v43 = vmul.f32 %v4416_v38, %v4416_v38 }
0x2283   :  { %v4417_v40 = vmul.f32 %v4415_v39, %v4415_v39 }
0x2284   :  { %v4422_v22 = vsel %vm89_vm0, %v4418_v43, 0.0 }
0x2285   :  { %v4419_v42 = vsel %vm89_vm0, %v4417_v40, 0.0 }
0x2286   :  { %4420 = vadd.xlane.f32.xlu0 %v4419_v42 }
0x228a   :  { %4423 = vadd.xlane.f32.xlu0 %v4422_v22 }
0x2313   :  { %v4421_v50 = vpop.xlane.xlu0 %4420 }
0x2314   :  { %v4425_v51 = vmul.f32 0.03125, %v4421_v50 }
0x2316   :  { %v4427_v18 = vadd.f32 1e-12, %v4425_v51 }
0x2317   :  { %v4424_v27 = vpop.xlane.xlu0 %4423 }
0x2318   :  { %6502 = vrsqrt.f32 %v4427_v18  ;;  %v4426_v52 = vmul.f32 0.03125, %v4424_v27 }
0x231a   :  { %v4428_v53 = vadd.f32 1e-12, %v4426_v52 }
0x231c   :  { %6504 = vrsqrt.f32 %v4428_v53 }
0x2322   :  { %v6503_v54 = vpop.eup %6502 }
0x2323   :  { %v4431_v58 = vmul.f32 %v6503_v54, %v4415_v39 }
0x2325   :  { %v4439_v59 = vmul.f32 %v5328_v56, %v4431_v58 }
0x2326   :  { %v6505_v60 = vpop.eup %6504 }
0x2327   :  { %v4432_v63 = vmul.f32 %v6505_v60, %v4416_v38  ;;  %v7551_v0 = vadd.f32 %v5329_v1, %v4439_v59 }
0x2329   :  { %v4440_v2 = vmul.f32 %v5328_v56, %v4432_v63  ;;  %6049 = vmatprep.mubr.msk.f32.mxu1 %vm89_vm0, %v7551_v0 }
0x232b   :  { %v7555_v55 = vadd.f32 %v5329_v1, %v4440_v2 }
0x232d   :  { %6050 = vmatmul.mubr.msk.f32.vlgmr.msra.gmra.mrb[46].mxu1 %vm89_vm0, %v7555_v55 }
0x2400   :  { %v6051_v11 = vpop.f32.mrb[46].mxu1 }
0x2401   :  { %v4540_v12 = vadd.f32 %v6051_v11, %v5335_v10  ;;  %v4534_v13 = vpop.f32.mrb[47].mxu1 }
0x2402   :  { %v4535_v14 = vadd.f32 %v5335_v10, %v4534_v13 }
0x2403   :  { %v4546_v16 = vmul.f32 0.70710677, %v4540_v12  ;;  %v4544_v4 = vmul.f32 0.5, %v4540_v12 }
0x2404   :  { %v4545_v17 = vmul.f32 0.70710677, %v4535_v14  ;;  %v4543_v57 = vmul.f32 0.5, %v4535_v14 }
0x2405   :  { %v4548_v19 = vand.u32 2147483647, %v4546_v16  ;;  %vm4588_vm10 = vcmp.ge.f32.partialorder %v4546_v16, 0.0 }
0x2406   :  { %v4547_v20 = vand.u32 2147483647, %v4545_v17  ;;  %vm4587_vm11 = vcmp.ge.f32.partialorder %v4545_v17, 0.0 }
0x2407   :  { %v4550_v23 = vmul.f32 0.3275911, %v4548_v19  ;;  %v4576_v15 = vsub.f32 0.0, %v4548_v19 }
0x2408   :  { %v4549_v24 = vmul.f32 0.3275911, %v4547_v20  ;;  %v4575_v28 = vsub.f32 0.0, %v4547_v20 }
0x2409   :  { %v4552_v25 = vadd.f32 1.0, %v4550_v23  ;;  %v4578_v30 = vmul.f32 %v4576_v15, %v4548_v19 }
0x240a   :  { %v4551_v26 = vadd.f32 1.0, %v4549_v24  ;;  %v4577_v32 = vmul.f32 %v4575_v28, %v4547_v20 }
0x240b   :  { %6506 = vrcp.f32 %v4552_v25  ;;  %v4581_v34 = vmul.f32 1.442695, %v4578_v30 }
0x240c   :  { %6508 = vrcp.f32 %v4551_v26  ;;  %v4579_v39 = vmul.f32 1.442695, %v4577_v32 }
0x240d   :  { %6510 = vpow2.f32 %v4581_v34 }
0x240e   :  { %6512 = vpow2.f32 %v4579_v39 }
0x2415   :  { %v6507_v29 = vpop.eup %6506 }
0x2416   :  { %v6509_v31 = vpop.eup %6508  ;;  %v4558_v61 = vmul.f32 1.0614054, %v6507_v29 }
0x2417   :  { %v4557_v33 = vmul.f32 1.0614054, %v6509_v31  ;;  %v6511_v18 = vpop.eup %6510 }
0x2418   :  { %v4560_v62 = vadd.f32 -1.4531521, %v4558_v61  ;;  %v6513_v52 = vpop.eup %6512 }
0x2419   :  { %v4559_v37 = vadd.f32 -1.4531521, %v4557_v33  ;;  %v5353_v33 = vld [vmem:[%s7727_s15 + $0x1] ss:$0 sm:$0xff]  ;;  %s5356_s15 = sld [smem:[#allocation3 + $0x1]] }
0x241a   :  { %v4562_v38 = vmul.f32 %v6507_v29, %v4560_v62 }
0x241b   :  { %v4561_v40 = vmul.f32 %v6509_v31, %v4559_v37  ;;  %v5354_v37 = vld [vmem:[%s7728_s16] ss:$0 sm:$0xff] }
0x241c   :  { %v4564_v42 = vadd.f32 1.4214138, %v4562_v38 }
0x241d   :  { %v4563_v43 = vadd.f32 1.4214138, %v4561_v40 }
0x241e   :  { %v4566_v22 = vmul.f32 %v6507_v29, %v4564_v42  ;;  %v5355_v42 = vld [vmem:[%s7728_s16 + $0x1] ss:$0 sm:$0xff] }
0x241f   :  { %v4565_v21 = vmul.f32 %v6509_v31, %v4563_v43 }
0x2420   :  { %v4568_v44 = vadd.f32 -0.28449672, %v4566_v22 }
0x2421   :  { %v4567_v45 = vadd.f32 -0.28449672, %v4565_v21 }
0x2422   :  { %v4570_v47 = vmul.f32 %v6507_v29, %v4568_v44 }
0x2423   :  { %v4569_v48 = vmul.f32 %v6509_v31, %v4567_v45 }
0x2424   :  { %v4572_v49 = vadd.f32 0.2548296, %v4570_v47 }
0x2425   :  { %v4571_v50 = vadd.f32 0.2548296, %v4569_v48 }
0x2426   :  { %v4574_v51 = vmul.f32 %v6507_v29, %v4572_v49 }
0x2427   :  { %v4573_v27 = vmul.f32 %v6509_v31, %v4571_v50  ;;  %v5352_v31 = vld [vmem:[%s7726_s14 + $0x1] ss:$0 sm:$0xff]  ;;  %s4757_s14 = sld [smem:[#allocation3]]  ;;  %v4779_v50 = vlaneseq }
0x2428   :  { %v4584_v53 = vmul.f32 %v6511_v18, %v4574_v51 }
0x2429   :  { %v4583_v54 = vmul.f32 %v6513_v52, %v4573_v27  ;;  %v7613_v51 = vand.u32 127, %v4779_v50  ;;  %v4782_v18 = vshrl.u32 %v4779_v50, 7 }
0x242a   :  { %v4586_v56 = vsub.f32 1.0, %v4584_v53 }
0x242b   :  { %v4585_v58 = vsub.f32 1.0, %v4583_v54  ;;  %v7616_v52 = vsub.s32 %v7613_v51, %v4782_v18 }
0x242c   :  { %v4590_v1 = vsub.f32 0.0, %v4586_v56 }
0x242d   :  { %v4589_v59 = vsub.f32 0.0, %v4585_v58  ;;  %v4758_v27 = vstv %s4757_s14 }
0x242e   :  { %v4592_v60 = vsel %vm4588_vm10, %v4586_v56, %v4590_v1  ;;  %v4774_v1 = vstv %s5356_s15 }
0x242f   :  { %v4594_v63 = vadd.f32 1.0, %v4592_v60  ;;  %v4591_v2 = vsel %vm4587_vm11, %v4585_v58, %v4589_v59 }
0x2430   :  { %v4593_v3 = vadd.f32 1.0, %v4591_v2 }
0x2431   :  { %v4596_v6 = vmul.f32 %v4594_v63, %v4544_v4 }
0x2432   :  { %v4595_v5 = vmul.f32 %v4593_v3, %v4543_v57 }
0x2434   :  { %6068 = vmatprep.mubr.msk.f32.mxu0 %vm2307_vm9, %v4595_v5 }
0x2435   :  { %6069 = vmatmul.mubr.msk.f32.vlgmr.msra.gmra.mrb[42].mxu0 %vm2307_vm9, %v4596_v6 }
0x2508   :  { %v6070_v35 = vpop.f32.mrb[42].mxu0 }
0x2509   :  { %v4692_v41 = vadd.f32 %v6070_v35, %v5347_v46  ;;  %v4686_v7 = vpop.f32.mrb[43].mxu0 }
0x250a   :  { %v4687_v36 = vadd.f32 %v5347_v46, %v4686_v7  ;;  %v6624_v7 = vmov 0  }
0x250b   :  { %v4696_v8 = vadd.f32 %v4692_v41, %v7555_v55  ;;  %6417 = vset.pattern.permute.xlu1 %v6624_v7  ;;  %6416 = vset.pattern.permute.xlu0 %v6624_v7 }
0x250c   :  { %v4695_v9 = vadd.f32 %v4687_v36, %v7551_v0  ;;  %v7628_v36 = vsub.s32 0, %v4782_v18 }
0x250d   :  { %v4704_v10 = vsel %vm89_vm0, %v4696_v8, 0.0 }
0x250e   :  { %4705 = vadd.xlane.f32.xlu1 %v4704_v10  ;;  %v4701_v11 = vsel %vm89_vm0, %v4695_v9, 0.0 }
0x250f   :  { %4702 = vadd.xlane.f32.xlu0 %v4701_v11 }
0x259b   :  { %v4706_v12 = vpop.xlane.xlu1 %4705 }
0x259c   :  { %v4708_v13 = vmul.f32 0.03125, %v4706_v12  ;;  %v4703_v14 = vpop.xlane.xlu0 %4702 }
0x259d   :  { %v4707_v16 = vmul.f32 0.03125, %v4703_v14 }
0x259e   :  { %v4710_v17 = vsub.f32 %v4696_v8, %v4708_v13  ;;  %v7630_v8 = vsub.s32 1, %v4782_v18  ;;  %v7655_v18 = vld [vmem:[%s7731_s19] sm:$0x3]  ;;  %s6626_s19 = smov [#allocation7]  }
0x259f   :  { %v4709_v19 = vsub.f32 %v4695_v9, %v4707_v16  ;;  %s5042_s2 = sshll.u32 %s6626_s19, 4  ;;  %s5043_s2 = int_to_ptr.vmem [resolvable:$true] %s5042_s2 }
0x25a0   :  { %v4712_v20 = vmul.f32 %v4710_v17, %v4710_v17  ;;  %s6548_s27 = scalar_lea.vmem %s5043_s2, 32  ;;  %p6553_p6 = scmp.lt.s32.totalorder %s5043_s2, %s5043_s2 }
0x25a1   :  { %v4711_v23 = vmul.f32 %v4709_v19, %v4709_v19  ;;  %p6549_p5 = scmp.ne.s32.totalorder %s5043_s2, %s6548_s27  ;;  %p6554_p7 = scmp.lt.s32.totalorder %s6548_s27, %s6548_s27 }
0x25a2   :  { %v4716_v24 = vsel %vm89_vm0, %v4712_v20, 0.0 }
0x25a3   :  { %4717 = vadd.xlane.f32.xlu1 %v4716_v24  ;;  %v4713_v55 = vsel %vm89_vm0, %v4711_v23, 0.0  ;;  %p6555_p8 = por %p6554_p7, %p6553_p6 }
0x25a4   :  { %4714 = vadd.xlane.f32.xlu0 %v4713_v55 }
0x25a5   :  { %p6556_p9 = pnand %p6555_p8, %p6549_p5 }
0x2630   :  { %v4718_v0 = vpop.xlane.xlu1 %4717 }
0x2631   :  { %v4720_v25 = vmul.f32 0.03125, %v4718_v0  ;;  %v4715_v26 = vpop.xlane.xlu0 %4714 }
0x2632   :  { %v4719_v15 = vmul.f32 0.03125, %v4715_v26 }
0x2633   :  { %v4722_v28 = vadd.f32 1e-12, %v4720_v25 }
0x2634   :  { %v4721_v29 = vadd.f32 1e-12, %v4719_v15 }
0x2635   :  { %6514 = vrsqrt.f32 %v4722_v28 }
0x2636   :  { %6516 = vrsqrt.f32 %v4721_v29 }
0x263f   :  { %v6515_v30 = vpop.eup %6514 }
0x2640   :  { %v6517_v61 = vpop.eup %6516  ;;  %v4726_v32 = vmul.f32 %v6515_v30, %v4710_v17 }
0x2641   :  { %v4725_v62 = vmul.f32 %v6517_v61, %v4709_v19 }
0x2642   :  { %v4734_v34 = vmul.f32 %v5352_v31, %v4726_v32 }
0x2643   :  { %v4733_v38 = vmul.f32 %v5352_v31, %v4725_v62 }
0x2644   :  { %v4742_v39 = vadd.f32 %v5353_v33, %v4734_v34 }
0x2645   :  { %v4741_v40 = vadd.f32 %v5353_v33, %v4733_v38 }
0x2646   :  { %v4750_v43 = vmul.f32 %v5354_v37, %v4742_v39  ;;  %v4766_v44 = vmul.f32 %v5355_v42, %v4742_v39 }
0x2647   :  { %v4749_v22 = vmul.f32 %v5354_v37, %v4741_v40  ;;  %v4765_v47 = vmul.f32 %v5355_v42, %v4741_v40  ;;  %v7647_v42 = vld [vmem:[%s7730_s18] sm:$0x3] }
0x2648   :  { %v4754_v21 = vsel %vm89_vm0, %v4750_v43, 0.0  ;;  %v4770_v48 = vsel %vm89_vm0, %v4766_v44, 0.0 }
0x2649   :  { %4755 = vadd.xlane.f32.xlu1 %v4754_v21  ;;  %v4751_v45 = vsel %vm89_vm0, %v4749_v22, 0.0  ;;  %v4767_v49 = vsel %vm89_vm0, %v4765_v47, 0.0 }
0x264a   :  { %4752 = vadd.xlane.f32.xlu0 %v4751_v45 }
0x264d   :  { %4771 = vadd.xlane.f32.xlu1 %v4770_v48 }
0x264e   :  { %4768 = vadd.xlane.f32.xlu0 %v4767_v49 }
0x26d6   :  { %v4756_v53 = vpop.xlane.xlu1 %4755 }
0x26d7   :  { %v4760_v54 = vadd.f32 %v4758_v27, %v4756_v53  ;;  %v4753_v56 = vpop.xlane.xlu0 %4752 }
0x26d8   :  { %v4759_v58 = vadd.f32 %v4758_v27, %v4753_v56 }
0x26d9   :  { %v4788_v59 = vrot.slane %v4760_v54, %v7616_v52 }
0x26da   :  { %v4784_v60 = vrot.slane %v4759_v58, %v7616_v52  ;;  %v4772_v63 = vpop.xlane.xlu1 %4771 }
0x26db   :  { %v4776_v2 = vadd.f32 %v4774_v1, %v4772_v63  ;;  %v4769_v57 = vpop.xlane.xlu0 %4768 }
0x26dc   :  { %v4775_v3 = vadd.f32 %v4774_v1, %v4769_v57  ;;  %v4790_v4 = vsel %vm4789_vm12, %v4788_v59, %v4784_v60  ;;  %v6625_v57 = vmov 0.0  }
0x26dd   :  { %v4803_v5 = vrot.slane %v4776_v2, %v7616_v52  ;;  %v4808_v6 = vsel %vm4792_vm13, %v4790_v4, -inf  ;;  %4793 = vst.msk [vmem:[#allocation6] sm:$0x3] %vm4792_vm13, %v4790_v4 }
0x26de   :  { %v4799_v46 = vrot.slane %v4775_v3, %v7616_v52  ;;  %4809 = vmax.xlane.f32.xlu0 %v4808_v6 }
0x26e0   :  { %v4804_v35 = vsel %vm4789_vm12, %v4803_v5, %v4799_v46 }
0x26e1   :  { %v4916_v41 = vsel %vm4792_vm13, %v4804_v35, -inf  ;;  %4806 = vst.msk [vmem:[#allocation7] sm:$0x3] %vm4792_vm13, %v4804_v35 }
0x26e2   :  { %4917 = vmax.xlane.f32.xlu1 %v4916_v41 }
0x276b   :  { %v4810_v9 = vpop.xlane.xlu0 %4809 }
0x276c   :  { %v4815_v10 = vrot.slane %v4810_v9, %v7628_v36  ;;  %v4819_v11 = vrot.slane %v4810_v9, %v7630_v8 }
0x276e   :  { %v4822_v12 = vsub.f32 %v4759_v58, %v4815_v10  ;;  %v4823_v13 = vsub.f32 %v4760_v54, %v4819_v11 }
0x276f   :  { %v4918_v14 = vpop.xlane.xlu1 %4917 }
0x2770   :  { %v4824_v16 = vmul.f32 1.442695, %v4822_v12  ;;  %v4826_v17 = vmul.f32 1.442695, %v4823_v13  ;;  %v4923_v19 = vrot.slane %v4918_v14, %v7628_v36  ;;  %v4927_v20 = vrot.slane %v4918_v14, %v7630_v8 }
0x2772   :  { %6518 = vpow2.f32 %v4824_v16  ;;  %v4930_v23 = vsub.f32 %v4775_v3, %v4923_v19  ;;  %v4931_v24 = vsub.f32 %v4776_v2, %v4927_v20 }
0x2773   :  { %6520 = vpow2.f32 %v4826_v17 }
0x2774   :  { %v4932_v55 = vmul.f32 1.442695, %v4930_v23  ;;  %v4934_v0 = vmul.f32 1.442695, %v4931_v24 }
0x2776   :  { %6522 = vpow2.f32 %v4932_v55 }
0x2777   :  { %6524 = vpow2.f32 %v4934_v0 }
0x277c   :  { %v6519_v25 = vpop.eup %6518 }
0x277d   :  { %v6521_v26 = vpop.eup %6520  ;;  %4831 = vperm.xlu0 %6416, %v6519_v25  }
0x277e   :  { %4834 = vperm.xlu1 %6417, %v6521_v26  }
0x2780   :  { %v6523_v15 = vpop.eup %6522 }
0x2781   :  { %v6525_v28 = vpop.eup %6524 }
0x2782   :  { %4939 = vperm.xlu1 %6417, %v6523_v15  }
0x2786   :  { %4942 = vperm.xlu1 %6417, %v6525_v28  }
0x27fc   :  { %v4832_v29 = vpop.permute.xlu0 %4831 }
0x27fd   :  { %v4835_v30 = vpop.permute.xlu1 %4834  ;;  %v4839_v31 = vrot.slane %v4832_v29, %v7616_v52 }
0x27fe   :  { %v4843_v61 = vrot.slane %v4835_v30, %v7616_v52 }
0x2800   :  { %v4844_v32 = vsel %vm4789_vm12, %v4843_v61, %v4839_v31 }
0x2801   :  { %v4940_v33 = vpop.permute.xlu1 %4939  ;;  %v4846_v62 = vsel %vm4792_vm13, %v4844_v32, 0.0 }
0x2802   :  { %4847 = vadd.xlane.f32.xlu1 %v4846_v62  ;;  %v4947_v37 = vrot.slane %v4940_v33, %v7616_v52 }
0x2805   :  { %v4943_v34 = vpop.permute.xlu1 %4942 }
0x2806   :  { %v4951_v38 = vrot.slane %v4943_v34, %v7616_v52 }
0x2808   :  { %v4952_v39 = vsel %vm4789_vm12, %v4951_v38, %v4947_v37 }
0x2809   :  { %v4954_v40 = vsel %vm4792_vm13, %v4952_v39, 0.0 }
0x280a   :  { %4955 = vadd.xlane.f32.xlu0 %v4954_v40 }
0x2813   :  { %4865 = vperm.xlu1 %6417, %v7647_v42  }
0x288f   :  { %v4848_v43 = vpop.xlane.xlu1 %4847 }
0x2890   :  { %6526 = vlog2.f32 %v4848_v43 }
0x2893   :  { %v4866_v1 = vpop.permute.xlu1 %4865 }
0x2894   :  { %vm4867_vm14 = vcmp.eq.s32.totalorder %v7613_v51, %v4866_v1 }
0x2895   :  { %v5357_v3 = vsel %vm4867_vm14, 1.0, %v6625_v57 }
0x2897   :  { %v4956_v22 = vpop.xlane.xlu0 %4955 }
0x2898   :  { %6528 = vlog2.f32 %v4956_v22 }
0x289a   :  { %v6527_v21 = vpop.eup %6526 }
0x289b   :  { %v4850_v44 = vmul.f32 0.6931472, %v6527_v21 }
0x289d   :  { %v4855_v45 = vrot.slane %v4850_v44, %v7628_v36  ;;  %v4859_v47 = vrot.slane %v4850_v44, %v7630_v8 }
0x289f   :  { %v4863_v48 = vsub.f32 %v4823_v13, %v4859_v47  ;;  %v4862_v49 = vsub.f32 %v4822_v12, %v4855_v45 }
0x28a1   :  { %4876 = vperm.xlu1 %6417, %v4863_v48   ;;  %4873 = vperm.xlu0 %6416, %v4862_v49  }
0x28a2   :  { %v6529_v50 = vpop.eup %6528 }
0x28a3   :  { %v4958_v27 = vmul.f32 0.6931472, %v6529_v50 }
0x28a5   :  { %v4963_v53 = vrot.slane %v4958_v27, %v7628_v36  ;;  %4973 = vperm.xlu0 %6416, %v7655_v18   ;;  %v4967_v54 = vrot.slane %v4958_v27, %v7630_v8 }
0x28a7   :  { %v4970_v56 = vsub.f32 %v4930_v23, %v4963_v53  ;;  %v4971_v58 = vsub.f32 %v4931_v24, %v4967_v54 }
0x28a9   :  { %4981 = vperm.xlu0 %6416, %v4970_v56  }
0x28ad   :  { %4984 = vperm.xlu0 %6416, %v4971_v58  }
0x2920   :  { %v4877_v59 = vpop.permute.xlu1 %4876  ;;  %v4874_v60 = vpop.permute.xlu0 %4873 }
0x2921   :  { %v4885_v63 = vrot.slane %v4877_v59, %v7616_v52  ;;  %v4881_v2 = vrot.slane %v4874_v60, %v7616_v52 }
0x2923   :  { %v4886_v4 = vsel %vm4789_vm12, %v4885_v63, %v4881_v2 }
0x2924   :  { %v4974_v5 = vpop.permute.xlu0 %4973  ;;  %v4888_v6 = vmul.f32 %v5357_v3, %v4886_v4 }
0x2925   :  { %vm4975_vm15 = vcmp.eq.s32.totalorder %v7613_v51, %v4974_v5 }
0x2926   :  { %v4889_v46 = vsel %vm4792_vm13, %v4888_v6, 0.0  ;;  %v5359_v8 = vsel %vm4975_vm15, 1.0, %v6625_v57 }
0x2927   :  { %4890 = vadd.xlane.f32.xlu1 %v4889_v46 }
0x2928   :  { %v4982_v35 = vpop.permute.xlu0 %4981 }
0x2929   :  { %v4989_v7 = vrot.slane %v4982_v35, %v7616_v52 }
0x292c   :  { %v4985_v41 = vpop.permute.xlu0 %4984 }
0x292d   :  { %v4993_v36 = vrot.slane %v4985_v41, %v7616_v52 }
0x292f   :  { %v4994_v9 = vsel %vm4789_vm12, %v4993_v36, %v4989_v7 }
0x2930   :  { %v4996_v10 = vmul.f32 %v5359_v8, %v4994_v9 }
0x2932   :  { %v4997_v11 = vsel %vm4792_vm13, %v4996_v10, 0.0 }
0x2933   :  { %4998 = vadd.xlane.f32.xlu0 %v4997_v11 }
0x2934   :  { %6559 = shalt.err (!%p6556_p9)
}
0x2935   :  { %s6560_s25 = scalar_lea.hbm %s7733_s21, 32 }
0x2936   :  { %p6561_p10 = scmp.ne.s32.totalorder %s7733_s21, %s6560_s25  ;;  %p6564_p11 = scmp.lt.u32.totalorder %s6560_s25, %s7733_s21 }
0x2938   :  { %p6566_p12 = pnand %p6564_p11, %p6561_p10 }
0x293a   :  { %6569 = shalt.err (!%p6566_p12)
}
0x293b   :  { %5045 = dma.vmem_to_hbm [thread:$0]  %s5043_s2, 32, %s7733_s21, [#allocation8]  }
0x293c   :  { %s6570_s13 = scalar_lea.vmem %s5033_s29, 32  ;;  %p6575_p0 = scmp.lt.s32.totalorder %s5033_s29, %s5033_s29 }
0x293d   :  { %p6571_p13 = scmp.ne.s32.totalorder %s5033_s29, %s6570_s13  ;;  %p6576_p1 = scmp.lt.s32.totalorder %s6570_s13, %s6570_s13 }
0x293f   :  { %p6577_p2 = por %p6576_p1, %p6575_p0 }
0x2941   :  { %p6578_p3 = pnand %p6577_p2, %p6571_p13 }
0x2943   :  { %6581 = shalt.err (!%p6578_p3)
}
0x2944   :  { %s6582_s8 = scalar_lea.hbm %s7732_s20, 32 }
0x2945   :  { %p6583_p4 = scmp.ne.s32.totalorder %s7732_s20, %s6582_s8  ;;  %p6586_p5 = scmp.lt.u32.totalorder %s6582_s8, %s7732_s20 }
0x2947   :  { %p6588_p6 = pnand %p6586_p5, %p6583_p4 }
0x2949   :  { %6591 = shalt.err (!%p6588_p6)
}
0x294a   :  { %5035 = dma.vmem_to_hbm [thread:$0]  %s5033_s29, 32, %s7732_s20, [#allocation4]   ;;  %vm4893_vm0 = vcmp.ne.s32.totalorder %v7647_v42, 8  ;;  %vm5001_vm1 = vcmp.ne.s32.totalorder %v7655_v18, 8  ;;  %vm4897_vm2 = vcmask 1024   ;;  %vm5024_vm3 = vcmask 0  }
0x294b   :  { %v5358_v51 = vsel %vm4893_vm0, 1.0, %v6625_v57  ;;  %v5360_v52 = vsel %vm5001_vm1, 1.0, %v6625_v57  ;;  %s6628_s20 = smov [#allocation9]  }
0x294c   :  { %v4905_v12 = vsel %vm4897_vm2, %v5358_v51, 0.0  ;;  %v5012_v13 = vsel %vm4897_vm2, %v5360_v52, 0.0  ;;  %s5052_s15 = sshll.u32 %s6628_s20, 4  ;;  %s5053_s15 = int_to_ptr.vmem [resolvable:$true] %s5052_s15 }
0x294d   :  { %v4906_v14 = vrot.slane %v4905_v12, 4  ;;  %v5013_v16 = vrot.slane %v5012_v13, 4  ;;  %s6592_s16 = scalar_lea.vmem %s5053_s15, 16  ;;  %s6596_s6 = scalar_lea.vmem %s5053_s15, 32 }
0x294e   :  { %p6593_p7 = scmp.ne.s32.totalorder %s5053_s15, %s6592_s16  ;;  %p6597_p8 = scmp.lt.s32.totalorder %s5053_s15, %s5053_s15 }
0x294f   :  { %v4907_v17 = vadd.f32 %v4906_v14, %v4905_v12  ;;  %v5014_v19 = vadd.f32 %v5013_v16, %v5012_v13  ;;  %p6598_p9 = scmp.lt.s32.totalorder %s6596_s6, %s6592_s16 }
0x2951   :  { %v4908_v20 = vrot.slane %v4907_v17, 2  ;;  %v5015_v23 = vrot.slane %v5014_v19, 2  ;;  %p6599_p10 = por %p6598_p9, %p6597_p8 }
0x2953   :  { %v4909_v24 = vadd.f32 %v4908_v20, %v4907_v17  ;;  %v5016_v25 = vadd.f32 %v5015_v23, %v5014_v19  ;;  %p6600_p11 = pnand %p6599_p10, %p6593_p7 }
0x2955   :  { %v4910_v15 = vrot.slane %v4909_v24, 1  ;;  %v5017_v29 = vrot.slane %v5016_v25, 1 }
0x2957   :  { %v4911_v31 = vadd.f32 %v4910_v15, %v4909_v24  ;;  %v5018_v61 = vadd.f32 %v5017_v29, %v5016_v25 }
0x2959   :  { %v4912_v33 = vmax.f32 %v4911_v31, 1.0  ;;  %v5019_v34 = vmax.f32 %v5018_v61, 1.0 }
0x295b   :  { %6530 = vrcp.f32 %v4912_v33 }
0x295c   :  { %6532 = vrcp.f32 %v5019_v34 }
0x2965   :  { %v6531_v47 = vpop.eup %6530 }
0x2966   :  { %v6533_v50 = vpop.eup %6532 }
0x29b4   :  { %v4891_v55 = vpop.xlane.xlu1 %4890 }
0x29b5   :  { %v4892_v0 = vsub.f32 0.0, %v4891_v55 }
0x29b7   :  { %v4896_v26 = vmul.f32 %v5358_v51, %v4892_v0 }
0x29b9   :  { %v4898_v28 = vsel %vm4897_vm2, %v4896_v26, 0.0 }
0x29ba   :  { %v4899_v30 = vrot.slane %v4898_v28, 4 }
0x29bc   :  { %v4900_v32 = vadd.f32 %v4899_v30, %v4898_v28 }
0x29be   :  { %v4901_v38 = vrot.slane %v4900_v32, 2 }
0x29c0   :  { %v4999_v62 = vpop.xlane.xlu0 %4998  ;;  %v4902_v42 = vadd.f32 %v4901_v38, %v4900_v32 }
0x29c1   :  { %v5000_v37 = vsub.f32 0.0, %v4999_v62 }
0x29c2   :  { %v4903_v21 = vrot.slane %v4902_v42, 1 }
0x29c3   :  { %v5004_v39 = vmul.f32 %v5360_v52, %v5000_v37 }
0x29c4   :  { %v4904_v49 = vadd.f32 %v4903_v21, %v4902_v42 }
0x29c5   :  { %v5005_v40 = vsel %vm4897_vm2, %v5004_v39, 0.0 }
0x29c6   :  { %v5006_v43 = vrot.slane %v5005_v40, 4  ;;  %v4914_v27 = vmul.f32 %v6531_v47, %v4904_v49 }
0x29c8   :  { %v5007_v22 = vadd.f32 %v5006_v43, %v5005_v40 }
0x29ca   :  { %v5008_v44 = vrot.slane %v5007_v22, 2 }
0x29cc   :  { %v5009_v45 = vadd.f32 %v5008_v44, %v5007_v22 }
0x29ce   :  { %v5010_v48 = vrot.slane %v5009_v45, 1 }
0x29d0   :  { %v5011_v18 = vadd.f32 %v5010_v48, %v5009_v45 }
0x29d2   :  { %v5021_v53 = vmul.f32 %v6533_v50, %v5011_v18 }
0x29d4   :  { %v5022_v54 = vadd.f32 %v5021_v53, %v4914_v27 }
0x29d6   :  { %v5023_v56 = vmul.f32 0.5, %v5022_v54 }
0x29d8   :  { %5025 = vst.msk [vmem:[#allocation9] sm:$0x1] %vm5024_vm3, %v5023_v56 }
0x29d9   :  { %6603 = shalt.err (!%p6600_p11)
}
0x29da   :  { %s6604_s19 = scalar_lea.hbm %s7734_s22, 16 }
0x29db   :  { %p6605_p12 = scmp.ne.s32.totalorder %s7734_s22, %s6604_s19  ;;  %p6608_p13 = scmp.lt.u32.totalorder %s6604_s19, %s7734_s22 }
0x29dd   :  { %p6610_p0 = pnand %p6608_p13, %p6605_p12 }
0x29df   :  { %6613 = shalt.err (!%p6610_p0)
}
0x29e0   :  { %5055 = dma.vmem_to_hbm [thread:$0]  %s5053_s15, 16, %s7734_s22, [#allocation8]  }
0x29e1   :  { %6616 = dma.done.wait [#allocation4], 32  }
0x29e2   :  { %6617 = vsyncadd [#allocation4], 4294967264 }
0x29e3   :  { %6618 = dma.done.wait [#allocation8], 48  }
0x29e4   :  { %6619 = vsyncadd [#allocation8], 4294967248 }
0x29e5   :  { %5065 = vsyncpa [#allocation4], 1 }
0x29e6   :  { %5066 = vsyncpa [#allocation8], 1 }
0x29e7   :  { %5067 = vsyncpa [#allocation5], 1 }

</bundles_post_ra>
